<compile_context>
chip_gen: v7x
topology: tpu7x:2x2x1
jax: 0.10.0
libtpu: 0.0.40
codegen_flags: <defaults>
</compile_context>

<pallas_src>
import functools

import jax
import jax.numpy as jnp
from jax.experimental import pallas as pl
from jax.experimental.pallas import tpu as pltpu


_VMEM_SPEC = pl.BlockSpec(memory_space=pltpu.MemorySpace.VMEM)
_TM_CAP = 1024                      # max conv-matmul rows resident per block
_VMEM_LIMIT = 32 * 1024 * 1024      # safe on v5e/v6e/v7x


# ----------------------------- Pallas kernels ------------------------------

def _conv_mm_kernel(x_ref, w_ref, b_ref, o_ref):
    """One M-tile of an im2col convolution:  relu(x @ w + b)."""
    acc = jnp.dot(x_ref[...], w_ref[...], preferred_element_type=jnp.float32)
    acc = jnp.maximum(acc + b_ref[...], 0.0)
    o_ref[...] = acc.astype(o_ref.dtype)


def _head_kernel(x_ref, wfc_ref, bfc_ref, wh_ref, bh_ref,
                 policy_ref, value_ref, *, num_actions):
    """Fused fc(+relu) -> combined [policy|value] matmul -> softmax / split."""
    hidden = jnp.dot(x_ref[...], wfc_ref[...], preferred_element_type=jnp.float32)
    hidden = jnp.maximum(hidden + bfc_ref[...], 0.0)                     # (B, 256) f32
    logits = jnp.dot(hidden.astype(wh_ref.dtype), wh_ref[...],
                     preferred_element_type=jnp.float32) + bh_ref[...]   # (B, A+1) f32
    pol = logits[:, :num_actions]
    m = jnp.max(pol, axis=-1, keepdims=True)
    e = jnp.exp(pol - m)
    denom = jnp.sum(e, axis=-1, keepdims=True)
    policy_ref[...] = (e * pl.reciprocal(denom, approx=True)).astype(policy_ref.dtype)
    value_ref[...] = logits[:, num_actions:].astype(value_ref.dtype)


# --------------------------- pallas_call wrappers ---------------------------

def conv_matmul(patches, w, b):
    """relu(patches @ w + b), M-tiled parallel grid. patches: (M, K) bf16."""
    M, K = patches.shape
    N = w.shape[1]
    tm = M if M <= _TM_CAP else _TM_CAP
    grid = (pl.cdiv(M, tm),)
    return pl.pallas_call(
        _conv_mm_kernel,
        out_shape=jax.ShapeDtypeStruct((M, N), jnp.bfloat16),
        grid_spec=pltpu.PrefetchScalarGridSpec(
            num_scalar_prefetch=0,
            grid=grid,
            in_specs=[pl.BlockSpec((tm, K), lambda i: (i, 0)),
                      pl.BlockSpec((K, N), lambda i: (0, 0)),
                      pl.BlockSpec((1, N), lambda i: (0, 0))],
            out_specs=pl.BlockSpec((tm, N), lambda i: (i, 0)),
        ),
        compiler_params=pltpu.CompilerParams(
            dimension_semantics=("parallel",),
            vmem_limit_bytes=_VMEM_LIMIT,
        ),
    )(patches, w, b)


def fused_head(flat, wfc, bfc, wh, bh):
    """Linear(2592,256)+relu, then combined policy/value heads + softmax."""
    B = flat.shape[0]
    num_actions = wh.shape[1] - 1
    kernel = functools.partial(_head_kernel, num_actions=num_actions)
    return pl.pallas_call(
        kernel,
        out_shape=(jax.ShapeDtypeStruct((B, num_actions), jnp.float32),
                   jax.ShapeDtypeStruct((B, 1), jnp.float32)),
        in_specs=[_VMEM_SPEC] * 5,
        out_specs=(_VMEM_SPEC, _VMEM_SPEC),
        compiler_params=pltpu.CompilerParams(vmem_limit_bytes=_VMEM_LIMIT),
    )(flat, wfc, bfc, wh, bh)


# ------------------------------- JAX glue ----------------------------------

def _im2col_nchw(x, kh, kw, stride):
    """NCHW -> (B*OH*OW, Cin*kh*kw); K-order (c, ki, kj) = torch weight flatten."""
    B, C, H, W = x.shape
    oh = (H - kh) // stride + 1
    ow = (W - kw) // stride + 1
    cols = [x[:, :, i:i + stride * oh:stride, j:j + stride * ow:stride]
            for i in range(kh) for j in range(kw)]
    patches = jnp.stack(cols, axis=-1)              # (B, C, oh, ow, kh*kw)
    patches = patches.transpose(0, 2, 3, 1, 4)      # (B, oh, ow, C, kh*kw)
    return patches.reshape(B * oh * ow, C * kh * kw), oh, ow


def _im2col_nhwc(x, kh, kw, stride):
    """NHWC -> (B*OH*OW, kh*kw*C); K-order (ki, kj, c)."""
    B, H, W, C = x.shape
    oh = (H - kh) // stride + 1
    ow = (W - kw) // stride + 1
    cols = [x[:, i:i + stride * oh:stride, j:j + stride * ow:stride, :]
            for i in range(kh) for j in range(kw)]
    patches = jnp.stack(cols, axis=3)               # (B, oh, ow, kh*kw, C)
    return patches.reshape(B * oh * ow, kh * kw * C), oh, ow


@jax.jit
def a3c_forward(params, x):
    """x: (B, 4, 84, 84) NCHW float32 -> (policy (B, A), value (B, 1))."""
    B = x.shape[0]
    xb = x.astype(jnp.bfloat16)

    # Conv2d(4, 16, 8, stride=4) + ReLU
    p1, oh1, ow1 = _im2col_nchw(xb, 8, 8, 4)                      # (B*400, 256)
    h1 = conv_matmul(p1, params["conv1_w"], params["conv1_b"])    # (B*400, 16) bf16
    h1 = h1.reshape(B, oh1, ow1, 16)                              # NHWC (no transpose)

    # Conv2d(16, 32, 4, stride=2) + ReLU
    p2, oh2, ow2 = _im2col_nhwc(h1, 4, 4, 2)                      # (B*81, 256)
    h2 = conv_matmul(p2, params["conv2_w"], params["conv2_b"])    # (B*81, 32) bf16

    # Flatten in (oh, ow, c) order; fc weight rows were permuted to match at init,
    # so this equals PyTorch's view(B, -1) on NCHW numerically.
    flat = h2.reshape(B, oh2 * ow2 * 32)                          # (B, 2592)

    # Fused Linear(2592,256).clamp(min=0) + policy/value heads + softmax.
    policy, value = fused_head(flat, params["fc_w"], params["fc_b"],
                               params["head_w"], params["head_b"])
    return policy, value


# ------------------------------ parameters ---------------------------------

def init_torch_params(key, num_actions):
    """Random params in PyTorch nn.Module layouts (uniform +-1/sqrt(fan_in))."""
    def uniform(k, shape, fan_in):
        bound = 1.0 / jnp.sqrt(jnp.float32(fan_in))
        return jax.random.uniform(k, shape, jnp.float32, -bound, bound)

    ks = jax.random.split(key, 10)
    return {
        "conv1_w": uniform(ks[0], (16, 4, 8, 8), 4 * 8 * 8),
        "conv1_b": uniform(ks[1], (16,), 4 * 8 * 8),
        "conv2_w": uniform(ks[2], (32, 16, 4, 4), 16 * 4 * 4),
        "conv2_b": uniform(ks[3], (32,), 16 * 4 * 4),
        "fc_w": uniform(ks[4], (256, 2592), 2592),
        "fc_b": uniform(ks[5], (256,), 2592),
        "policy_w": uniform(ks[6], (num_actions, 256), 256),
        "policy_b": uniform(ks[7], (num_actions,), 256),
        "value_w": uniform(ks[8], (1, 256), 256),
        "value_b": uniform(ks[9], (1,), 256),
    }


def prepare_params(tp):
    """One-time layout prep: transposes, K-order permutes, head concat, bf16 cast."""
    num_actions = tp["policy_w"].shape[0]
    # conv1: (Cout,Cin,KH,KW) -> (K=Cin*KH*KW, Cout); K-order (c, ki, kj).
    conv1_w = tp["conv1_w"].reshape(16, 4 * 8 * 8).T.astype(jnp.bfloat16)
    # conv2: (Cout,Cin,KH,KW) -> (KH,KW,Cin,Cout) -> (K, Cout); K-order (ki, kj, c).
    conv2_w = (tp["conv2_w"].transpose(2, 3, 1, 0)
               .reshape(4 * 4 * 16, 32).astype(jnp.bfloat16))
    # fc rows reordered: PyTorch NCHW flatten (c,oh,ow) -> our NHWC flatten (oh,ow,c).
    fc_w = (tp["fc_w"].reshape(256, 32, 9, 9).transpose(0, 2, 3, 1)
            .reshape(256, 2592).T.astype(jnp.bfloat16))                     # (2592, 256)
    # policy & value heads merged into one (256, A+1) matmul.
    head_w = jnp.concatenate([tp["policy_w"], tp["value_w"]], axis=0).T.astype(jnp.bfloat16)
    head_b = jnp.concatenate([tp["policy_b"], tp["value_b"]], axis=0)
    return {
        "conv1_w": conv1_w, "conv1_b": tp["conv1_b"].reshape(1, 16).astype(jnp.float32),
        "conv2_w": conv2_w, "conv2_b": tp["conv2_b"].reshape(1, 32).astype(jnp.float32),
        "fc_w": fc_w, "fc_b": tp["fc_b"].reshape(1, 256).astype(jnp.float32),
        "head_w": head_w,
        "head_b": head_b.reshape(1, num_actions + 1).astype(jnp.float32),
    }


if __name__ == "__main__":
    num_actions = 6
    batch = 2

    key = jax.random.PRNGKey(0)
    k_params, k_x = jax.random.split(key)
    params = prepare_params(init_torch_params(k_params, num_actions))

    # Spatial size must be 84x84 so the flattened conv output is 2592
    # (hard-coded by the module's Linear(2592, 256)).
    x = jax.random.normal(k_x, (batch, 4, 84, 84), dtype=jnp.float32)

    policy, value = a3c_forward(params, x)
    jax.block_until_ready((policy, value))

    assert policy.shape == (batch, num_actions)
    assert value.shape == (batch, 1)
    assert bool(jnp.all(jnp.isfinite(policy))) and bool(jnp.all(jnp.isfinite(value)))
    # softmax rows must sum to ~1 (loose tol: bf16 MXU inputs + approx reciprocal)
    assert jnp.allclose(jnp.sum(policy, axis=-1), 1.0, atol=5e-3)

    print("KERNEL_OK")
</pallas_src>

<mosaic_0001>
module attributes {stable_mosaic.version = 11 : i64} {
  func.func @_conv_mm_kernel(%arg0: i32, %arg1: memref<800x256xbf16, #tpu.memory_space<vmem>>, %arg2: memref<256x16xbf16, #tpu.memory_space<vmem>>, %arg3: memref<1x16xf32, #tpu.memory_space<vmem>>, %arg4: memref<800x16xbf16, #tpu.memory_space<vmem>>) attributes {dimension_semantics = [#tpu.dimension_semantics<parallel>], iteration_bounds = array<i64: 1>, scalar_prefetch = 0 : i64, scratch_operands = 0 : i64, tpu.core_type = #tpu.core_type<tc>, window_params = [{transform_indices = @transform_0, window_bounds = array<i64: 800, 256>}, {pipeline_mode = #tpu.pipeline_mode<synchronous>, transform_indices = @transform_1, window_bounds = array<i64: 256, 16>}, {pipeline_mode = #tpu.pipeline_mode<synchronous>, transform_indices = @transform_2, window_bounds = array<i64: 1, 16>}, {transform_indices = @transform_3, window_bounds = array<i64: 800, 16>}]} {
    %c0 = arith.constant 0 : index
    %c0_0 = arith.constant 0 : index
    %0 = vector.load %arg1[%c0, %c0_0] : memref<800x256xbf16, #tpu.memory_space<vmem>>, vector<800x256xbf16>
    %c0_1 = arith.constant 0 : index
    %c0_2 = arith.constant 0 : index
    %1 = vector.load %arg2[%c0_1, %c0_2] : memref<256x16xbf16, #tpu.memory_space<vmem>>, vector<256x16xbf16>
    %cst = arith.constant dense<0.000000e+00> : vector<800x16xf32>
    %2 = tpu.matmul %0, %1, %cst {dimension_numbers = #tpu.dot_dimension_numbers<[1], [0], [0], [1], [0, 0, 1, 1], [], []>} : vector<800x256xbf16>, vector<256x16xbf16>, vector<800x16xf32> -> vector<800x16xf32>
    %c0_3 = arith.constant 0 : index
    %c0_4 = arith.constant 0 : index
    %3 = vector.load %arg3[%c0_3, %c0_4] : memref<1x16xf32, #tpu.memory_space<vmem>>, vector<1x16xf32>
    %4 = vector.broadcast %3 : vector<1x16xf32> to vector<800x16xf32>
    %5 = arith.addf %2, %4 : vector<800x16xf32>
    %cst_5 = arith.constant 0.000000e+00 : f32
    %6 = vector.broadcast %cst_5 : f32 to vector<800x16xf32>
    %7 = arith.maximumf %5, %6 : vector<800x16xf32>
    %8 = arith.truncf %7 : vector<800x16xf32> to vector<800x16xbf16>
    %c0_6 = arith.constant 0 : index
    %c0_7 = arith.constant 0 : index
    %9 = vector.load %arg4[%c0_6, %c0_7] : memref<800x16xbf16, #tpu.memory_space<vmem>>, vector<800x16xbf16>
    tpu.vector_store %arg4[%c0_6, %c0_7], %8 {strides = array<i32>} : memref<800x16xbf16, #tpu.memory_space<vmem>>, vector<800x16xbf16>,
    return
  }
  func.func @transform_0(%arg0: i32) -> (i32, i32) {
    %c0_i32 = arith.constant 0 : i32
    %c0_i32_0 = arith.constant 0 : i32
    return %arg0, %c0_i32 : i32, i32
  }
  func.func @transform_1(%arg0: i32) -> (i32, i32) {
    %c0_i32 = arith.constant 0 : i32
    %c0_i32_0 = arith.constant 0 : i32
    %c0_i32_1 = arith.constant 0 : i32
    return %c0_i32, %c0_i32_0 : i32, i32
  }
  func.func @transform_2(%arg0: i32) -> (i32, i32) {
    %c0_i32 = arith.constant 0 : i32
    %c0_i32_0 = arith.constant 0 : i32
    %c0_i32_1 = arith.constant 0 : i32
    return %c0_i32, %c0_i32_0 : i32, i32
  }
  func.func @transform_3(%arg0: i32) -> (i32, i32) {
    %c0_i32 = arith.constant 0 : i32
    %c0_i32_0 = arith.constant 0 : i32
    return %arg0, %c0_i32 : i32, i32
  }
}

module attributes {stable_mosaic.version = 11 : i64} {
  func.func @_conv_mm_kernel(%arg0: i32, %arg1: memref<162x256xbf16, #tpu.memory_space<vmem>>, %arg2: memref<256x32xbf16, #tpu.memory_space<vmem>>, %arg3: memref<1x32xf32, #tpu.memory_space<vmem>>, %arg4: memref<162x32xbf16, #tpu.memory_space<vmem>>) attributes {dimension_semantics = [#tpu.dimension_semantics<parallel>], iteration_bounds = array<i64: 1>, scalar_prefetch = 0 : i64, scratch_operands = 0 : i64, tpu.core_type = #tpu.core_type<tc>, window_params = [{transform_indices = @transform_0, window_bounds = array<i64: 162, 256>}, {pipeline_mode = #tpu.pipeline_mode<synchronous>, transform_indices = @transform_1, window_bounds = array<i64: 256, 32>}, {pipeline_mode = #tpu.pipeline_mode<synchronous>, transform_indices = @transform_2, window_bounds = array<i64: 1, 32>}, {transform_indices = @transform_3, window_bounds = array<i64: 162, 32>}]} {
    %c0 = arith.constant 0 : index
    %c0_0 = arith.constant 0 : index
    %0 = vector.load %arg1[%c0, %c0_0] : memref<162x256xbf16, #tpu.memory_space<vmem>>, vector<162x256xbf16>
    %c0_1 = arith.constant 0 : index
    %c0_2 = arith.constant 0 : index
    %1 = vector.load %arg2[%c0_1, %c0_2] : memref<256x32xbf16, #tpu.memory_space<vmem>>, vector<256x32xbf16>
    %cst = arith.constant dense<0.000000e+00> : vector<162x32xf32>
    %2 = tpu.matmul %0, %1, %cst {dimension_numbers = #tpu.dot_dimension_numbers<[1], [0], [0], [1], [0, 0, 1, 1], [], []>} : vector<162x256xbf16>, vector<256x32xbf16>, vector<162x32xf32> -> vector<162x32xf32>
    %c0_3 = arith.constant 0 : index
    %c0_4 = arith.constant 0 : index
    %3 = vector.load %arg3[%c0_3, %c0_4] : memref<1x32xf32, #tpu.memory_space<vmem>>, vector<1x32xf32>
    %4 = vector.broadcast %3 : vector<1x32xf32> to vector<162x32xf32>
    %5 = arith.addf %2, %4 : vector<162x32xf32>
    %cst_5 = arith.constant 0.000000e+00 : f32
    %6 = vector.broadcast %cst_5 : f32 to vector<162x32xf32>
    %7 = arith.maximumf %5, %6 : vector<162x32xf32>
    %8 = arith.truncf %7 : vector<162x32xf32> to vector<162x32xbf16>
    %c0_6 = arith.constant 0 : index
    %c0_7 = arith.constant 0 : index
    %9 = vector.load %arg4[%c0_6, %c0_7] : memref<162x32xbf16, #tpu.memory_space<vmem>>, vector<162x32xbf16>
    tpu.vector_store %arg4[%c0_6, %c0_7], %8 {strides = array<i32>} : memref<162x32xbf16, #tpu.memory_space<vmem>>, vector<162x32xbf16>,
    return
  }
  func.func @transform_0(%arg0: i32) -> (i32, i32) {
    %c0_i32 = arith.constant 0 : i32
    %c0_i32_0 = arith.constant 0 : i32
    return %arg0, %c0_i32 : i32, i32
  }
  func.func @transform_1(%arg0: i32) -> (i32, i32) {
    %c0_i32 = arith.constant 0 : i32
    %c0_i32_0 = arith.constant 0 : i32
    %c0_i32_1 = arith.constant 0 : i32
    return %c0_i32, %c0_i32_0 : i32, i32
  }
  func.func @transform_2(%arg0: i32) -> (i32, i32) {
    %c0_i32 = arith.constant 0 : i32
    %c0_i32_0 = arith.constant 0 : i32
    %c0_i32_1 = arith.constant 0 : i32
    return %c0_i32, %c0_i32_0 : i32, i32
  }
  func.func @transform_3(%arg0: i32) -> (i32, i32) {
    %c0_i32 = arith.constant 0 : i32
    %c0_i32_0 = arith.constant 0 : i32
    return %arg0, %c0_i32 : i32, i32
  }
}

module attributes {stable_mosaic.version = 11 : i64} {
  func.func @_head_kernel(%arg0: memref<2x2592xbf16, #tpu.memory_space<vmem>>, %arg1: memref<2592x256xbf16, #tpu.memory_space<vmem>>, %arg2: memref<1x256xf32, #tpu.memory_space<vmem>>, %arg3: memref<256x7xbf16, #tpu.memory_space<vmem>>, %arg4: memref<1x7xf32, #tpu.memory_space<vmem>>, %arg5: memref<2x6xf32, #tpu.memory_space<vmem>>, %arg6: memref<2x1xf32, #tpu.memory_space<vmem>>) attributes {dimension_semantics = [], scalar_prefetch = 0 : i64, scratch_operands = 0 : i64, tpu.core_type = #tpu.core_type<tc>} {
    %c0 = arith.constant 0 : index
    %c0_0 = arith.constant 0 : index
    %0 = vector.load %arg0[%c0, %c0_0] : memref<2x2592xbf16, #tpu.memory_space<vmem>>, vector<2x2592xbf16>
    %c0_1 = arith.constant 0 : index
    %c0_2 = arith.constant 0 : index
    %1 = vector.load %arg1[%c0_1, %c0_2] : memref<2592x256xbf16, #tpu.memory_space<vmem>>, vector<2592x256xbf16>
    %cst = arith.constant dense<0.000000e+00> : vector<2x256xf32>
    %2 = tpu.matmul %0, %1, %cst {dimension_numbers = #tpu.dot_dimension_numbers<[1], [0], [0], [1], [0, 0, 1, 1], [], []>} : vector<2x2592xbf16>, vector<2592x256xbf16>, vector<2x256xf32> -> vector<2x256xf32>
    %c0_3 = arith.constant 0 : index
    %c0_4 = arith.constant 0 : index
    %3 = vector.load %arg2[%c0_3, %c0_4] : memref<1x256xf32, #tpu.memory_space<vmem>>, vector<1x256xf32>
    %4 = vector.broadcast %3 : vector<1x256xf32> to vector<2x256xf32>
    %5 = arith.addf %2, %4 : vector<2x256xf32>
    %cst_5 = arith.constant 0.000000e+00 : f32
    %6 = vector.broadcast %cst_5 : f32 to vector<2x256xf32>
    %7 = arith.maximumf %5, %6 : vector<2x256xf32>
    %8 = arith.truncf %7 : vector<2x256xf32> to vector<2x256xbf16>
    %c0_6 = arith.constant 0 : index
    %c0_7 = arith.constant 0 : index
    %9 = vector.load %arg3[%c0_6, %c0_7] : memref<256x7xbf16, #tpu.memory_space<vmem>>, vector<256x7xbf16>
    %cst_8 = arith.constant dense<0.000000e+00> : vector<2x7xf32>
    %10 = tpu.matmul %8, %9, %cst_8 {dimension_numbers = #tpu.dot_dimension_numbers<[1], [0], [0], [1], [0, 0, 1, 1], [], []>} : vector<2x256xbf16>, vector<256x7xbf16>, vector<2x7xf32> -> vector<2x7xf32>
    %c0_9 = arith.constant 0 : index
    %c0_10 = arith.constant 0 : index
    %11 = vector.load %arg4[%c0_9, %c0_10] : memref<1x7xf32, #tpu.memory_space<vmem>>, vector<1x7xf32>
    %12 = vector.broadcast %11 : vector<1x7xf32> to vector<2x7xf32>
    %13 = arith.addf %10, %12 : vector<2x7xf32>
    %14 = vector.extract_strided_slice %13 {offsets = [0, 0], sizes = [2, 6], strides = [1, 1]} : vector<2x7xf32> to vector<2x6xf32>
    %cst_11 = arith.constant dense<0xFF800000> : vector<2xf32>
    %15 = vector.multi_reduction <maximumf>, %14, %cst_11 [1] : vector<2x6xf32> to vector<2xf32>
    %16 = vector.shape_cast %15 : vector<2xf32> to vector<2x1xf32>
    %17 = vector.broadcast %16 : vector<2x1xf32> to vector<2x6xf32>
    %18 = arith.subf %14, %17 : vector<2x6xf32>
    %19 = math.exp %18 : vector<2x6xf32>
    %cst_12 = arith.constant dense<0.000000e+00> : vector<2xf32>
    %20 = vector.multi_reduction <add>, %19, %cst_12 [1] : vector<2x6xf32> to vector<2xf32>
    %21 = vector.shape_cast %20 : vector<2xf32> to vector<2x1xf32>
    %22 = tpu.reciprocal %21 {approx = true} : vector<2x1xf32> -> vector<2x1xf32>
    %23 = vector.broadcast %22 : vector<2x1xf32> to vector<2x6xf32>
    %24 = arith.mulf %19, %23 : vector<2x6xf32>
    %c0_13 = arith.constant 0 : index
    %c0_14 = arith.constant 0 : index
    %25 = vector.load %arg5[%c0_13, %c0_14] : memref<2x6xf32, #tpu.memory_space<vmem>>, vector<2x6xf32>
    tpu.vector_store %arg5[%c0_13, %c0_14], %24 {strides = array<i32>} : memref<2x6xf32, #tpu.memory_space<vmem>>, vector<2x6xf32>,
    %26 = vector.extract_strided_slice %13 {offsets = [0, 6], sizes = [2, 1], strides = [1, 1]} : vector<2x7xf32> to vector<2x1xf32>
    %c0_15 = arith.constant 0 : index
    %c0_16 = arith.constant 0 : index
    %27 = vector.load %arg6[%c0_15, %c0_16] : memref<2x1xf32, #tpu.memory_space<vmem>>, vector<2x1xf32>
    tpu.vector_store %arg6[%c0_15, %c0_16], %26 {strides = array<i32>} : memref<2x1xf32, #tpu.memory_space<vmem>>, vector<2x1xf32>,
    return
  }
}

</mosaic_0001>

<bundles_post_ra>
// kernel: a3c_forward.3
= control target key start
LH: loop header
LB: loop body
LE: loop exit
PB: predicated region body
PF: predicated region fallthrough
CT: control target
= control target key end

     0   :  { %v2305_v0 = vmov 0   ;;  %vm1683_vm0 = vcmask 125952   ;;  %s3216_s1 = inlined_call_operand.vmem [shape: bf16[256,16], index: 1, kind: input, shape index: {}]   ;;  %s3217_s0 = inlined_call_operand.vmem [shape: bf16[800,256], index: 0, kind: input, shape index: {}]   ;;  %s3218_s2 = inlined_call_operand.vmem [shape: f32[1,16], index: 2, kind: input, shape index: {}]   ;;  %s3219_s3 = inlined_call_operand.vmem [shape: bf16[800,16], index: 3, kind: output, shape index: {}]  }
   0x1   :  { %750 = vmatprep.subr.bf16.mxu0 %v2305_v0  ;;  %2105 = vmatprep.subr.bf16.mxu1 %v2305_v0  ;;  %v2138_v1 = vld [vmem:[%s3216_s1] sm:$0xff]   ;;  %v2139_v2 = vld [vmem:[%s3216_s1 + $0x8] sm:$0xff]   ;;  %v2140_v3 = vld [vmem:[%s3216_s1 + $0x10] sm:$0xff]  }
   0x2   :  { %751 = vmatpush1.bf16.msra.mxu0 %v2138_v1  ;;  %2121 = vmatpush1.bf16.msra.mxu1 %v2138_v1  ;;  %v2141_v4 = vld [vmem:[%s3216_s1 + $0x18] sm:$0xff]   ;;  %v2142_v5 = vld [vmem:[%s3216_s1 + $0x20] sm:$0xff]   ;;  %v2143_v7 = vld [vmem:[%s3216_s1 + $0x28] sm:$0xff]  }
   0x3   :  { %752 = vmatprep.subr.bf16.mxu0 %v2305_v0  ;;  %2106 = vmatprep.subr.bf16.mxu1 %v2305_v0  ;;  %v2156_v6 = vld [vmem:[%s3217_s0 + $0x4] ss:$8 sps:$4 sm:$0xff]   ;;  %v2159_v8 = vld [vmem:[%s3217_s0 + $0x194] ss:$8 sps:$4 sm:$0xff]   ;;  %v2154_v19 = vld [vmem:[%s3217_s0] ss:$8 sps:$4 sm:$0xff]  }
   0x4   :  { %782 = vmatprep.mubr.bf16.mxu0 %v2156_v6  ;;  %982 = vmatprep.mubr.bf16.mxu1 %v2159_v8  ;;  %v2144_v9 = vld [vmem:[%s3216_s1 + $0x30] sm:$0xff]   ;;  %v2145_v10 = vld [vmem:[%s3216_s1 + $0x38] sm:$0xff]   ;;  %v2146_v11 = vld [vmem:[%s3216_s1 + $0x40] sm:$0xff]  }
   0x5   :  { %v2147_v12 = vld [vmem:[%s3216_s1 + $0x48] sm:$0xff]   ;;  %v2148_v13 = vld [vmem:[%s3216_s1 + $0x50] sm:$0xff]   ;;  %v2149_v14 = vld [vmem:[%s3216_s1 + $0x58] sm:$0xff]  }
   0x6   :  { %753 = vmatpush1.bf16.msra.mxu0 %v2139_v2  ;;  %2122 = vmatpush1.bf16.msra.mxu1 %v2139_v2  ;;  %v2150_v15 = vld [vmem:[%s3216_s1 + $0x60] sm:$0xff]   ;;  %v2151_v16 = vld [vmem:[%s3216_s1 + $0x68] sm:$0xff]   ;;  %v2152_v17 = vld [vmem:[%s3216_s1 + $0x70] sm:$0xff]  }
   0x7   :  { %754 = vmatprep.subr.bf16.mxu0 %v2305_v0  ;;  %2107 = vmatprep.subr.bf16.mxu1 %v2305_v0  ;;  %v2153_v18 = vld [vmem:[%s3216_s1 + $0x78] sm:$0xff]   ;;  %v2162_v22 = vld [vmem:[%s3217_s0 + $0x1a4] ss:$8 sps:$4 sm:$0xff]   ;;  %v2165_v24 = vld [vmem:[%s3217_s0 + $0x1a0] ss:$8 sps:$4 sm:$0xff]  }
   0x8   :  { %v2157_v20 = vld [vmem:[%s3217_s0 + $0x190] ss:$8 sps:$4 sm:$0xff]   ;;  %v2160_v21 = vld [vmem:[%s3217_s0 + $0x14] ss:$8 sps:$4 sm:$0xff]   ;;  %v2166_v25 = vld [vmem:[%s3217_s0 + $0x24] ss:$8 sps:$4 sm:$0xff]  }
   0x9   :  { %v2164_v23 = vld [vmem:[%s3217_s0 + $0x10] ss:$8 sps:$4 sm:$0xff]   ;;  %v2168_v26 = vld [vmem:[%s3217_s0 + $0x1b4] ss:$8 sps:$4 sm:$0xff]   ;;  %v2170_v27 = vld [vmem:[%s3217_s0 + $0x20] ss:$8 sps:$4 sm:$0xff]  }
   0xa   :  { %755 = vmatpush1.bf16.msra.mxu0 %v2140_v3  ;;  %2123 = vmatpush1.bf16.msra.mxu1 %v2140_v3  ;;  %v2171_v28 = vld [vmem:[%s3217_s0 + $0x1b0] ss:$8 sps:$4 sm:$0xff]   ;;  %v2172_v29 = vld [vmem:[%s3217_s0 + $0x34] ss:$8 sps:$4 sm:$0xff]   ;;  %v2174_v30 = vld [vmem:[%s3217_s0 + $0x1c4] ss:$8 sps:$4 sm:$0xff]  }
   0xb   :  { %756 = vmatprep.subr.bf16.mxu0 %v2305_v0  ;;  %2108 = vmatprep.subr.bf16.mxu1 %v2305_v0  ;;  %v2176_v31 = vld [vmem:[%s3217_s0 + $0x30] ss:$8 sps:$4 sm:$0xff]   ;;  %v2177_v32 = vld [vmem:[%s3217_s0 + $0x1c0] ss:$8 sps:$4 sm:$0xff]   ;;  %v2178_v33 = vld [vmem:[%s3217_s0 + $0x44] ss:$8 sps:$4 sm:$0xff]  }
   0xc   :  { %v2180_v34 = vld [vmem:[%s3217_s0 + $0x1d4] ss:$8 sps:$4 sm:$0xff]   ;;  %v2182_v35 = vld [vmem:[%s3217_s0 + $0x40] ss:$8 sps:$4 sm:$0xff]   ;;  %v2183_v36 = vld [vmem:[%s3217_s0 + $0x1d0] ss:$8 sps:$4 sm:$0xff]  }
   0xd   :  { %v2184_v37 = vld [vmem:[%s3217_s0 + $0x54] ss:$8 sps:$4 sm:$0xff]   ;;  %v2186_v38 = vld [vmem:[%s3217_s0 + $0x1e4] ss:$8 sps:$4 sm:$0xff]   ;;  %v2188_v39 = vld [vmem:[%s3217_s0 + $0x50] ss:$8 sps:$4 sm:$0xff]  }
   0xe   :  { %757 = vmatpush1.bf16.msra.mxu0 %v2141_v4  ;;  %2124 = vmatpush1.bf16.msra.mxu1 %v2141_v4  ;;  %v2189_v40 = vld [vmem:[%s3217_s0 + $0x1e0] ss:$8 sps:$4 sm:$0xff]   ;;  %v2190_v41 = vld [vmem:[%s3217_s0 + $0x64] ss:$8 sps:$4 sm:$0xff]   ;;  %v2192_v42 = vld [vmem:[%s3217_s0 + $0x1f4] ss:$8 sps:$4 sm:$0xff]  }
   0xf   :  { %758 = vmatprep.subr.bf16.mxu0 %v2305_v0  ;;  %2109 = vmatprep.subr.bf16.mxu1 %v2305_v0  ;;  %v2194_v43 = vld [vmem:[%s3217_s0 + $0x60] ss:$8 sps:$4 sm:$0xff]   ;;  %v2195_v44 = vld [vmem:[%s3217_s0 + $0x1f0] ss:$8 sps:$4 sm:$0xff]   ;;  %v2196_v45 = vld [vmem:[%s3217_s0 + $0x74] ss:$8 sps:$4 sm:$0xff]  }
  0x10   :  { %v2198_v46 = vld [vmem:[%s3217_s0 + $0x204] ss:$8 sps:$4 sm:$0xff]   ;;  %v2200_v47 = vld [vmem:[%s3217_s0 + $0x70] ss:$8 sps:$4 sm:$0xff]   ;;  %v2201_v48 = vld [vmem:[%s3217_s0 + $0x200] ss:$8 sps:$4 sm:$0xff]  }
  0x11   :  { %v2202_v49 = vld [vmem:[%s3217_s0 + $0x84] ss:$8 sps:$4 sm:$0xff]   ;;  %v2204_v50 = vld [vmem:[%s3217_s0 + $0x214] ss:$8 sps:$4 sm:$0xff]   ;;  %v2206_v51 = vld [vmem:[%s3217_s0 + $0x80] ss:$8 sps:$4 sm:$0xff]  }
  0x12   :  { %759 = vmatpush1.bf16.msra.mxu0 %v2142_v5  ;;  %2125 = vmatpush1.bf16.msra.mxu1 %v2142_v5  ;;  %v2207_v52 = vld [vmem:[%s3217_s0 + $0x210] ss:$8 sps:$4 sm:$0xff]   ;;  %v2208_v53 = vld [vmem:[%s3217_s0 + $0x94] ss:$8 sps:$4 sm:$0xff]   ;;  %v2210_v54 = vld [vmem:[%s3217_s0 + $0x224] ss:$8 sps:$4 sm:$0xff]  }
  0x13   :  { %760 = vmatprep.subr.bf16.mxu0 %v2305_v0  ;;  %2110 = vmatprep.subr.bf16.mxu1 %v2305_v0  ;;  %v2212_v55 = vld [vmem:[%s3217_s0 + $0x90] ss:$8 sps:$4 sm:$0xff]   ;;  %v2213_v56 = vld [vmem:[%s3217_s0 + $0x220] ss:$8 sps:$4 sm:$0xff]   ;;  %v2214_v57 = vld [vmem:[%s3217_s0 + $0xa4] ss:$8 sps:$4 sm:$0xff]  }
  0x14   :  { %v2216_v58 = vld [vmem:[%s3217_s0 + $0x234] ss:$8 sps:$4 sm:$0xff]   ;;  %v2218_v59 = vld [vmem:[%s3217_s0 + $0xa0] ss:$8 sps:$4 sm:$0xff]   ;;  %v2219_v60 = vld [vmem:[%s3217_s0 + $0x230] ss:$8 sps:$4 sm:$0xff]  }
  0x15   :  { %v2220_v61 = vld [vmem:[%s3217_s0 + $0xb4] ss:$8 sps:$4 sm:$0xff]   ;;  %v2222_v62 = vld [vmem:[%s3217_s0 + $0x244] ss:$8 sps:$4 sm:$0xff]   ;;  %v2224_v63 = vld [vmem:[%s3217_s0 + $0xb0] ss:$8 sps:$4 sm:$0xff]  }
  0x16   :  { %761 = vmatpush1.bf16.msra.mxu0 %v2143_v7  ;;  %2126 = vmatpush1.bf16.msra.mxu1 %v2143_v7  ;;  %v2226_v1 = vld [vmem:[%s3217_s0 + $0xc4] ss:$8 sps:$4 sm:$0xff]   ;;  %v2228_v2 = vld [vmem:[%s3217_s0 + $0x254] ss:$8 sps:$4 sm:$0xff]   ;;  %v2230_v3 = vld [vmem:[%s3217_s0 + $0xc0] ss:$8 sps:$4 sm:$0xff]  }
  0x17   :  { %762 = vmatprep.subr.bf16.mxu0 %v2305_v0  ;;  %2111 = vmatprep.subr.bf16.mxu1 %v2305_v0  ;;  %v2231_v4 = vld [vmem:[%s3217_s0 + $0x250] ss:$8 sps:$4 sm:$0xff]   ;;  %v2232_v5 = vld [vmem:[%s3217_s0 + $0xd4] ss:$8 sps:$4 sm:$0xff]   ;;  %v2234_v6 = vld [vmem:[%s3217_s0 + $0x264] ss:$8 sps:$4 sm:$0xff]  }
  0x18   :  { %v2236_v7 = vld [vmem:[%s3217_s0 + $0xd0] ss:$8 sps:$4 sm:$0xff]   ;;  %v2237_v8 = vld [vmem:[%s3217_s0 + $0x260] ss:$8 sps:$4 sm:$0xff]  }
  0x1a   :  { %763 = vmatpush1.bf16.msra.mxu0 %v2144_v9  ;;  %2127 = vmatpush1.bf16.msra.mxu1 %v2144_v9  ;;  %v2238_v9 = vld [vmem:[%s3217_s0 + $0xe4] ss:$8 sps:$4 sm:$0xff]  }
  0x1b   :  { %764 = vmatprep.subr.bf16.mxu0 %v2305_v0  ;;  %2112 = vmatprep.subr.bf16.mxu1 %v2305_v0 }
  0x1e   :  { %765 = vmatpush1.bf16.msra.mxu0 %v2145_v10  ;;  %2128 = vmatpush1.bf16.msra.mxu1 %v2145_v10  ;;  %v2240_v10 = vld [vmem:[%s3217_s0 + $0x274] ss:$8 sps:$4 sm:$0xff]  }
  0x1f   :  { %766 = vmatprep.subr.bf16.mxu0 %v2305_v0  ;;  %2113 = vmatprep.subr.bf16.mxu1 %v2305_v0 }
  0x22   :  { %767 = vmatpush1.bf16.msra.mxu0 %v2146_v11  ;;  %2129 = vmatpush1.bf16.msra.mxu1 %v2146_v11  ;;  %v2242_v11 = vld [vmem:[%s3217_s0 + $0xe0] ss:$8 sps:$4 sm:$0xff]  }
  0x23   :  { %768 = vmatprep.subr.bf16.mxu0 %v2305_v0  ;;  %2114 = vmatprep.subr.bf16.mxu1 %v2305_v0 }
  0x26   :  { %769 = vmatpush1.bf16.msra.mxu0 %v2147_v12  ;;  %2130 = vmatpush1.bf16.msra.mxu1 %v2147_v12  ;;  %v2243_v12 = vld [vmem:[%s3217_s0 + $0x270] ss:$8 sps:$4 sm:$0xff]  }
  0x27   :  { %770 = vmatprep.subr.bf16.mxu0 %v2305_v0  ;;  %2115 = vmatprep.subr.bf16.mxu1 %v2305_v0 }
  0x2a   :  { %771 = vmatpush1.bf16.msra.mxu0 %v2148_v13  ;;  %2131 = vmatpush1.bf16.msra.mxu1 %v2148_v13  ;;  %v2244_v13 = vld [vmem:[%s3217_s0 + $0xf4] ss:$8 sps:$4 sm:$0xff]  }
  0x2b   :  { %772 = vmatprep.subr.bf16.mxu0 %v2305_v0  ;;  %2116 = vmatprep.subr.bf16.mxu1 %v2305_v0 }
  0x2e   :  { %773 = vmatpush1.bf16.msra.mxu0 %v2149_v14  ;;  %2132 = vmatpush1.bf16.msra.mxu1 %v2149_v14  ;;  %v2246_v14 = vld [vmem:[%s3217_s0 + $0x284] ss:$8 sps:$4 sm:$0xff]  }
  0x2f   :  { %774 = vmatprep.subr.bf16.mxu0 %v2305_v0  ;;  %2117 = vmatprep.subr.bf16.mxu1 %v2305_v0 }
  0x32   :  { %775 = vmatpush1.bf16.msra.mxu0 %v2150_v15  ;;  %2133 = vmatpush1.bf16.msra.mxu1 %v2150_v15  ;;  %v2248_v15 = vld [vmem:[%s3217_s0 + $0xf0] ss:$8 sps:$4 sm:$0xff]  }
  0x33   :  { %776 = vmatprep.subr.bf16.mxu0 %v2305_v0  ;;  %2118 = vmatprep.subr.bf16.mxu1 %v2305_v0 }
  0x36   :  { %777 = vmatpush1.bf16.msra.mxu0 %v2151_v16  ;;  %2134 = vmatpush1.bf16.msra.mxu1 %v2151_v16  ;;  %v2249_v16 = vld [vmem:[%s3217_s0 + $0x280] ss:$8 sps:$4 sm:$0xff]  }
  0x37   :  { %778 = vmatprep.subr.bf16.mxu0 %v2305_v0  ;;  %2119 = vmatprep.subr.bf16.mxu1 %v2305_v0 }
  0x3a   :  { %779 = vmatpush1.bf16.msra.mxu0 %v2152_v17  ;;  %2135 = vmatpush1.bf16.msra.mxu1 %v2152_v17  ;;  %v2250_v17 = vld [vmem:[%s3217_s0 + $0x104] ss:$8 sps:$4 sm:$0xff]  }
  0x3b   :  { %780 = vmatprep.subr.bf16.mxu0 %v2305_v0  ;;  %2120 = vmatprep.subr.bf16.mxu1 %v2305_v0  ;;  %v2225_v0 = vld [vmem:[%s3217_s0 + $0x240] ss:$8 sps:$4 sm:$0xff]  }
  0x3e   :  { %781 = vmatpush1.bf16.msra.mxu0 %v2153_v18  ;;  %2136 = vmatpush1.bf16.msra.mxu1 %v2153_v18  ;;  %v2252_v18 = vld [vmem:[%s3217_s0 + $0x294] ss:$8 sps:$4 sm:$0xff]  }
  0x41   :  { %783 = vmatmul.mubr.bf16.vlgmr.msra.gmra.mrb[0].mxu0 %v2154_v19  ;;  %983 = vmatmul.mubr.bf16.vlgmr.msra.gmra.mrb[0].mxu1 %v2157_v20  ;;  %v2254_v19 = vld [vmem:[%s3217_s0 + $0x100] ss:$8 sps:$4 sm:$0xff]   ;;  %v2255_v20 = vld [vmem:[%s3217_s0 + $0x290] ss:$8 sps:$4 sm:$0xff]  }
  0x42   :  { %790 = vmatprep.mubr.bf16.mxu0 %v2160_v21  ;;  %990 = vmatprep.mubr.bf16.mxu1 %v2162_v22  ;;  %v2256_v21 = vld [vmem:[%s3217_s0 + $0x114] ss:$8 sps:$4 sm:$0xff]   ;;  %v2258_v22 = vld [vmem:[%s3217_s0 + $0x2a4] ss:$8 sps:$4 sm:$0xff]  }
  0x49   :  { %791 = vmatmul.mubr.bf16.gmra.mrb[4].mxu0 %v2164_v23  ;;  %991 = vmatmul.mubr.bf16.gmra.mrb[4].mxu1 %v2165_v24  ;;  %v2260_v23 = vld [vmem:[%s3217_s0 + $0x110] ss:$8 sps:$4 sm:$0xff]   ;;  %v2261_v24 = vld [vmem:[%s3217_s0 + $0x2a0] ss:$8 sps:$4 sm:$0xff]  }
  0x4a   :  { %798 = vmatprep.mubr.bf16.mxu0 %v2166_v25  ;;  %998 = vmatprep.mubr.bf16.mxu1 %v2168_v26  ;;  %v2262_v25 = vld [vmem:[%s3217_s0 + $0x124] ss:$8 sps:$4 sm:$0xff]   ;;  %v2264_v26 = vld [vmem:[%s3217_s0 + $0x2b4] ss:$8 sps:$4 sm:$0xff]  }
  0x51   :  { %799 = vmatmul.mubr.bf16.gmra.mrb[8].mxu0 %v2170_v27  ;;  %999 = vmatmul.mubr.bf16.gmra.mrb[8].mxu1 %v2171_v28  ;;  %v2266_v27 = vld [vmem:[%s3217_s0 + $0x120] ss:$8 sps:$4 sm:$0xff]   ;;  %v2267_v28 = vld [vmem:[%s3217_s0 + $0x2b0] ss:$8 sps:$4 sm:$0xff]  }
  0x52   :  { %806 = vmatprep.mubr.bf16.mxu0 %v2172_v29  ;;  %1006 = vmatprep.mubr.bf16.mxu1 %v2174_v30  ;;  %v2268_v29 = vld [vmem:[%s3217_s0 + $0x134] ss:$8 sps:$4 sm:$0xff]   ;;  %v2270_v30 = vld [vmem:[%s3217_s0 + $0x2c4] ss:$8 sps:$4 sm:$0xff]  }
  0x59   :  { %807 = vmatmul.mubr.bf16.gmra.mrb[12].mxu0 %v2176_v31  ;;  %1007 = vmatmul.mubr.bf16.gmra.mrb[12].mxu1 %v2177_v32  ;;  %v2272_v31 = vld [vmem:[%s3217_s0 + $0x130] ss:$8 sps:$4 sm:$0xff]   ;;  %v2273_v32 = vld [vmem:[%s3217_s0 + $0x2c0] ss:$8 sps:$4 sm:$0xff]  }
  0x5a   :  { %814 = vmatprep.mubr.bf16.mxu0 %v2178_v33  ;;  %1014 = vmatprep.mubr.bf16.mxu1 %v2180_v34  ;;  %v2274_v33 = vld [vmem:[%s3217_s0 + $0x144] ss:$8 sps:$4 sm:$0xff]   ;;  %v2276_v34 = vld [vmem:[%s3217_s0 + $0x2d4] ss:$8 sps:$4 sm:$0xff]  }
  0x61   :  { %815 = vmatmul.mubr.bf16.gmra.mrb[16].mxu0 %v2182_v35  ;;  %1015 = vmatmul.mubr.bf16.gmra.mrb[16].mxu1 %v2183_v36  ;;  %v2278_v35 = vld [vmem:[%s3217_s0 + $0x140] ss:$8 sps:$4 sm:$0xff]   ;;  %v2279_v36 = vld [vmem:[%s3217_s0 + $0x2d0] ss:$8 sps:$4 sm:$0xff]  }
  0x62   :  { %822 = vmatprep.mubr.bf16.mxu0 %v2184_v37  ;;  %1022 = vmatprep.mubr.bf16.mxu1 %v2186_v38  ;;  %v2280_v37 = vld [vmem:[%s3217_s0 + $0x154] ss:$8 sps:$4 sm:$0xff]   ;;  %v2282_v38 = vld [vmem:[%s3217_s0 + $0x2e4] ss:$8 sps:$4 sm:$0xff]  }
  0x69   :  { %823 = vmatmul.mubr.bf16.gmra.mrb[20].mxu0 %v2188_v39  ;;  %1023 = vmatmul.mubr.bf16.gmra.mrb[20].mxu1 %v2189_v40  ;;  %v2284_v39 = vld [vmem:[%s3217_s0 + $0x150] ss:$8 sps:$4 sm:$0xff]   ;;  %v2285_v40 = vld [vmem:[%s3217_s0 + $0x2e0] ss:$8 sps:$4 sm:$0xff]  }
  0x6a   :  { %830 = vmatprep.mubr.bf16.mxu0 %v2190_v41  ;;  %1030 = vmatprep.mubr.bf16.mxu1 %v2192_v42  ;;  %v2286_v41 = vld [vmem:[%s3217_s0 + $0x164] ss:$8 sps:$4 sm:$0xff]   ;;  %v2288_v42 = vld [vmem:[%s3217_s0 + $0x2f4] ss:$8 sps:$4 sm:$0xff]  }
  0x71   :  { %831 = vmatmul.mubr.bf16.gmra.mrb[24].mxu0 %v2194_v43  ;;  %1031 = vmatmul.mubr.bf16.gmra.mrb[24].mxu1 %v2195_v44  ;;  %v2290_v43 = vld [vmem:[%s3217_s0 + $0x160] ss:$8 sps:$4 sm:$0xff]   ;;  %v2291_v44 = vld [vmem:[%s3217_s0 + $0x2f0] ss:$8 sps:$4 sm:$0xff]  }
  0x72   :  { %838 = vmatprep.mubr.bf16.mxu0 %v2196_v45  ;;  %1038 = vmatprep.mubr.bf16.mxu1 %v2198_v46  ;;  %v2292_v45 = vld [vmem:[%s3217_s0 + $0x174] ss:$8 sps:$4 sm:$0xff]   ;;  %v2294_v46 = vld [vmem:[%s3217_s0 + $0x304] ss:$8 sps:$4 sm:$0xff]  }
  0x79   :  { %839 = vmatmul.mubr.bf16.gmra.mrb[28].mxu0 %v2200_v47  ;;  %1039 = vmatmul.mubr.bf16.gmra.mrb[28].mxu1 %v2201_v48  ;;  %v2296_v47 = vld [vmem:[%s3217_s0 + $0x170] ss:$8 sps:$4 sm:$0xff]   ;;  %v2297_v48 = vld [vmem:[%s3217_s0 + $0x300] ss:$8 sps:$4 sm:$0xff]  }
  0x7a   :  { %846 = vmatprep.mubr.bf16.mxu0 %v2202_v49  ;;  %1046 = vmatprep.mubr.bf16.mxu1 %v2204_v50  ;;  %v2298_v49 = vld [vmem:[%s3217_s0 + $0x184] ss:$8 sps:$4 sm:$0xff]   ;;  %v2300_v50 = vld [vmem:[%s3217_s0 + $0x314] ss:$8 sps:$4 sm:$0xff]  }
  0x81   :  { %847 = vmatmul.mubr.bf16.gmra.mrb[32].mxu0 %v2206_v51  ;;  %1047 = vmatmul.mubr.bf16.gmra.mrb[32].mxu1 %v2207_v52  ;;  %v2302_v51 = vld [vmem:[%s3217_s0 + $0x180] ss:$8 sps:$4 sm:$0xff]   ;;  %v2303_v52 = vld [vmem:[%s3217_s0 + $0x310] ss:$8 sps:$4 sm:$0xff]  }
  0x82   :  { %854 = vmatprep.mubr.bf16.mxu0 %v2208_v53  ;;  %1054 = vmatprep.mubr.bf16.mxu1 %v2210_v54  ;;  %v2709_v53 = vld [vmem:[%s3218_s2] ss:$0 sm:$0xff] }
  0x89   :  { %855 = vmatmul.mubr.bf16.gmra.mrb[36].mxu0 %v2212_v55  ;;  %1055 = vmatmul.mubr.bf16.gmra.mrb[36].mxu1 %v2213_v56 }
  0x8a   :  { %862 = vmatprep.mubr.bf16.mxu0 %v2214_v57  ;;  %1062 = vmatprep.mubr.bf16.mxu1 %v2216_v58 }
  0x91   :  { %863 = vmatmul.mubr.bf16.gmra.mrb[40].mxu0 %v2218_v59  ;;  %1063 = vmatmul.mubr.bf16.gmra.mrb[40].mxu1 %v2219_v60 }
  0x92   :  { %870 = vmatprep.mubr.bf16.mxu0 %v2220_v61  ;;  %1070 = vmatprep.mubr.bf16.mxu1 %v2222_v62 }
  0x99   :  { %871 = vmatmul.mubr.bf16.gmra.mrb[44].mxu0 %v2224_v63  ;;  %1071 = vmatmul.mubr.bf16.gmra.mrb[44].mxu1 %v2225_v0 }
  0x9a   :  { %878 = vmatprep.mubr.bf16.mxu0 %v2226_v1  ;;  %1078 = vmatprep.mubr.bf16.mxu1 %v2228_v2 }
  0xa1   :  { %879 = vmatmul.mubr.bf16.gmra.mrb[48].mxu0 %v2230_v3  ;;  %1079 = vmatmul.mubr.bf16.gmra.mrb[48].mxu1 %v2231_v4 }
  0xa2   :  { %886 = vmatprep.mubr.bf16.mxu0 %v2232_v5  ;;  %1086 = vmatprep.mubr.bf16.mxu1 %v2234_v6 }
  0xa9   :  { %887 = vmatmul.mubr.bf16.gmra.mrb[52].mxu0 %v2236_v7  ;;  %1087 = vmatmul.mubr.bf16.gmra.mrb[52].mxu1 %v2237_v8 }
  0xaa   :  { %894 = vmatprep.mubr.bf16.mxu0 %v2238_v9  ;;  %1094 = vmatprep.mubr.bf16.mxu1 %v2240_v10 }
  0xb1   :  { %895 = vmatmul.mubr.bf16.gmra.mrb[56].mxu0 %v2242_v11  ;;  %1095 = vmatmul.mubr.bf16.gmra.mrb[56].mxu1 %v2243_v12 }
  0xb2   :  { %902 = vmatprep.mubr.bf16.mxu0 %v2244_v13  ;;  %1102 = vmatprep.mubr.bf16.mxu1 %v2246_v14 }
  0xb9   :  { %903 = vmatmul.mubr.bf16.gmra.mrb[60].mxu0 %v2248_v15  ;;  %1103 = vmatmul.mubr.bf16.gmra.mrb[60].mxu1 %v2249_v16 }
  0xba   :  { %910 = vmatprep.mubr.bf16.mxu0 %v2250_v17  ;;  %1110 = vmatprep.mubr.bf16.mxu1 %v2252_v18 }
  0xc1   :  { %911 = vmatmul.mubr.bf16.gmra.mrb[64].mxu0 %v2254_v19  ;;  %1111 = vmatmul.mubr.bf16.gmra.mrb[64].mxu1 %v2255_v20 }
  0xc2   :  { %918 = vmatprep.mubr.bf16.mxu0 %v2256_v21  ;;  %1118 = vmatprep.mubr.bf16.mxu1 %v2258_v22 }
  0xc9   :  { %919 = vmatmul.mubr.bf16.gmra.mrb[68].mxu0 %v2260_v23  ;;  %1119 = vmatmul.mubr.bf16.gmra.mrb[68].mxu1 %v2261_v24 }
  0xca   :  { %926 = vmatprep.mubr.bf16.mxu0 %v2262_v25  ;;  %1126 = vmatprep.mubr.bf16.mxu1 %v2264_v26 }
  0xd1   :  { %927 = vmatmul.mubr.bf16.gmra.mrb[72].mxu0 %v2266_v27  ;;  %1127 = vmatmul.mubr.bf16.gmra.mrb[72].mxu1 %v2267_v28 }
  0xd2   :  { %934 = vmatprep.mubr.bf16.mxu0 %v2268_v29  ;;  %1134 = vmatprep.mubr.bf16.mxu1 %v2270_v30 }
  0xd9   :  { %935 = vmatmul.mubr.bf16.gmra.mrb[76].mxu0 %v2272_v31  ;;  %1135 = vmatmul.mubr.bf16.gmra.mrb[76].mxu1 %v2273_v32 }
  0xda   :  { %942 = vmatprep.mubr.bf16.mxu0 %v2274_v33  ;;  %1142 = vmatprep.mubr.bf16.mxu1 %v2276_v34 }
  0xe1   :  { %943 = vmatmul.mubr.bf16.gmra.mrb[80].mxu0 %v2278_v35  ;;  %1143 = vmatmul.mubr.bf16.gmra.mrb[80].mxu1 %v2279_v36 }
  0xe2   :  { %950 = vmatprep.mubr.bf16.mxu0 %v2280_v37  ;;  %1150 = vmatprep.mubr.bf16.mxu1 %v2282_v38 }
  0xe9   :  { %951 = vmatmul.mubr.bf16.gmra.mrb[84].mxu0 %v2284_v39  ;;  %1151 = vmatmul.mubr.bf16.gmra.mrb[84].mxu1 %v2285_v40 }
  0xea   :  { %958 = vmatprep.mubr.bf16.mxu0 %v2286_v41  ;;  %1158 = vmatprep.mubr.bf16.mxu1 %v2288_v42 }
  0xf1   :  { %959 = vmatmul.mubr.bf16.gmra.mrb[88].mxu0 %v2290_v43  ;;  %1159 = vmatmul.mubr.bf16.gmra.mrb[88].mxu1 %v2291_v44 }
  0xf2   :  { %966 = vmatprep.mubr.bf16.mxu0 %v2292_v45  ;;  %1166 = vmatprep.mubr.bf16.mxu1 %v2294_v46 }
  0xf9   :  { %967 = vmatmul.mubr.bf16.gmra.mrb[92].mxu0 %v2296_v47  ;;  %1167 = vmatmul.mubr.bf16.gmra.mrb[92].mxu1 %v2297_v48 }
  0xfa   :  { %974 = vmatprep.mubr.bf16.mxu0 %v2298_v49  ;;  %1174 = vmatprep.mubr.bf16.mxu1 %v2300_v50 }
 0x101   :  { %975 = vmatmul.mubr.bf16.gmra.mrb[96].mxu0 %v2302_v51  ;;  %1175 = vmatmul.mubr.bf16.gmra.mrb[96].mxu1 %v2303_v52 }
 0x114   :  { %v784_v54 = vpop.f32.mrb[0].mxu0  ;;  %v984_v55 = vpop.f32.mrb[0].mxu1 }
 0x115   :  { %v785_v56 = vadd.f32 %v2709_v53, %v784_v54  ;;  %v985_v57 = vadd.f32 %v2709_v53, %v984_v55  ;;  %v786_v58 = vpop.f32.mrb[1].mxu0  ;;  %v986_v59 = vpop.f32.mrb[1].mxu1 }
 0x116   :  { %v787_v60 = vpop.f32.mrb[2].mxu0  ;;  %v987_v61 = vpop.f32.mrb[2].mxu1 }
 0x117   :  { %v1183_v62 = vmax.f32 %v785_v56, 0.0  ;;  %v1233_v63 = vmax.f32 %v985_v57, 0.0  ;;  %v788_v0 = vadd.f32 %v2709_v53, %v787_v60  ;;  %v988_v1 = vadd.f32 %v2709_v53, %v987_v61  ;;  %v789_v2 = vpop.f32.mrb[3].mxu0  ;;  %v989_v3 = vpop.f32.mrb[3].mxu1 }
 0x119   :  { %v2005_v4 = vpack.c.bf16 %v1183_v62, %v1183_v62  ;;  %v2055_v5 = vpack.c.bf16 %v1233_v63, %v1233_v63  ;;  %v1184_v6 = vmax.f32 %v788_v0, 0.0  ;;  %v1234_v7 = vmax.f32 %v988_v1, 0.0 }
 0x11b   :  { %1684 = vst.msk [vmem:[%s3219_s3] sm:$0xf] %vm1683_vm0, %v2005_v4  ;;  %1734 = vst.msk [vmem:[%s3219_s3 + $0xc8] sm:$0xf] %vm1683_vm0, %v2055_v5  ;;  %v2006_v8 = vpack.c.bf16 %v1184_v6, %v1184_v6  ;;  %v2056_v9 = vpack.c.bf16 %v1234_v7, %v1234_v7 }
 0x11c   :  { %v792_v10 = vpop.f32.mrb[4].mxu0  ;;  %v992_v11 = vpop.f32.mrb[4].mxu1 }
 0x11d   :  { %1685 = vst.msk [vmem:[%s3219_s3 + $0x4] sm:$0xf] %vm1683_vm0, %v2006_v8  ;;  %1735 = vst.msk [vmem:[%s3219_s3 + $0xcc] sm:$0xf] %vm1683_vm0, %v2056_v9  ;;  %v793_v12 = vadd.f32 %v2709_v53, %v792_v10  ;;  %v993_v13 = vadd.f32 %v2709_v53, %v992_v11  ;;  %v794_v14 = vpop.f32.mrb[5].mxu0  ;;  %v994_v15 = vpop.f32.mrb[5].mxu1 }
 0x11e   :  { %v795_v16 = vpop.f32.mrb[6].mxu0  ;;  %v995_v17 = vpop.f32.mrb[6].mxu1 }
 0x11f   :  { %v1185_v18 = vmax.f32 %v793_v12, 0.0  ;;  %v1235_v19 = vmax.f32 %v993_v13, 0.0  ;;  %v796_v20 = vadd.f32 %v2709_v53, %v795_v16  ;;  %v996_v21 = vadd.f32 %v2709_v53, %v995_v17  ;;  %v797_v22 = vpop.f32.mrb[7].mxu0  ;;  %v997_v23 = vpop.f32.mrb[7].mxu1 }
 0x121   :  { %v2007_v24 = vpack.c.bf16 %v1185_v18, %v1185_v18  ;;  %v2057_v25 = vpack.c.bf16 %v1235_v19, %v1235_v19  ;;  %v1186_v26 = vmax.f32 %v796_v20, 0.0  ;;  %v1236_v27 = vmax.f32 %v996_v21, 0.0 }
 0x123   :  { %1686 = vst.msk [vmem:[%s3219_s3 + $0x8] sm:$0xf] %vm1683_vm0, %v2007_v24  ;;  %1736 = vst.msk [vmem:[%s3219_s3 + $0xd0] sm:$0xf] %vm1683_vm0, %v2057_v25  ;;  %v2008_v28 = vpack.c.bf16 %v1186_v26, %v1186_v26  ;;  %v2058_v29 = vpack.c.bf16 %v1236_v27, %v1236_v27 }
 0x124   :  { %v800_v30 = vpop.f32.mrb[8].mxu0  ;;  %v1000_v31 = vpop.f32.mrb[8].mxu1 }
 0x125   :  { %1687 = vst.msk [vmem:[%s3219_s3 + $0xc] sm:$0xf] %vm1683_vm0, %v2008_v28  ;;  %1737 = vst.msk [vmem:[%s3219_s3 + $0xd4] sm:$0xf] %vm1683_vm0, %v2058_v29  ;;  %v801_v32 = vadd.f32 %v2709_v53, %v800_v30  ;;  %v1001_v33 = vadd.f32 %v2709_v53, %v1000_v31  ;;  %v802_v34 = vpop.f32.mrb[9].mxu0  ;;  %v1002_v35 = vpop.f32.mrb[9].mxu1 }
 0x126   :  { %v803_v36 = vpop.f32.mrb[10].mxu0  ;;  %v1003_v37 = vpop.f32.mrb[10].mxu1 }
 0x127   :  { %v1187_v38 = vmax.f32 %v801_v32, 0.0  ;;  %v1237_v39 = vmax.f32 %v1001_v33, 0.0  ;;  %v804_v40 = vadd.f32 %v2709_v53, %v803_v36  ;;  %v1004_v41 = vadd.f32 %v2709_v53, %v1003_v37  ;;  %v805_v42 = vpop.f32.mrb[11].mxu0  ;;  %v1005_v43 = vpop.f32.mrb[11].mxu1 }
 0x129   :  { %v2009_v44 = vpack.c.bf16 %v1187_v38, %v1187_v38  ;;  %v2059_v45 = vpack.c.bf16 %v1237_v39, %v1237_v39  ;;  %v1188_v46 = vmax.f32 %v804_v40, 0.0  ;;  %v1238_v47 = vmax.f32 %v1004_v41, 0.0 }
 0x12b   :  { %1688 = vst.msk [vmem:[%s3219_s3 + $0x10] sm:$0xf] %vm1683_vm0, %v2009_v44  ;;  %1738 = vst.msk [vmem:[%s3219_s3 + $0xd8] sm:$0xf] %vm1683_vm0, %v2059_v45  ;;  %v2010_v48 = vpack.c.bf16 %v1188_v46, %v1188_v46  ;;  %v2060_v49 = vpack.c.bf16 %v1238_v47, %v1238_v47 }
 0x12c   :  { %v808_v50 = vpop.f32.mrb[12].mxu0  ;;  %v1008_v51 = vpop.f32.mrb[12].mxu1 }
 0x12d   :  { %1689 = vst.msk [vmem:[%s3219_s3 + $0x14] sm:$0xf] %vm1683_vm0, %v2010_v48  ;;  %1739 = vst.msk [vmem:[%s3219_s3 + $0xdc] sm:$0xf] %vm1683_vm0, %v2060_v49  ;;  %v809_v52 = vadd.f32 %v2709_v53, %v808_v50  ;;  %v1009_v54 = vadd.f32 %v2709_v53, %v1008_v51  ;;  %v810_v55 = vpop.f32.mrb[13].mxu0  ;;  %v1010_v56 = vpop.f32.mrb[13].mxu1 }
 0x12e   :  { %v811_v57 = vpop.f32.mrb[14].mxu0  ;;  %v1011_v58 = vpop.f32.mrb[14].mxu1 }
 0x12f   :  { %v1189_v59 = vmax.f32 %v809_v52, 0.0  ;;  %v1239_v60 = vmax.f32 %v1009_v54, 0.0  ;;  %v812_v61 = vadd.f32 %v2709_v53, %v811_v57  ;;  %v1012_v62 = vadd.f32 %v2709_v53, %v1011_v58  ;;  %v813_v63 = vpop.f32.mrb[15].mxu0  ;;  %v1013_v0 = vpop.f32.mrb[15].mxu1 }
 0x131   :  { %v2011_v1 = vpack.c.bf16 %v1189_v59, %v1189_v59  ;;  %v2061_v2 = vpack.c.bf16 %v1239_v60, %v1239_v60  ;;  %v1190_v3 = vmax.f32 %v812_v61, 0.0  ;;  %v1240_v4 = vmax.f32 %v1012_v62, 0.0 }
 0x133   :  { %1690 = vst.msk [vmem:[%s3219_s3 + $0x18] sm:$0xf] %vm1683_vm0, %v2011_v1  ;;  %1740 = vst.msk [vmem:[%s3219_s3 + $0xe0] sm:$0xf] %vm1683_vm0, %v2061_v2  ;;  %v2012_v5 = vpack.c.bf16 %v1190_v3, %v1190_v3  ;;  %v2062_v6 = vpack.c.bf16 %v1240_v4, %v1240_v4 }
 0x134   :  { %v816_v7 = vpop.f32.mrb[16].mxu0  ;;  %v1016_v8 = vpop.f32.mrb[16].mxu1 }
 0x135   :  { %1691 = vst.msk [vmem:[%s3219_s3 + $0x1c] sm:$0xf] %vm1683_vm0, %v2012_v5  ;;  %1741 = vst.msk [vmem:[%s3219_s3 + $0xe4] sm:$0xf] %vm1683_vm0, %v2062_v6  ;;  %v817_v9 = vadd.f32 %v2709_v53, %v816_v7  ;;  %v1017_v10 = vadd.f32 %v2709_v53, %v1016_v8  ;;  %v818_v11 = vpop.f32.mrb[17].mxu0  ;;  %v1018_v12 = vpop.f32.mrb[17].mxu1 }
 0x136   :  { %v819_v13 = vpop.f32.mrb[18].mxu0  ;;  %v1019_v14 = vpop.f32.mrb[18].mxu1 }
 0x137   :  { %v1191_v15 = vmax.f32 %v817_v9, 0.0  ;;  %v1241_v16 = vmax.f32 %v1017_v10, 0.0  ;;  %v820_v17 = vadd.f32 %v2709_v53, %v819_v13  ;;  %v1020_v18 = vadd.f32 %v2709_v53, %v1019_v14  ;;  %v821_v19 = vpop.f32.mrb[19].mxu0  ;;  %v1021_v20 = vpop.f32.mrb[19].mxu1 }
 0x139   :  { %v2013_v21 = vpack.c.bf16 %v1191_v15, %v1191_v15  ;;  %v2063_v22 = vpack.c.bf16 %v1241_v16, %v1241_v16  ;;  %v1192_v23 = vmax.f32 %v820_v17, 0.0  ;;  %v1242_v24 = vmax.f32 %v1020_v18, 0.0 }
 0x13b   :  { %1692 = vst.msk [vmem:[%s3219_s3 + $0x20] sm:$0xf] %vm1683_vm0, %v2013_v21  ;;  %1742 = vst.msk [vmem:[%s3219_s3 + $0xe8] sm:$0xf] %vm1683_vm0, %v2063_v22  ;;  %v2014_v25 = vpack.c.bf16 %v1192_v23, %v1192_v23  ;;  %v2064_v26 = vpack.c.bf16 %v1242_v24, %v1242_v24 }
 0x13c   :  { %v824_v27 = vpop.f32.mrb[20].mxu0  ;;  %v1024_v28 = vpop.f32.mrb[20].mxu1 }
 0x13d   :  { %1693 = vst.msk [vmem:[%s3219_s3 + $0x24] sm:$0xf] %vm1683_vm0, %v2014_v25  ;;  %1743 = vst.msk [vmem:[%s3219_s3 + $0xec] sm:$0xf] %vm1683_vm0, %v2064_v26  ;;  %v825_v29 = vadd.f32 %v2709_v53, %v824_v27  ;;  %v1025_v30 = vadd.f32 %v2709_v53, %v1024_v28  ;;  %v826_v31 = vpop.f32.mrb[21].mxu0  ;;  %v1026_v32 = vpop.f32.mrb[21].mxu1 }
 0x13e   :  { %v827_v33 = vpop.f32.mrb[22].mxu0  ;;  %v1027_v34 = vpop.f32.mrb[22].mxu1 }
 0x13f   :  { %v1193_v35 = vmax.f32 %v825_v29, 0.0  ;;  %v1243_v36 = vmax.f32 %v1025_v30, 0.0  ;;  %v828_v37 = vadd.f32 %v2709_v53, %v827_v33  ;;  %v1028_v38 = vadd.f32 %v2709_v53, %v1027_v34  ;;  %v829_v39 = vpop.f32.mrb[23].mxu0  ;;  %v1029_v40 = vpop.f32.mrb[23].mxu1 }
 0x141   :  { %v2015_v41 = vpack.c.bf16 %v1193_v35, %v1193_v35  ;;  %v2065_v42 = vpack.c.bf16 %v1243_v36, %v1243_v36  ;;  %v1194_v43 = vmax.f32 %v828_v37, 0.0  ;;  %v1244_v44 = vmax.f32 %v1028_v38, 0.0 }
 0x143   :  { %1694 = vst.msk [vmem:[%s3219_s3 + $0x28] sm:$0xf] %vm1683_vm0, %v2015_v41  ;;  %1744 = vst.msk [vmem:[%s3219_s3 + $0xf0] sm:$0xf] %vm1683_vm0, %v2065_v42  ;;  %v2016_v45 = vpack.c.bf16 %v1194_v43, %v1194_v43  ;;  %v2066_v46 = vpack.c.bf16 %v1244_v44, %v1244_v44 }
 0x144   :  { %v832_v47 = vpop.f32.mrb[24].mxu0  ;;  %v1032_v48 = vpop.f32.mrb[24].mxu1 }
 0x145   :  { %1695 = vst.msk [vmem:[%s3219_s3 + $0x2c] sm:$0xf] %vm1683_vm0, %v2016_v45  ;;  %1745 = vst.msk [vmem:[%s3219_s3 + $0xf4] sm:$0xf] %vm1683_vm0, %v2066_v46  ;;  %v833_v49 = vadd.f32 %v2709_v53, %v832_v47  ;;  %v1033_v50 = vadd.f32 %v2709_v53, %v1032_v48  ;;  %v834_v51 = vpop.f32.mrb[25].mxu0  ;;  %v1034_v52 = vpop.f32.mrb[25].mxu1 }
 0x146   :  { %v835_v54 = vpop.f32.mrb[26].mxu0  ;;  %v1035_v55 = vpop.f32.mrb[26].mxu1 }
 0x147   :  { %v1195_v56 = vmax.f32 %v833_v49, 0.0  ;;  %v1245_v57 = vmax.f32 %v1033_v50, 0.0  ;;  %v836_v58 = vadd.f32 %v2709_v53, %v835_v54  ;;  %v1036_v59 = vadd.f32 %v2709_v53, %v1035_v55  ;;  %v837_v60 = vpop.f32.mrb[27].mxu0  ;;  %v1037_v61 = vpop.f32.mrb[27].mxu1 }
 0x149   :  { %v2017_v62 = vpack.c.bf16 %v1195_v56, %v1195_v56  ;;  %v2067_v63 = vpack.c.bf16 %v1245_v57, %v1245_v57  ;;  %v1196_v0 = vmax.f32 %v836_v58, 0.0  ;;  %v1246_v1 = vmax.f32 %v1036_v59, 0.0 }
 0x14b   :  { %1696 = vst.msk [vmem:[%s3219_s3 + $0x30] sm:$0xf] %vm1683_vm0, %v2017_v62  ;;  %1746 = vst.msk [vmem:[%s3219_s3 + $0xf8] sm:$0xf] %vm1683_vm0, %v2067_v63  ;;  %v2018_v2 = vpack.c.bf16 %v1196_v0, %v1196_v0  ;;  %v2068_v3 = vpack.c.bf16 %v1246_v1, %v1246_v1 }
 0x14c   :  { %v840_v4 = vpop.f32.mrb[28].mxu0  ;;  %v1040_v5 = vpop.f32.mrb[28].mxu1 }
 0x14d   :  { %1697 = vst.msk [vmem:[%s3219_s3 + $0x34] sm:$0xf] %vm1683_vm0, %v2018_v2  ;;  %1747 = vst.msk [vmem:[%s3219_s3 + $0xfc] sm:$0xf] %vm1683_vm0, %v2068_v3  ;;  %v841_v6 = vadd.f32 %v2709_v53, %v840_v4  ;;  %v1041_v7 = vadd.f32 %v2709_v53, %v1040_v5  ;;  %v842_v8 = vpop.f32.mrb[29].mxu0  ;;  %v1042_v9 = vpop.f32.mrb[29].mxu1 }
 0x14e   :  { %v843_v10 = vpop.f32.mrb[30].mxu0  ;;  %v1043_v11 = vpop.f32.mrb[30].mxu1 }
 0x14f   :  { %v1197_v12 = vmax.f32 %v841_v6, 0.0  ;;  %v1247_v13 = vmax.f32 %v1041_v7, 0.0  ;;  %v844_v14 = vadd.f32 %v2709_v53, %v843_v10  ;;  %v1044_v15 = vadd.f32 %v2709_v53, %v1043_v11  ;;  %v845_v16 = vpop.f32.mrb[31].mxu0  ;;  %v1045_v17 = vpop.f32.mrb[31].mxu1 }
 0x151   :  { %v2019_v18 = vpack.c.bf16 %v1197_v12, %v1197_v12  ;;  %v2069_v19 = vpack.c.bf16 %v1247_v13, %v1247_v13  ;;  %v1198_v20 = vmax.f32 %v844_v14, 0.0  ;;  %v1248_v21 = vmax.f32 %v1044_v15, 0.0 }
 0x153   :  { %1698 = vst.msk [vmem:[%s3219_s3 + $0x38] sm:$0xf] %vm1683_vm0, %v2019_v18  ;;  %1748 = vst.msk [vmem:[%s3219_s3 + $0x100] sm:$0xf] %vm1683_vm0, %v2069_v19  ;;  %v2020_v22 = vpack.c.bf16 %v1198_v20, %v1198_v20  ;;  %v2070_v23 = vpack.c.bf16 %v1248_v21, %v1248_v21 }
 0x154   :  { %v848_v24 = vpop.f32.mrb[32].mxu0  ;;  %v1048_v25 = vpop.f32.mrb[32].mxu1 }
 0x155   :  { %1699 = vst.msk [vmem:[%s3219_s3 + $0x3c] sm:$0xf] %vm1683_vm0, %v2020_v22  ;;  %1749 = vst.msk [vmem:[%s3219_s3 + $0x104] sm:$0xf] %vm1683_vm0, %v2070_v23  ;;  %v849_v26 = vadd.f32 %v2709_v53, %v848_v24  ;;  %v1049_v27 = vadd.f32 %v2709_v53, %v1048_v25  ;;  %v850_v28 = vpop.f32.mrb[33].mxu0  ;;  %v1050_v29 = vpop.f32.mrb[33].mxu1 }
 0x156   :  { %v851_v30 = vpop.f32.mrb[34].mxu0  ;;  %v1051_v31 = vpop.f32.mrb[34].mxu1 }
 0x157   :  { %v1199_v32 = vmax.f32 %v849_v26, 0.0  ;;  %v1249_v33 = vmax.f32 %v1049_v27, 0.0  ;;  %v852_v34 = vadd.f32 %v2709_v53, %v851_v30  ;;  %v1052_v35 = vadd.f32 %v2709_v53, %v1051_v31  ;;  %v853_v36 = vpop.f32.mrb[35].mxu0  ;;  %v1053_v37 = vpop.f32.mrb[35].mxu1 }
 0x159   :  { %v2021_v38 = vpack.c.bf16 %v1199_v32, %v1199_v32  ;;  %v2071_v39 = vpack.c.bf16 %v1249_v33, %v1249_v33  ;;  %v1200_v40 = vmax.f32 %v852_v34, 0.0  ;;  %v1250_v41 = vmax.f32 %v1052_v35, 0.0 }
 0x15b   :  { %1700 = vst.msk [vmem:[%s3219_s3 + $0x40] sm:$0xf] %vm1683_vm0, %v2021_v38  ;;  %1750 = vst.msk [vmem:[%s3219_s3 + $0x108] sm:$0xf] %vm1683_vm0, %v2071_v39  ;;  %v2022_v42 = vpack.c.bf16 %v1200_v40, %v1200_v40  ;;  %v2072_v43 = vpack.c.bf16 %v1250_v41, %v1250_v41 }
 0x15c   :  { %v856_v44 = vpop.f32.mrb[36].mxu0  ;;  %v1056_v45 = vpop.f32.mrb[36].mxu1 }
 0x15d   :  { %1701 = vst.msk [vmem:[%s3219_s3 + $0x44] sm:$0xf] %vm1683_vm0, %v2022_v42  ;;  %1751 = vst.msk [vmem:[%s3219_s3 + $0x10c] sm:$0xf] %vm1683_vm0, %v2072_v43  ;;  %v857_v46 = vadd.f32 %v2709_v53, %v856_v44  ;;  %v1057_v47 = vadd.f32 %v2709_v53, %v1056_v45  ;;  %v858_v48 = vpop.f32.mrb[37].mxu0  ;;  %v1058_v49 = vpop.f32.mrb[37].mxu1 }
 0x15e   :  { %v859_v50 = vpop.f32.mrb[38].mxu0  ;;  %v1059_v51 = vpop.f32.mrb[38].mxu1 }
 0x15f   :  { %v1201_v52 = vmax.f32 %v857_v46, 0.0  ;;  %v1251_v54 = vmax.f32 %v1057_v47, 0.0  ;;  %v860_v55 = vadd.f32 %v2709_v53, %v859_v50  ;;  %v1060_v56 = vadd.f32 %v2709_v53, %v1059_v51  ;;  %v861_v57 = vpop.f32.mrb[39].mxu0  ;;  %v1061_v58 = vpop.f32.mrb[39].mxu1 }
 0x161   :  { %v2023_v59 = vpack.c.bf16 %v1201_v52, %v1201_v52  ;;  %v2073_v60 = vpack.c.bf16 %v1251_v54, %v1251_v54  ;;  %v1202_v61 = vmax.f32 %v860_v55, 0.0  ;;  %v1252_v62 = vmax.f32 %v1060_v56, 0.0 }
 0x163   :  { %1702 = vst.msk [vmem:[%s3219_s3 + $0x48] sm:$0xf] %vm1683_vm0, %v2023_v59  ;;  %1752 = vst.msk [vmem:[%s3219_s3 + $0x110] sm:$0xf] %vm1683_vm0, %v2073_v60  ;;  %v2024_v63 = vpack.c.bf16 %v1202_v61, %v1202_v61  ;;  %v2074_v0 = vpack.c.bf16 %v1252_v62, %v1252_v62 }
 0x164   :  { %v864_v1 = vpop.f32.mrb[40].mxu0  ;;  %v1064_v2 = vpop.f32.mrb[40].mxu1 }
 0x165   :  { %1703 = vst.msk [vmem:[%s3219_s3 + $0x4c] sm:$0xf] %vm1683_vm0, %v2024_v63  ;;  %1753 = vst.msk [vmem:[%s3219_s3 + $0x114] sm:$0xf] %vm1683_vm0, %v2074_v0  ;;  %v865_v3 = vadd.f32 %v2709_v53, %v864_v1  ;;  %v1065_v4 = vadd.f32 %v2709_v53, %v1064_v2  ;;  %v866_v5 = vpop.f32.mrb[41].mxu0  ;;  %v1066_v6 = vpop.f32.mrb[41].mxu1 }
 0x166   :  { %v867_v7 = vpop.f32.mrb[42].mxu0  ;;  %v1067_v8 = vpop.f32.mrb[42].mxu1 }
 0x167   :  { %v1203_v9 = vmax.f32 %v865_v3, 0.0  ;;  %v1253_v10 = vmax.f32 %v1065_v4, 0.0  ;;  %v868_v11 = vadd.f32 %v2709_v53, %v867_v7  ;;  %v1068_v12 = vadd.f32 %v2709_v53, %v1067_v8  ;;  %v869_v13 = vpop.f32.mrb[43].mxu0  ;;  %v1069_v14 = vpop.f32.mrb[43].mxu1 }
 0x169   :  { %v2025_v15 = vpack.c.bf16 %v1203_v9, %v1203_v9  ;;  %v2075_v16 = vpack.c.bf16 %v1253_v10, %v1253_v10  ;;  %v1204_v17 = vmax.f32 %v868_v11, 0.0  ;;  %v1254_v18 = vmax.f32 %v1068_v12, 0.0 }
 0x16b   :  { %1704 = vst.msk [vmem:[%s3219_s3 + $0x50] sm:$0xf] %vm1683_vm0, %v2025_v15  ;;  %1754 = vst.msk [vmem:[%s3219_s3 + $0x118] sm:$0xf] %vm1683_vm0, %v2075_v16  ;;  %v2026_v19 = vpack.c.bf16 %v1204_v17, %v1204_v17  ;;  %v2076_v20 = vpack.c.bf16 %v1254_v18, %v1254_v18 }
 0x16c   :  { %v872_v21 = vpop.f32.mrb[44].mxu0  ;;  %v1072_v22 = vpop.f32.mrb[44].mxu1 }
 0x16d   :  { %1705 = vst.msk [vmem:[%s3219_s3 + $0x54] sm:$0xf] %vm1683_vm0, %v2026_v19  ;;  %1755 = vst.msk [vmem:[%s3219_s3 + $0x11c] sm:$0xf] %vm1683_vm0, %v2076_v20  ;;  %v873_v23 = vadd.f32 %v2709_v53, %v872_v21  ;;  %v1073_v24 = vadd.f32 %v2709_v53, %v1072_v22  ;;  %v874_v25 = vpop.f32.mrb[45].mxu0  ;;  %v1074_v26 = vpop.f32.mrb[45].mxu1 }
 0x16e   :  { %v875_v27 = vpop.f32.mrb[46].mxu0  ;;  %v1075_v28 = vpop.f32.mrb[46].mxu1 }
 0x16f   :  { %v1205_v29 = vmax.f32 %v873_v23, 0.0  ;;  %v1255_v30 = vmax.f32 %v1073_v24, 0.0  ;;  %v876_v31 = vadd.f32 %v2709_v53, %v875_v27  ;;  %v1076_v32 = vadd.f32 %v2709_v53, %v1075_v28  ;;  %v877_v33 = vpop.f32.mrb[47].mxu0  ;;  %v1077_v34 = vpop.f32.mrb[47].mxu1 }
 0x171   :  { %v2027_v35 = vpack.c.bf16 %v1205_v29, %v1205_v29  ;;  %v2077_v36 = vpack.c.bf16 %v1255_v30, %v1255_v30  ;;  %v1206_v37 = vmax.f32 %v876_v31, 0.0  ;;  %v1256_v38 = vmax.f32 %v1076_v32, 0.0 }
 0x173   :  { %1706 = vst.msk [vmem:[%s3219_s3 + $0x58] sm:$0xf] %vm1683_vm0, %v2027_v35  ;;  %1756 = vst.msk [vmem:[%s3219_s3 + $0x120] sm:$0xf] %vm1683_vm0, %v2077_v36  ;;  %v2028_v39 = vpack.c.bf16 %v1206_v37, %v1206_v37  ;;  %v2078_v40 = vpack.c.bf16 %v1256_v38, %v1256_v38 }
 0x174   :  { %v880_v41 = vpop.f32.mrb[48].mxu0  ;;  %v1080_v42 = vpop.f32.mrb[48].mxu1 }
 0x175   :  { %1707 = vst.msk [vmem:[%s3219_s3 + $0x5c] sm:$0xf] %vm1683_vm0, %v2028_v39  ;;  %1757 = vst.msk [vmem:[%s3219_s3 + $0x124] sm:$0xf] %vm1683_vm0, %v2078_v40  ;;  %v881_v43 = vadd.f32 %v2709_v53, %v880_v41  ;;  %v1081_v44 = vadd.f32 %v2709_v53, %v1080_v42  ;;  %v882_v45 = vpop.f32.mrb[49].mxu0  ;;  %v1082_v46 = vpop.f32.mrb[49].mxu1 }
 0x176   :  { %v883_v47 = vpop.f32.mrb[50].mxu0  ;;  %v1083_v48 = vpop.f32.mrb[50].mxu1 }
 0x177   :  { %v1207_v49 = vmax.f32 %v881_v43, 0.0  ;;  %v1257_v50 = vmax.f32 %v1081_v44, 0.0  ;;  %v884_v51 = vadd.f32 %v2709_v53, %v883_v47  ;;  %v1084_v52 = vadd.f32 %v2709_v53, %v1083_v48  ;;  %v885_v54 = vpop.f32.mrb[51].mxu0  ;;  %v1085_v55 = vpop.f32.mrb[51].mxu1 }
 0x179   :  { %v2029_v56 = vpack.c.bf16 %v1207_v49, %v1207_v49  ;;  %v2079_v57 = vpack.c.bf16 %v1257_v50, %v1257_v50  ;;  %v1208_v58 = vmax.f32 %v884_v51, 0.0  ;;  %v1258_v59 = vmax.f32 %v1084_v52, 0.0 }
 0x17b   :  { %1708 = vst.msk [vmem:[%s3219_s3 + $0x60] sm:$0xf] %vm1683_vm0, %v2029_v56  ;;  %1758 = vst.msk [vmem:[%s3219_s3 + $0x128] sm:$0xf] %vm1683_vm0, %v2079_v57  ;;  %v2030_v60 = vpack.c.bf16 %v1208_v58, %v1208_v58  ;;  %v2080_v61 = vpack.c.bf16 %v1258_v59, %v1258_v59 }
 0x17c   :  { %v888_v62 = vpop.f32.mrb[52].mxu0  ;;  %v1088_v63 = vpop.f32.mrb[52].mxu1 }
 0x17d   :  { %1709 = vst.msk [vmem:[%s3219_s3 + $0x64] sm:$0xf] %vm1683_vm0, %v2030_v60  ;;  %1759 = vst.msk [vmem:[%s3219_s3 + $0x12c] sm:$0xf] %vm1683_vm0, %v2080_v61  ;;  %v889_v0 = vadd.f32 %v2709_v53, %v888_v62  ;;  %v1089_v1 = vadd.f32 %v2709_v53, %v1088_v63  ;;  %v890_v2 = vpop.f32.mrb[53].mxu0  ;;  %v1090_v3 = vpop.f32.mrb[53].mxu1 }
 0x17e   :  { %v891_v4 = vpop.f32.mrb[54].mxu0  ;;  %v1091_v5 = vpop.f32.mrb[54].mxu1 }
 0x17f   :  { %v1209_v6 = vmax.f32 %v889_v0, 0.0  ;;  %v1259_v7 = vmax.f32 %v1089_v1, 0.0  ;;  %v892_v8 = vadd.f32 %v2709_v53, %v891_v4  ;;  %v1092_v9 = vadd.f32 %v2709_v53, %v1091_v5  ;;  %v893_v10 = vpop.f32.mrb[55].mxu0  ;;  %v1093_v11 = vpop.f32.mrb[55].mxu1 }
 0x181   :  { %v2031_v12 = vpack.c.bf16 %v1209_v6, %v1209_v6  ;;  %v2081_v13 = vpack.c.bf16 %v1259_v7, %v1259_v7  ;;  %v1210_v14 = vmax.f32 %v892_v8, 0.0  ;;  %v1260_v15 = vmax.f32 %v1092_v9, 0.0 }
 0x183   :  { %1710 = vst.msk [vmem:[%s3219_s3 + $0x68] sm:$0xf] %vm1683_vm0, %v2031_v12  ;;  %1760 = vst.msk [vmem:[%s3219_s3 + $0x130] sm:$0xf] %vm1683_vm0, %v2081_v13  ;;  %v2032_v16 = vpack.c.bf16 %v1210_v14, %v1210_v14  ;;  %v2082_v17 = vpack.c.bf16 %v1260_v15, %v1260_v15 }
 0x184   :  { %v896_v18 = vpop.f32.mrb[56].mxu0  ;;  %v1096_v19 = vpop.f32.mrb[56].mxu1 }
 0x185   :  { %1711 = vst.msk [vmem:[%s3219_s3 + $0x6c] sm:$0xf] %vm1683_vm0, %v2032_v16  ;;  %1761 = vst.msk [vmem:[%s3219_s3 + $0x134] sm:$0xf] %vm1683_vm0, %v2082_v17  ;;  %v897_v20 = vadd.f32 %v2709_v53, %v896_v18  ;;  %v1097_v21 = vadd.f32 %v2709_v53, %v1096_v19  ;;  %v898_v22 = vpop.f32.mrb[57].mxu0  ;;  %v1098_v23 = vpop.f32.mrb[57].mxu1 }
 0x186   :  { %v899_v24 = vpop.f32.mrb[58].mxu0  ;;  %v1099_v25 = vpop.f32.mrb[58].mxu1 }
 0x187   :  { %v1211_v26 = vmax.f32 %v897_v20, 0.0  ;;  %v1261_v27 = vmax.f32 %v1097_v21, 0.0  ;;  %v900_v28 = vadd.f32 %v2709_v53, %v899_v24  ;;  %v1100_v29 = vadd.f32 %v2709_v53, %v1099_v25  ;;  %v901_v30 = vpop.f32.mrb[59].mxu0  ;;  %v1101_v31 = vpop.f32.mrb[59].mxu1 }
 0x189   :  { %v2033_v32 = vpack.c.bf16 %v1211_v26, %v1211_v26  ;;  %v2083_v33 = vpack.c.bf16 %v1261_v27, %v1261_v27  ;;  %v1212_v34 = vmax.f32 %v900_v28, 0.0  ;;  %v1262_v35 = vmax.f32 %v1100_v29, 0.0 }
 0x18b   :  { %1712 = vst.msk [vmem:[%s3219_s3 + $0x70] sm:$0xf] %vm1683_vm0, %v2033_v32  ;;  %1762 = vst.msk [vmem:[%s3219_s3 + $0x138] sm:$0xf] %vm1683_vm0, %v2083_v33  ;;  %v2034_v36 = vpack.c.bf16 %v1212_v34, %v1212_v34  ;;  %v2084_v37 = vpack.c.bf16 %v1262_v35, %v1262_v35 }
 0x18c   :  { %v904_v38 = vpop.f32.mrb[60].mxu0  ;;  %v1104_v39 = vpop.f32.mrb[60].mxu1 }
 0x18d   :  { %1713 = vst.msk [vmem:[%s3219_s3 + $0x74] sm:$0xf] %vm1683_vm0, %v2034_v36  ;;  %1763 = vst.msk [vmem:[%s3219_s3 + $0x13c] sm:$0xf] %vm1683_vm0, %v2084_v37  ;;  %v905_v40 = vadd.f32 %v2709_v53, %v904_v38  ;;  %v1105_v41 = vadd.f32 %v2709_v53, %v1104_v39  ;;  %v906_v42 = vpop.f32.mrb[61].mxu0  ;;  %v1106_v43 = vpop.f32.mrb[61].mxu1 }
 0x18e   :  { %v907_v44 = vpop.f32.mrb[62].mxu0  ;;  %v1107_v45 = vpop.f32.mrb[62].mxu1 }
 0x18f   :  { %v1213_v46 = vmax.f32 %v905_v40, 0.0  ;;  %v1263_v47 = vmax.f32 %v1105_v41, 0.0  ;;  %v908_v48 = vadd.f32 %v2709_v53, %v907_v44  ;;  %v1108_v49 = vadd.f32 %v2709_v53, %v1107_v45  ;;  %v909_v50 = vpop.f32.mrb[63].mxu0  ;;  %v1109_v51 = vpop.f32.mrb[63].mxu1 }
 0x191   :  { %v2035_v52 = vpack.c.bf16 %v1213_v46, %v1213_v46  ;;  %v2085_v54 = vpack.c.bf16 %v1263_v47, %v1263_v47  ;;  %v1214_v55 = vmax.f32 %v908_v48, 0.0  ;;  %v1264_v56 = vmax.f32 %v1108_v49, 0.0 }
 0x193   :  { %1714 = vst.msk [vmem:[%s3219_s3 + $0x78] sm:$0xf] %vm1683_vm0, %v2035_v52  ;;  %1764 = vst.msk [vmem:[%s3219_s3 + $0x140] sm:$0xf] %vm1683_vm0, %v2085_v54  ;;  %v2036_v57 = vpack.c.bf16 %v1214_v55, %v1214_v55  ;;  %v2086_v58 = vpack.c.bf16 %v1264_v56, %v1264_v56 }
 0x194   :  { %v912_v59 = vpop.f32.mrb[64].mxu0  ;;  %v1112_v60 = vpop.f32.mrb[64].mxu1 }
 0x195   :  { %1715 = vst.msk [vmem:[%s3219_s3 + $0x7c] sm:$0xf] %vm1683_vm0, %v2036_v57  ;;  %1765 = vst.msk [vmem:[%s3219_s3 + $0x144] sm:$0xf] %vm1683_vm0, %v2086_v58  ;;  %v913_v61 = vadd.f32 %v2709_v53, %v912_v59  ;;  %v1113_v62 = vadd.f32 %v2709_v53, %v1112_v60  ;;  %v914_v63 = vpop.f32.mrb[65].mxu0  ;;  %v1114_v0 = vpop.f32.mrb[65].mxu1 }
 0x196   :  { %v915_v1 = vpop.f32.mrb[66].mxu0  ;;  %v1115_v2 = vpop.f32.mrb[66].mxu1 }
 0x197   :  { %v1215_v3 = vmax.f32 %v913_v61, 0.0  ;;  %v1265_v4 = vmax.f32 %v1113_v62, 0.0  ;;  %v916_v5 = vadd.f32 %v2709_v53, %v915_v1  ;;  %v1116_v6 = vadd.f32 %v2709_v53, %v1115_v2  ;;  %v917_v7 = vpop.f32.mrb[67].mxu0  ;;  %v1117_v8 = vpop.f32.mrb[67].mxu1 }
 0x199   :  { %v2037_v9 = vpack.c.bf16 %v1215_v3, %v1215_v3  ;;  %v2087_v10 = vpack.c.bf16 %v1265_v4, %v1265_v4  ;;  %v1216_v11 = vmax.f32 %v916_v5, 0.0  ;;  %v1266_v12 = vmax.f32 %v1116_v6, 0.0 }
 0x19b   :  { %1716 = vst.msk [vmem:[%s3219_s3 + $0x80] sm:$0xf] %vm1683_vm0, %v2037_v9  ;;  %1766 = vst.msk [vmem:[%s3219_s3 + $0x148] sm:$0xf] %vm1683_vm0, %v2087_v10  ;;  %v2038_v13 = vpack.c.bf16 %v1216_v11, %v1216_v11  ;;  %v2088_v14 = vpack.c.bf16 %v1266_v12, %v1266_v12 }
 0x19c   :  { %v920_v15 = vpop.f32.mrb[68].mxu0  ;;  %v1120_v16 = vpop.f32.mrb[68].mxu1 }
 0x19d   :  { %1717 = vst.msk [vmem:[%s3219_s3 + $0x84] sm:$0xf] %vm1683_vm0, %v2038_v13  ;;  %1767 = vst.msk [vmem:[%s3219_s3 + $0x14c] sm:$0xf] %vm1683_vm0, %v2088_v14  ;;  %v921_v17 = vadd.f32 %v2709_v53, %v920_v15  ;;  %v1121_v18 = vadd.f32 %v2709_v53, %v1120_v16  ;;  %v922_v19 = vpop.f32.mrb[69].mxu0  ;;  %v1122_v20 = vpop.f32.mrb[69].mxu1 }
 0x19e   :  { %v923_v21 = vpop.f32.mrb[70].mxu0  ;;  %v1123_v22 = vpop.f32.mrb[70].mxu1 }
 0x19f   :  { %v1217_v23 = vmax.f32 %v921_v17, 0.0  ;;  %v1267_v24 = vmax.f32 %v1121_v18, 0.0  ;;  %v924_v25 = vadd.f32 %v2709_v53, %v923_v21  ;;  %v1124_v26 = vadd.f32 %v2709_v53, %v1123_v22  ;;  %v925_v27 = vpop.f32.mrb[71].mxu0  ;;  %v1125_v28 = vpop.f32.mrb[71].mxu1 }
 0x1a1   :  { %v2039_v29 = vpack.c.bf16 %v1217_v23, %v1217_v23  ;;  %v2089_v30 = vpack.c.bf16 %v1267_v24, %v1267_v24  ;;  %v1218_v31 = vmax.f32 %v924_v25, 0.0  ;;  %v1268_v32 = vmax.f32 %v1124_v26, 0.0 }
 0x1a3   :  { %1718 = vst.msk [vmem:[%s3219_s3 + $0x88] sm:$0xf] %vm1683_vm0, %v2039_v29  ;;  %1768 = vst.msk [vmem:[%s3219_s3 + $0x150] sm:$0xf] %vm1683_vm0, %v2089_v30  ;;  %v2040_v33 = vpack.c.bf16 %v1218_v31, %v1218_v31  ;;  %v2090_v34 = vpack.c.bf16 %v1268_v32, %v1268_v32 }
 0x1a4   :  { %v928_v35 = vpop.f32.mrb[72].mxu0  ;;  %v1128_v36 = vpop.f32.mrb[72].mxu1 }
 0x1a5   :  { %1719 = vst.msk [vmem:[%s3219_s3 + $0x8c] sm:$0xf] %vm1683_vm0, %v2040_v33  ;;  %1769 = vst.msk [vmem:[%s3219_s3 + $0x154] sm:$0xf] %vm1683_vm0, %v2090_v34  ;;  %v929_v37 = vadd.f32 %v2709_v53, %v928_v35  ;;  %v1129_v38 = vadd.f32 %v2709_v53, %v1128_v36  ;;  %v930_v39 = vpop.f32.mrb[73].mxu0  ;;  %v1130_v40 = vpop.f32.mrb[73].mxu1 }
 0x1a6   :  { %v931_v41 = vpop.f32.mrb[74].mxu0  ;;  %v1131_v42 = vpop.f32.mrb[74].mxu1 }
 0x1a7   :  { %v1219_v43 = vmax.f32 %v929_v37, 0.0  ;;  %v1269_v44 = vmax.f32 %v1129_v38, 0.0  ;;  %v932_v45 = vadd.f32 %v2709_v53, %v931_v41  ;;  %v1132_v46 = vadd.f32 %v2709_v53, %v1131_v42  ;;  %v933_v47 = vpop.f32.mrb[75].mxu0  ;;  %v1133_v48 = vpop.f32.mrb[75].mxu1  ;;  %v3136_v42 = vld [vmem:[%s3218_s2] ss:$0 sm:$0xff] }
 0x1a9   :  { %v2041_v49 = vpack.c.bf16 %v1219_v43, %v1219_v43  ;;  %v2091_v50 = vpack.c.bf16 %v1269_v44, %v1269_v44  ;;  %v1220_v51 = vmax.f32 %v932_v45, 0.0  ;;  %v1270_v52 = vmax.f32 %v1132_v46, 0.0 }
 0x1ab   :  { %1720 = vst.msk [vmem:[%s3219_s3 + $0x90] sm:$0xf] %vm1683_vm0, %v2041_v49  ;;  %1770 = vst.msk [vmem:[%s3219_s3 + $0x158] sm:$0xf] %vm1683_vm0, %v2091_v50  ;;  %v2042_v54 = vpack.c.bf16 %v1220_v51, %v1220_v51  ;;  %v2092_v55 = vpack.c.bf16 %v1270_v52, %v1270_v52 }
 0x1ac   :  { %v936_v56 = vpop.f32.mrb[76].mxu0  ;;  %v1136_v57 = vpop.f32.mrb[76].mxu1 }
 0x1ad   :  { %1721 = vst.msk [vmem:[%s3219_s3 + $0x94] sm:$0xf] %vm1683_vm0, %v2042_v54  ;;  %1771 = vst.msk [vmem:[%s3219_s3 + $0x15c] sm:$0xf] %vm1683_vm0, %v2092_v55  ;;  %v937_v58 = vadd.f32 %v2709_v53, %v936_v56  ;;  %v1137_v59 = vadd.f32 %v2709_v53, %v1136_v57  ;;  %v938_v60 = vpop.f32.mrb[77].mxu0  ;;  %v1138_v61 = vpop.f32.mrb[77].mxu1 }
 0x1ae   :  { %v939_v62 = vpop.f32.mrb[78].mxu0  ;;  %v1139_v63 = vpop.f32.mrb[78].mxu1 }
 0x1af   :  { %v1221_v0 = vmax.f32 %v937_v58, 0.0  ;;  %v1271_v1 = vmax.f32 %v1137_v59, 0.0  ;;  %v940_v2 = vadd.f32 %v2709_v53, %v939_v62  ;;  %v1140_v3 = vadd.f32 %v2709_v53, %v1139_v63  ;;  %v941_v4 = vpop.f32.mrb[79].mxu0  ;;  %v1141_v5 = vpop.f32.mrb[79].mxu1 }
 0x1b1   :  { %v2043_v6 = vpack.c.bf16 %v1221_v0, %v1221_v0  ;;  %v2093_v7 = vpack.c.bf16 %v1271_v1, %v1271_v1  ;;  %v1222_v8 = vmax.f32 %v940_v2, 0.0  ;;  %v1272_v9 = vmax.f32 %v1140_v3, 0.0 }
 0x1b3   :  { %1722 = vst.msk [vmem:[%s3219_s3 + $0x98] sm:$0xf] %vm1683_vm0, %v2043_v6  ;;  %1772 = vst.msk [vmem:[%s3219_s3 + $0x160] sm:$0xf] %vm1683_vm0, %v2093_v7  ;;  %v2044_v10 = vpack.c.bf16 %v1222_v8, %v1222_v8  ;;  %v2094_v11 = vpack.c.bf16 %v1272_v9, %v1272_v9 }
 0x1b4   :  { %v944_v12 = vpop.f32.mrb[80].mxu0  ;;  %v1144_v13 = vpop.f32.mrb[80].mxu1 }
 0x1b5   :  { %1723 = vst.msk [vmem:[%s3219_s3 + $0x9c] sm:$0xf] %vm1683_vm0, %v2044_v10  ;;  %1773 = vst.msk [vmem:[%s3219_s3 + $0x164] sm:$0xf] %vm1683_vm0, %v2094_v11  ;;  %v945_v14 = vadd.f32 %v2709_v53, %v944_v12  ;;  %v1145_v15 = vadd.f32 %v2709_v53, %v1144_v13  ;;  %v946_v16 = vpop.f32.mrb[81].mxu0  ;;  %v1146_v17 = vpop.f32.mrb[81].mxu1 }
 0x1b6   :  { %v947_v18 = vpop.f32.mrb[82].mxu0  ;;  %v1147_v19 = vpop.f32.mrb[82].mxu1 }
 0x1b7   :  { %v1223_v20 = vmax.f32 %v945_v14, 0.0  ;;  %v1273_v21 = vmax.f32 %v1145_v15, 0.0  ;;  %v948_v22 = vadd.f32 %v2709_v53, %v947_v18  ;;  %v1148_v23 = vadd.f32 %v2709_v53, %v1147_v19  ;;  %v949_v24 = vpop.f32.mrb[83].mxu0  ;;  %v1149_v25 = vpop.f32.mrb[83].mxu1 }
 0x1b9   :  { %v2045_v26 = vpack.c.bf16 %v1223_v20, %v1223_v20  ;;  %v2095_v27 = vpack.c.bf16 %v1273_v21, %v1273_v21  ;;  %v1224_v28 = vmax.f32 %v948_v22, 0.0  ;;  %v1274_v29 = vmax.f32 %v1148_v23, 0.0 }
 0x1bb   :  { %1724 = vst.msk [vmem:[%s3219_s3 + $0xa0] sm:$0xf] %vm1683_vm0, %v2045_v26  ;;  %1774 = vst.msk [vmem:[%s3219_s3 + $0x168] sm:$0xf] %vm1683_vm0, %v2095_v27  ;;  %v2046_v30 = vpack.c.bf16 %v1224_v28, %v1224_v28  ;;  %v2096_v31 = vpack.c.bf16 %v1274_v29, %v1274_v29 }
 0x1bc   :  { %v952_v32 = vpop.f32.mrb[84].mxu0  ;;  %v1152_v33 = vpop.f32.mrb[84].mxu1 }
 0x1bd   :  { %1725 = vst.msk [vmem:[%s3219_s3 + $0xa4] sm:$0xf] %vm1683_vm0, %v2046_v30  ;;  %1775 = vst.msk [vmem:[%s3219_s3 + $0x16c] sm:$0xf] %vm1683_vm0, %v2096_v31  ;;  %v953_v34 = vadd.f32 %v2709_v53, %v952_v32  ;;  %v1153_v35 = vadd.f32 %v2709_v53, %v1152_v33  ;;  %v954_v36 = vpop.f32.mrb[85].mxu0  ;;  %v1154_v37 = vpop.f32.mrb[85].mxu1 }
 0x1be   :  { %v955_v38 = vpop.f32.mrb[86].mxu0  ;;  %v1155_v39 = vpop.f32.mrb[86].mxu1 }
 0x1bf   :  { %v1225_v40 = vmax.f32 %v953_v34, 0.0  ;;  %v1275_v41 = vmax.f32 %v1153_v35, 0.0  ;;  %v956_v43 = vadd.f32 %v3136_v42, %v955_v38  ;;  %v1156_v44 = vadd.f32 %v3136_v42, %v1155_v39  ;;  %v957_v45 = vpop.f32.mrb[87].mxu0  ;;  %v1157_v46 = vpop.f32.mrb[87].mxu1 }
 0x1c1   :  { %v2047_v47 = vpack.c.bf16 %v1225_v40, %v1225_v40  ;;  %v2097_v48 = vpack.c.bf16 %v1275_v41, %v1275_v41  ;;  %v1226_v53 = vmax.f32 %v956_v43, 0.0  ;;  %v1276_v49 = vmax.f32 %v1156_v44, 0.0 }
 0x1c3   :  { %1726 = vst.msk [vmem:[%s3219_s3 + $0xa8] sm:$0xf] %vm1683_vm0, %v2047_v47  ;;  %1776 = vst.msk [vmem:[%s3219_s3 + $0x170] sm:$0xf] %vm1683_vm0, %v2097_v48  ;;  %v2048_v50 = vpack.c.bf16 %v1226_v53, %v1226_v53  ;;  %v2098_v51 = vpack.c.bf16 %v1276_v49, %v1276_v49 }
 0x1c4   :  { %v960_v52 = vpop.f32.mrb[88].mxu0  ;;  %v1160_v54 = vpop.f32.mrb[88].mxu1 }
 0x1c5   :  { %1727 = vst.msk [vmem:[%s3219_s3 + $0xac] sm:$0xf] %vm1683_vm0, %v2048_v50  ;;  %1777 = vst.msk [vmem:[%s3219_s3 + $0x174] sm:$0xf] %vm1683_vm0, %v2098_v51  ;;  %v961_v55 = vadd.f32 %v3136_v42, %v960_v52  ;;  %v1161_v56 = vadd.f32 %v3136_v42, %v1160_v54  ;;  %v962_v57 = vpop.f32.mrb[89].mxu0  ;;  %v1162_v58 = vpop.f32.mrb[89].mxu1 }
 0x1c6   :  { %v963_v59 = vpop.f32.mrb[90].mxu0  ;;  %v1163_v60 = vpop.f32.mrb[90].mxu1 }
 0x1c7   :  { %v1227_v61 = vmax.f32 %v961_v55, 0.0  ;;  %v1277_v62 = vmax.f32 %v1161_v56, 0.0  ;;  %v964_v63 = vadd.f32 %v3136_v42, %v963_v59  ;;  %v1164_v0 = vadd.f32 %v3136_v42, %v1163_v60  ;;  %v965_v1 = vpop.f32.mrb[91].mxu0  ;;  %v1165_v2 = vpop.f32.mrb[91].mxu1 }
 0x1c9   :  { %v2049_v3 = vpack.c.bf16 %v1227_v61, %v1227_v61  ;;  %v2099_v4 = vpack.c.bf16 %v1277_v62, %v1277_v62  ;;  %v1228_v5 = vmax.f32 %v964_v63, 0.0  ;;  %v1278_v6 = vmax.f32 %v1164_v0, 0.0 }
 0x1cb   :  { %1728 = vst.msk [vmem:[%s3219_s3 + $0xb0] sm:$0xf] %vm1683_vm0, %v2049_v3  ;;  %1778 = vst.msk [vmem:[%s3219_s3 + $0x178] sm:$0xf] %vm1683_vm0, %v2099_v4  ;;  %v2050_v7 = vpack.c.bf16 %v1228_v5, %v1228_v5  ;;  %v2100_v8 = vpack.c.bf16 %v1278_v6, %v1278_v6 }
 0x1cc   :  { %v968_v9 = vpop.f32.mrb[92].mxu0  ;;  %v1168_v10 = vpop.f32.mrb[92].mxu1 }
 0x1cd   :  { %1729 = vst.msk [vmem:[%s3219_s3 + $0xb4] sm:$0xf] %vm1683_vm0, %v2050_v7  ;;  %1779 = vst.msk [vmem:[%s3219_s3 + $0x17c] sm:$0xf] %vm1683_vm0, %v2100_v8  ;;  %v969_v11 = vadd.f32 %v3136_v42, %v968_v9  ;;  %v1169_v12 = vadd.f32 %v3136_v42, %v1168_v10  ;;  %v970_v13 = vpop.f32.mrb[93].mxu0  ;;  %v1170_v14 = vpop.f32.mrb[93].mxu1 }
 0x1ce   :  { %v971_v15 = vpop.f32.mrb[94].mxu0  ;;  %v1171_v16 = vpop.f32.mrb[94].mxu1 }
 0x1cf   :  { %v1229_v17 = vmax.f32 %v969_v11, 0.0  ;;  %v1279_v18 = vmax.f32 %v1169_v12, 0.0  ;;  %v972_v19 = vadd.f32 %v3136_v42, %v971_v15  ;;  %v1172_v20 = vadd.f32 %v3136_v42, %v1171_v16  ;;  %v973_v21 = vpop.f32.mrb[95].mxu0  ;;  %v1173_v22 = vpop.f32.mrb[95].mxu1 }
 0x1d1   :  { %v2051_v23 = vpack.c.bf16 %v1229_v17, %v1229_v17  ;;  %v2101_v24 = vpack.c.bf16 %v1279_v18, %v1279_v18  ;;  %v1230_v25 = vmax.f32 %v972_v19, 0.0  ;;  %v1280_v26 = vmax.f32 %v1172_v20, 0.0 }
 0x1d3   :  { %1730 = vst.msk [vmem:[%s3219_s3 + $0xb8] sm:$0xf] %vm1683_vm0, %v2051_v23  ;;  %1780 = vst.msk [vmem:[%s3219_s3 + $0x180] sm:$0xf] %vm1683_vm0, %v2101_v24  ;;  %v2052_v27 = vpack.c.bf16 %v1230_v25, %v1230_v25  ;;  %v2102_v28 = vpack.c.bf16 %v1280_v26, %v1280_v26 }
 0x1d4   :  { %v976_v29 = vpop.f32.mrb[96].mxu0  ;;  %v1176_v30 = vpop.f32.mrb[96].mxu1 }
 0x1d5   :  { %1731 = vst.msk [vmem:[%s3219_s3 + $0xbc] sm:$0xf] %vm1683_vm0, %v2052_v27  ;;  %1781 = vst.msk [vmem:[%s3219_s3 + $0x184] sm:$0xf] %vm1683_vm0, %v2102_v28  ;;  %v977_v31 = vadd.f32 %v3136_v42, %v976_v29  ;;  %v1177_v32 = vadd.f32 %v3136_v42, %v1176_v30  ;;  %v978_v33 = vpop.f32.mrb[97].mxu0  ;;  %v1178_v34 = vpop.f32.mrb[97].mxu1 }
 0x1d6   :  { %v979_v35 = vpop.f32.mrb[98].mxu0  ;;  %v1179_v36 = vpop.f32.mrb[98].mxu1 }
 0x1d7   :  { %v1231_v37 = vmax.f32 %v977_v31, 0.0  ;;  %v1281_v38 = vmax.f32 %v1177_v32, 0.0  ;;  %v980_v39 = vadd.f32 %v3136_v42, %v979_v35  ;;  %v1180_v40 = vadd.f32 %v3136_v42, %v1179_v36  ;;  %v981_v41 = vpop.f32.mrb[99].mxu0  ;;  %v1181_v43 = vpop.f32.mrb[99].mxu1 }
 0x1d9   :  { %v2053_v44 = vpack.c.bf16 %v1231_v37, %v1231_v37  ;;  %v2103_v45 = vpack.c.bf16 %v1281_v38, %v1281_v38  ;;  %v1232_v46 = vmax.f32 %v980_v39, 0.0  ;;  %v1282_v47 = vmax.f32 %v1180_v40, 0.0 }
 0x1db   :  { %1732 = vst.msk [vmem:[%s3219_s3 + $0xc0] sm:$0xf] %vm1683_vm0, %v2053_v44  ;;  %1782 = vst.msk [vmem:[%s3219_s3 + $0x188] sm:$0xf] %vm1683_vm0, %v2103_v45  ;;  %v2054_v48 = vpack.c.bf16 %v1232_v46, %v1232_v46  ;;  %v2104_v53 = vpack.c.bf16 %v1282_v47, %v1282_v47 }
 0x1dd   :  { %1733 = vst.msk [vmem:[%s3219_s3 + $0xc4] sm:$0xf] %vm1683_vm0, %v2054_v48  ;;  %1783 = vst.msk [vmem:[%s3219_s3 + $0x18c] sm:$0xf] %vm1683_vm0, %v2104_v53 }

// kernel: a3c_forward.4
= control target key start
LH: loop header
LB: loop body
LE: loop exit
PB: predicated region body
PF: predicated region fallthrough
CT: control target
= control target key end

     0   :  { %vm504_vm0 = vcmask 257024   ;;  %vm525_vm1 = vcmask 253952   ;;  %s998_s1 = inlined_call_operand.vmem [shape: bf16[256,32], index: 1, kind: input, shape index: {}]   ;;  %s999_s0 = inlined_call_operand.vmem [shape: bf16[162,256], index: 0, kind: input, shape index: {}]   ;;  %s1000_s2 = inlined_call_operand.vmem [shape: f32[1,32], index: 2, kind: input, shape index: {}]   ;;  %s1001_s3 = inlined_call_operand.vmem [shape: bf16[162,32], index: 3, kind: output, shape index: {}]  }
   0x1   :  { %v710_v0 = vld [vmem:[%s998_s1 + $0x40] sm:$0xff]   ;;  %v712_v2 = vld [vmem:[%s998_s1 + $0x48] sm:$0xff]   ;;  %v714_v4 = vld [vmem:[%s998_s1 + $0x50] sm:$0xff]  }
   0x2   :  { %v711_v1 = vld [vmem:[%s998_s1] sm:$0xff]   ;;  %612 = vmatprep.subr.bf16.mxu0 %v710_v0  ;;  %694 = vmatprep.subr.bf16.mxu1 %v710_v0  ;;  %v713_v3 = vld [vmem:[%s998_s1 + $0x8] sm:$0xff]   ;;  %v715_v5 = vld [vmem:[%s998_s1 + $0x10] sm:$0xff]  }
   0x3   :  { %613 = vmatpush3.bf16.msra.mxu0 %v711_v1  ;;  %702 = vmatpush3.bf16.msra.mxu1 %v711_v1  ;;  %v716_v6 = vld [vmem:[%s998_s1 + $0x58] sm:$0xff]   ;;  %v718_v8 = vld [vmem:[%s998_s1 + $0x60] sm:$0xff]   ;;  %v720_v10 = vld [vmem:[%s998_s1 + $0x68] sm:$0xff]  }
   0x4   :  { %614 = vmatprep.subr.bf16.mxu0 %v712_v2  ;;  %695 = vmatprep.subr.bf16.mxu1 %v712_v2  ;;  %v717_v7 = vld [vmem:[%s998_s1 + $0x18] sm:$0xff]   ;;  %v719_v9 = vld [vmem:[%s998_s1 + $0x20] sm:$0xff]   ;;  %v721_v13 = vld [vmem:[%s998_s1 + $0x28] sm:$0xff]  }
   0x5   :  { %v728_v11 = vld [vmem:[%s999_s0 + $0x4] ss:$8 sps:$4 sm:$0xff]   ;;  %v722_v14 = vld [vmem:[%s998_s1 + $0x70] sm:$0xff]   ;;  %v724_v16 = vld [vmem:[%s998_s1 + $0x78] sm:$0xff]  }
   0x6   :  { %v731_v12 = vld [vmem:[%s999_s0 + $0x64] ss:$8 sps:$4 sm:$0xff]   ;;  %310 = vmatprep.mubr.bf16.mxu0 %v728_v11  ;;  %v723_v15 = vld [vmem:[%s998_s1 + $0x30] sm:$0xff]   ;;  %v725_v17 = vld [vmem:[%s998_s1 + $0x38] sm:$0xff]  }
   0x7   :  { %615 = vmatpush3.bf16.msra.mxu0 %v713_v3  ;;  %703 = vmatpush3.bf16.msra.mxu1 %v713_v3  ;;  %v726_v18 = vld [vmem:[%s999_s0] ss:$8 sps:$4 sm:$0xff]   ;;  %v732_v20 = vld [vmem:[%s999_s0 + $0x14] ss:$8 sps:$4 sm:$0xff]   ;;  %v734_v22 = vld [vmem:[%s999_s0 + $0x10] ss:$8 sps:$4 sm:$0xff]  }
   0x8   :  { %616 = vmatprep.subr.bf16.mxu0 %v714_v4  ;;  %696 = vmatprep.subr.bf16.mxu1 %v714_v4  ;;  %v729_v19 = vld [vmem:[%s999_s0 + $0x60] ss:$8 sps:$4 sm:$0xff]   ;;  %v735_v21 = vld [vmem:[%s999_s0 + $0x74] ss:$8 sps:$4 sm:$0xff]   ;;  %v739_v23 = vld [vmem:[%s999_s0 + $0x70] ss:$8 sps:$4 sm:$0xff]  }
   0x9   :  { %358 = vmatprep.mubr.bf16.mxu1 %v731_v12  ;;  %v737_v24 = vld [vmem:[%s999_s0 + $0x24] ss:$8 sps:$4 sm:$0xff]   ;;  %v740_v26 = vld [vmem:[%s999_s0 + $0x20] ss:$8 sps:$4 sm:$0xff]   ;;  %v743_v28 = vld [vmem:[%s999_s0 + $0x34] ss:$8 sps:$4 sm:$0xff]  }
   0xa   :  { %v741_v25 = vld [vmem:[%s999_s0 + $0x84] ss:$8 sps:$4 sm:$0xff]   ;;  %v745_v27 = vld [vmem:[%s999_s0 + $0x80] ss:$8 sps:$4 sm:$0xff]   ;;  %v747_v29 = vld [vmem:[%s999_s0 + $0x94] ss:$8 sps:$4 sm:$0xff]  }
   0xb   :  { %617 = vmatpush3.bf16.msra.mxu0 %v715_v5  ;;  %704 = vmatpush3.bf16.msra.mxu1 %v715_v5  ;;  %v35_v30 = vld [vmem:[%s999_s0 + $0xa0] sm:$0x11]  ;;  %v746_v31 = vld [vmem:[%s999_s0 + $0x30] ss:$8 sps:$4 sm:$0xff]   ;;  %v754_v37 = vld [vmem:[%s999_s0 + $0x54] ss:$8 sps:$4 sm:$0xff]  }
   0xc   :  { %618 = vmatprep.subr.bf16.mxu0 %v716_v6  ;;  %697 = vmatprep.subr.bf16.mxu1 %v716_v6  ;;  %v751_v32 = vld [vmem:[%s999_s0 + $0x90] ss:$8 sps:$4 sm:$0xff]   ;;  %v749_v33 = vld [vmem:[%s999_s0 + $0x44] ss:$8 sps:$4 sm:$0xff]   ;;  %v553_v34 = vcombine.high %v35_v30, %v35_v30  ;;  %v752_v35 = vld [vmem:[%s999_s0 + $0x40] ss:$8 sps:$4 sm:$0xff]   ;;  %v552_v36 = vcombine.low %v35_v30, %v35_v30 }
   0xd   :  { %v757_v38 = vld [vmem:[%s999_s0 + $0x50] ss:$8 sps:$4 sm:$0xff]   ;;  %v892_v41 = vld [vmem:[%s1000_s2] ss:$0 sm:$0xff] }
   0xf   :  { %619 = vmatpush3.bf16.msra.mxu0 %v717_v7  ;;  %705 = vmatpush3.bf16.msra.mxu1 %v717_v7 }
  0x10   :  { %620 = vmatprep.subr.bf16.mxu0 %v718_v8  ;;  %698 = vmatprep.subr.bf16.mxu1 %v718_v8 }
  0x13   :  { %621 = vmatpush3.bf16.msra.mxu0 %v719_v9  ;;  %706 = vmatpush3.bf16.msra.mxu1 %v719_v9 }
  0x14   :  { %622 = vmatprep.subr.bf16.mxu0 %v720_v10  ;;  %699 = vmatprep.subr.bf16.mxu1 %v720_v10 }
  0x17   :  { %623 = vmatpush3.bf16.msra.mxu0 %v721_v13  ;;  %707 = vmatpush3.bf16.msra.mxu1 %v721_v13 }
  0x18   :  { %624 = vmatprep.subr.bf16.mxu0 %v722_v14  ;;  %700 = vmatprep.subr.bf16.mxu1 %v722_v14 }
  0x1b   :  { %625 = vmatpush3.bf16.msra.mxu0 %v723_v15  ;;  %708 = vmatpush3.bf16.msra.mxu1 %v723_v15 }
  0x1c   :  { %626 = vmatprep.subr.bf16.mxu0 %v724_v16  ;;  %701 = vmatprep.subr.bf16.mxu1 %v724_v16 }
  0x1f   :  { %627 = vmatpush3.bf16.msra.mxu0 %v725_v17  ;;  %709 = vmatpush3.bf16.msra.mxu1 %v725_v17 }
  0x22   :  { %311 = vmatmul.mubr.bf16.vlgmr.msra.gmra.mrb[0].mxu0 %v726_v18  ;;  %359 = vmatmul.mubr.bf16.vlgmr.msra.gmra.mrb[0].mxu1 %v729_v19 }
  0x23   :  { %318 = vmatprep.mubr.bf16.mxu0 %v732_v20  ;;  %366 = vmatprep.mubr.bf16.mxu1 %v735_v21 }
  0x2a   :  { %319 = vmatmul.mubr.bf16.gmra.mrb[4].mxu0 %v734_v22  ;;  %367 = vmatmul.mubr.bf16.gmra.mrb[4].mxu1 %v739_v23 }
  0x2b   :  { %326 = vmatprep.mubr.bf16.mxu0 %v737_v24  ;;  %374 = vmatprep.mubr.bf16.mxu1 %v741_v25 }
  0x32   :  { %327 = vmatmul.mubr.bf16.gmra.mrb[8].mxu0 %v740_v26  ;;  %375 = vmatmul.mubr.bf16.gmra.mrb[8].mxu1 %v745_v27 }
  0x33   :  { %334 = vmatprep.mubr.bf16.mxu0 %v743_v28  ;;  %382 = vmatprep.mubr.bf16.mxu1 %v747_v29 }
  0x3a   :  { %335 = vmatmul.mubr.bf16.gmra.mrb[12].mxu0 %v746_v31  ;;  %383 = vmatmul.mubr.bf16.gmra.mrb[12].mxu1 %v751_v32 }
  0x3b   :  { %342 = vmatprep.mubr.bf16.mxu0 %v749_v33  ;;  %390 = vmatprep.mubr.bf16.mxu1 %v553_v34 }
  0x42   :  { %343 = vmatmul.mubr.bf16.gmra.mrb[16].mxu0 %v752_v35  ;;  %391 = vmatmul.mubr.bf16.gmra.mrb[16].mxu1 %v552_v36 }
  0x43   :  { %350 = vmatprep.mubr.bf16.mxu0 %v754_v37 }
  0x4a   :  { %351 = vmatmul.mubr.bf16.gmra.mrb[20].mxu0 %v757_v38 }
  0xf5   :  { %v628_v39 = vpop.f32.mrb[0].mxu0  ;;  %v664_v40 = vpop.f32.mrb[0].mxu1 }
  0xf6   :  { %v629_v42 = vpop.f32.mrb[1].mxu0  ;;  %v665_v43 = vpop.f32.mrb[1].mxu1 }
  0xf7   :  { %v630_v44 = vadd.f32 %v629_v42, %v628_v39  ;;  %v631_v45 = vpop.f32.mrb[2].mxu0  ;;  %v666_v46 = vadd.f32 %v665_v43, %v664_v40  ;;  %v667_v47 = vpop.f32.mrb[2].mxu1 }
  0xf8   :  { %v632_v48 = vpop.f32.mrb[3].mxu0  ;;  %v668_v49 = vpop.f32.mrb[3].mxu1 }
  0xf9   :  { %v313_v50 = vadd.f32 %v630_v44, %v892_v41  ;;  %v633_v51 = vadd.f32 %v632_v48, %v631_v45  ;;  %v361_v52 = vadd.f32 %v666_v46, %v892_v41  ;;  %v669_v53 = vadd.f32 %v668_v49, %v667_v47 }
  0xfb   :  { %v398_v54 = vmax.f32 %v313_v50, 0.0  ;;  %v316_v55 = vadd.f32 %v633_v51, %v892_v41  ;;  %v410_v56 = vmax.f32 %v361_v52, 0.0  ;;  %v364_v57 = vadd.f32 %v669_v53, %v892_v41 }
  0xfd   :  { %v591_v58 = vpack.c.bf16 %v398_v54, %v398_v54  ;;  %v399_v59 = vmax.f32 %v316_v55, 0.0  ;;  %v634_v60 = vpop.f32.mrb[4].mxu0  ;;  %v603_v61 = vpack.c.bf16 %v410_v56, %v410_v56  ;;  %v411_v62 = vmax.f32 %v364_v57, 0.0  ;;  %v670_v63 = vpop.f32.mrb[4].mxu1 }
  0xfe   :  { %v635_v0 = vpop.f32.mrb[5].mxu0  ;;  %v671_v1 = vpop.f32.mrb[5].mxu1 }
  0xff   :  { %505 = vst.msk [vmem:[%s1001_s3] sm:$0xf] %vm504_vm0, %v591_v58  ;;  %v592_v2 = vpack.c.bf16 %v399_v59, %v399_v59  ;;  %517 = vst.msk [vmem:[%s1001_s3 + $0x30] sm:$0xf] %vm504_vm0, %v603_v61  ;;  %v636_v3 = vadd.f32 %v635_v0, %v634_v60  ;;  %v637_v4 = vpop.f32.mrb[6].mxu0  ;;  %v604_v5 = vpack.c.bf16 %v411_v62, %v411_v62  ;;  %v673_v7 = vpop.f32.mrb[6].mxu1 }
 0x100   :  { %v672_v6 = vadd.f32 %v671_v1, %v670_v63  ;;  %v638_v8 = vpop.f32.mrb[7].mxu0  ;;  %v674_v9 = vpop.f32.mrb[7].mxu1 }
 0x101   :  { %506 = vst.msk [vmem:[%s1001_s3 + $0x4] sm:$0xf] %vm504_vm0, %v592_v2  ;;  %v321_v10 = vadd.f32 %v636_v3, %v892_v41  ;;  %518 = vst.msk [vmem:[%s1001_s3 + $0x34] sm:$0xf] %vm504_vm0, %v604_v5  ;;  %v639_v11 = vadd.f32 %v638_v8, %v637_v4  ;;  %v675_v13 = vadd.f32 %v674_v9, %v673_v7 }
 0x102   :  { %v369_v12 = vadd.f32 %v672_v6, %v892_v41 }
 0x103   :  { %v400_v14 = vmax.f32 %v321_v10, 0.0  ;;  %v324_v15 = vadd.f32 %v639_v11, %v892_v41  ;;  %v372_v17 = vadd.f32 %v675_v13, %v892_v41 }
 0x104   :  { %v412_v16 = vmax.f32 %v369_v12, 0.0 }
 0x105   :  { %v593_v18 = vpack.c.bf16 %v400_v14, %v400_v14  ;;  %v401_v19 = vmax.f32 %v324_v15, 0.0  ;;  %v640_v20 = vpop.f32.mrb[8].mxu0  ;;  %v413_v22 = vmax.f32 %v372_v17, 0.0  ;;  %v676_v23 = vpop.f32.mrb[8].mxu1 }
 0x106   :  { %v605_v21 = vpack.c.bf16 %v412_v16, %v412_v16  ;;  %v641_v24 = vpop.f32.mrb[9].mxu0  ;;  %v677_v25 = vpop.f32.mrb[9].mxu1 }
 0x107   :  { %507 = vst.msk [vmem:[%s1001_s3 + $0x8] sm:$0xf] %vm504_vm0, %v593_v18  ;;  %v594_v26 = vpack.c.bf16 %v401_v19, %v401_v19  ;;  %v642_v27 = vadd.f32 %v641_v24, %v640_v20  ;;  %v643_v28 = vpop.f32.mrb[10].mxu0  ;;  %v606_v29 = vpack.c.bf16 %v413_v22, %v413_v22  ;;  %v678_v30 = vadd.f32 %v677_v25, %v676_v23  ;;  %v679_v31 = vpop.f32.mrb[10].mxu1 }
 0x108   :  { %519 = vst.msk [vmem:[%s1001_s3 + $0x38] sm:$0xf] %vm504_vm0, %v605_v21  ;;  %v644_v32 = vpop.f32.mrb[11].mxu0  ;;  %v680_v33 = vpop.f32.mrb[11].mxu1 }
 0x109   :  { %508 = vst.msk [vmem:[%s1001_s3 + $0xc] sm:$0xf] %vm504_vm0, %v594_v26  ;;  %v329_v34 = vadd.f32 %v642_v27, %v892_v41  ;;  %520 = vst.msk [vmem:[%s1001_s3 + $0x3c] sm:$0xf] %vm504_vm0, %v606_v29  ;;  %v645_v35 = vadd.f32 %v644_v32, %v643_v28  ;;  %v377_v36 = vadd.f32 %v678_v30, %v892_v41 }
 0x10a   :  { %v681_v37 = vadd.f32 %v680_v33, %v679_v31 }
 0x10b   :  { %v402_v38 = vmax.f32 %v329_v34, 0.0  ;;  %v332_v39 = vadd.f32 %v645_v35, %v892_v41  ;;  %v414_v40 = vmax.f32 %v377_v36, 0.0 }
 0x10c   :  { %v380_v42 = vadd.f32 %v681_v37, %v892_v41 }
 0x10d   :  { %v595_v43 = vpack.c.bf16 %v402_v38, %v402_v38  ;;  %v403_v44 = vmax.f32 %v332_v39, 0.0  ;;  %v646_v45 = vpop.f32.mrb[12].mxu0  ;;  %v607_v46 = vpack.c.bf16 %v414_v40, %v414_v40  ;;  %v682_v48 = vpop.f32.mrb[12].mxu1 }
 0x10e   :  { %v415_v47 = vmax.f32 %v380_v42, 0.0  ;;  %v647_v49 = vpop.f32.mrb[13].mxu0  ;;  %v683_v50 = vpop.f32.mrb[13].mxu1 }
 0x10f   :  { %509 = vst.msk [vmem:[%s1001_s3 + $0x10] sm:$0xf] %vm504_vm0, %v595_v43  ;;  %v596_v51 = vpack.c.bf16 %v403_v44, %v403_v44  ;;  %521 = vst.msk [vmem:[%s1001_s3 + $0x40] sm:$0xf] %vm504_vm0, %v607_v46  ;;  %v648_v52 = vadd.f32 %v647_v49, %v646_v45  ;;  %v649_v53 = vpop.f32.mrb[14].mxu0  ;;  %v684_v55 = vadd.f32 %v683_v50, %v682_v48  ;;  %v685_v56 = vpop.f32.mrb[14].mxu1 }
 0x110   :  { %v608_v54 = vpack.c.bf16 %v415_v47, %v415_v47  ;;  %v650_v57 = vpop.f32.mrb[15].mxu0  ;;  %v686_v58 = vpop.f32.mrb[15].mxu1 }
 0x111   :  { %510 = vst.msk [vmem:[%s1001_s3 + $0x14] sm:$0xf] %vm504_vm0, %v596_v51  ;;  %v337_v59 = vadd.f32 %v648_v52, %v892_v41  ;;  %v651_v60 = vadd.f32 %v650_v57, %v649_v53  ;;  %v385_v61 = vadd.f32 %v684_v55, %v892_v41  ;;  %v687_v62 = vadd.f32 %v686_v58, %v685_v56 }
 0x112   :  { %522 = vst.msk [vmem:[%s1001_s3 + $0x44] sm:$0xf] %vm504_vm0, %v608_v54 }
 0x113   :  { %v404_v63 = vmax.f32 %v337_v59, 0.0  ;;  %v340_v0 = vadd.f32 %v651_v60, %v892_v41  ;;  %v416_v1 = vmax.f32 %v385_v61, 0.0  ;;  %v388_v2 = vadd.f32 %v687_v62, %v892_v41 }
 0x115   :  { %v597_v3 = vpack.c.bf16 %v404_v63, %v404_v63  ;;  %v405_v4 = vmax.f32 %v340_v0, 0.0  ;;  %v652_v5 = vpop.f32.mrb[16].mxu0  ;;  %v609_v6 = vpack.c.bf16 %v416_v1, %v416_v1  ;;  %v417_v7 = vmax.f32 %v388_v2, 0.0  ;;  %v688_v8 = vpop.f32.mrb[16].mxu1 }
 0x116   :  { %v653_v9 = vpop.f32.mrb[17].mxu0  ;;  %v689_v10 = vpop.f32.mrb[17].mxu1 }
 0x117   :  { %511 = vst.msk [vmem:[%s1001_s3 + $0x18] sm:$0xf] %vm504_vm0, %v597_v3  ;;  %v598_v11 = vpack.c.bf16 %v405_v4, %v405_v4  ;;  %523 = vst.msk [vmem:[%s1001_s3 + $0x48] sm:$0xf] %vm504_vm0, %v609_v6  ;;  %v654_v12 = vadd.f32 %v653_v9, %v652_v5  ;;  %v655_v13 = vpop.f32.mrb[18].mxu0  ;;  %v610_v14 = vpack.c.bf16 %v417_v7, %v417_v7  ;;  %v691_v16 = vpop.f32.mrb[18].mxu1 }
 0x118   :  { %v690_v15 = vadd.f32 %v689_v10, %v688_v8  ;;  %v656_v17 = vpop.f32.mrb[19].mxu0  ;;  %v692_v18 = vpop.f32.mrb[19].mxu1 }
 0x119   :  { %512 = vst.msk [vmem:[%s1001_s3 + $0x1c] sm:$0xf] %vm504_vm0, %v598_v11  ;;  %v345_v19 = vadd.f32 %v654_v12, %v892_v41  ;;  %524 = vst.msk [vmem:[%s1001_s3 + $0x4c] sm:$0xf] %vm504_vm0, %v610_v14  ;;  %v657_v20 = vadd.f32 %v656_v17, %v655_v13 }
 0x11a   :  { %v393_v21 = vadd.f32 %v690_v15, %v892_v41 }
 0x11b   :  { %v406_v22 = vmax.f32 %v345_v19, 0.0  ;;  %v348_v23 = vadd.f32 %v657_v20, %v892_v41 }
 0x11c   :  { %v418_v24 = vmax.f32 %v393_v21, 0.0 }
 0x11d   :  { %v599_v25 = vpack.c.bf16 %v406_v22, %v406_v22  ;;  %v407_v26 = vmax.f32 %v348_v23, 0.0  ;;  %v658_v27 = vpop.f32.mrb[20].mxu0 }
 0x11e   :  { %v611_v28 = vpack.c.bf16 %v418_v24, %v418_v24  ;;  %v659_v29 = vpop.f32.mrb[21].mxu0 }
 0x11f   :  { %513 = vst.msk [vmem:[%s1001_s3 + $0x20] sm:$0xf] %vm504_vm0, %v599_v25  ;;  %v600_v30 = vpack.c.bf16 %v407_v26, %v407_v26  ;;  %v660_v31 = vadd.f32 %v659_v29, %v658_v27  ;;  %v661_v32 = vpop.f32.mrb[22].mxu0 }
 0x120   :  { %526 = vst.msk [vmem:[%s1001_s3 + $0x50] sm:$0x1] %vm525_vm1, %v611_v28  ;;  %v662_v33 = vpop.f32.mrb[23].mxu0 }
 0x121   :  { %514 = vst.msk [vmem:[%s1001_s3 + $0x24] sm:$0xf] %vm504_vm0, %v600_v30  ;;  %v353_v34 = vadd.f32 %v660_v31, %v892_v41  ;;  %v663_v35 = vadd.f32 %v662_v33, %v661_v32 }
 0x123   :  { %v408_v36 = vmax.f32 %v353_v34, 0.0  ;;  %v356_v37 = vadd.f32 %v663_v35, %v892_v41 }
 0x125   :  { %v601_v38 = vpack.c.bf16 %v408_v36, %v408_v36  ;;  %v409_v39 = vmax.f32 %v356_v37, 0.0 }
 0x127   :  { %515 = vst.msk [vmem:[%s1001_s3 + $0x28] sm:$0xf] %vm504_vm0, %v601_v38  ;;  %v602_v40 = vpack.c.bf16 %v409_v39, %v409_v39 }
 0x129   :  { %516 = vst.msk [vmem:[%s1001_s3 + $0x2c] sm:$0xf] %vm504_vm0, %v602_v40 }

// kernel: a3c_forward.5
= control target key start
LH: loop header
LB: loop body
LE: loop exit
PB: predicated region body
PF: predicated region fallthrough
CT: control target
= control target key end

     0   :  { %v353_v38 = vlaneseq  ;;  %v3755_v39 = vmov 1966171168   ;;  %s4946_s0 = inlined_call_operand.vmem [shape: bf16[2,2592], index: 0, kind: input, shape index: {}]   ;;  %s4947_s1 = inlined_call_operand.vmem [shape: bf16[2592,256], index: 1, kind: input, shape index: {}]   ;;  %s4948_s2 = inlined_call_operand.vmem [shape: f32[1,256], index: 2, kind: input, shape index: {}]   ;;  %s4949_s3 = inlined_call_operand.vmem [shape: bf16[256,7], index: 3, kind: input, shape index: {}]   ;;  %s4950_s4 = inlined_call_operand.vmem [shape: f32[1,7], index: 4, kind: input, shape index: {}]   ;;  %s4951_s5 = inlined_call_operand.hbm [shape: f32[2,6], index: 5, kind: output, shape index: {0}]   ;;  %s4952_s6 = inlined_call_operand.vmem [shape: f32[2,1], index: 6, kind: output, shape index: {1}]  }
   0x1   :  { %v3222_v0 = vld [vmem:[%s4947_s1 + $0x4] ss:$8 sps:$4 sm:$0xff]   ;;  %v3226_v2 = vld [vmem:[%s4947_s1] ss:$8 sps:$4 sm:$0xff]   ;;  %v3228_v4 = vld [vmem:[%s4947_s1 + $0x14] ss:$8 sps:$4 sm:$0xff]   ;;  %v368_v40 = vunpack.c.l.s4 %v3755_v39 }
   0x2   :  { %v3224_v1 = vld [vmem:[%s4947_s1 + $0x504] ss:$8 sps:$4 sm:$0xff]   ;;  %2147 = vmatprep.subr.bf16.mxu1 %v3222_v0  ;;  %v3227_v3 = vld [vmem:[%s4947_s1 + $0x500] ss:$8 sps:$4 sm:$0xff]   ;;  %v3230_v5 = vld [vmem:[%s4947_s1 + $0x514] ss:$8 sps:$4 sm:$0xff]  }
   0x3   :  { %2352 = vmatprep.subr.bf16.mxu0 %v3224_v1  ;;  %2148 = vmatpush1.bf16.msra.mxu1 %v3226_v2  ;;  %v3232_v6 = vld [vmem:[%s4947_s1 + $0x10] ss:$8 sps:$4 sm:$0xff]   ;;  %v3234_v8 = vld [vmem:[%s4947_s1 + $0x24] ss:$8 sps:$4 sm:$0xff]   ;;  %v3238_v10 = vld [vmem:[%s4947_s1 + $0x20] ss:$8 sps:$4 sm:$0xff]   ;;  %v369_v46 = vunpack.c.0.s8 %v368_v40 }
   0x4   :  { %2353 = vmatpush1.bf16.msra.mxu0 %v3227_v3  ;;  %2149 = vmatprep.subr.bf16.mxu1 %v3228_v4  ;;  %v3233_v7 = vld [vmem:[%s4947_s1 + $0x510] ss:$8 sps:$4 sm:$0xff]   ;;  %v3236_v9 = vld [vmem:[%s4947_s1 + $0x524] ss:$8 sps:$4 sm:$0xff]   ;;  %v3239_v11 = vld [vmem:[%s4947_s1 + $0x520] ss:$8 sps:$4 sm:$0xff]  }
   0x5   :  { %2354 = vmatprep.subr.bf16.mxu0 %v3230_v5  ;;  %v3240_v12 = vld [vmem:[%s4947_s1 + $0x34] ss:$8 sps:$4 sm:$0xff]   ;;  %v3244_v14 = vld [vmem:[%s4947_s1 + $0x30] ss:$8 sps:$4 sm:$0xff]   ;;  %v3246_v16 = vld [vmem:[%s4947_s1 + $0x44] ss:$8 sps:$4 sm:$0xff]  }
   0x6   :  { %v3242_v13 = vld [vmem:[%s4947_s1 + $0x534] ss:$8 sps:$4 sm:$0xff]   ;;  %v3245_v15 = vld [vmem:[%s4947_s1 + $0x530] ss:$8 sps:$4 sm:$0xff]   ;;  %v3248_v17 = vld [vmem:[%s4947_s1 + $0x544] ss:$8 sps:$4 sm:$0xff]  }
   0x7   :  { %2150 = vmatpush1.bf16.msra.mxu1 %v3232_v6  ;;  %v3250_v18 = vld [vmem:[%s4947_s1 + $0x40] ss:$8 sps:$4 sm:$0xff]   ;;  %v3252_v20 = vld [vmem:[%s4947_s1 + $0x54] ss:$8 sps:$4 sm:$0xff]   ;;  %v3256_v22 = vld [vmem:[%s4947_s1 + $0x50] ss:$8 sps:$4 sm:$0xff]  }
   0x8   :  { %2355 = vmatpush1.bf16.msra.mxu0 %v3233_v7  ;;  %2151 = vmatprep.subr.bf16.mxu1 %v3234_v8  ;;  %v3251_v19 = vld [vmem:[%s4947_s1 + $0x540] ss:$8 sps:$4 sm:$0xff]   ;;  %v3254_v21 = vld [vmem:[%s4947_s1 + $0x554] ss:$8 sps:$4 sm:$0xff]   ;;  %v3257_v23 = vld [vmem:[%s4947_s1 + $0x550] ss:$8 sps:$4 sm:$0xff]  }
   0x9   :  { %2356 = vmatprep.subr.bf16.mxu0 %v3236_v9  ;;  %v3258_v24 = vld [vmem:[%s4947_s1 + $0x64] ss:$8 sps:$4 sm:$0xff]   ;;  %v3262_v26 = vld [vmem:[%s4947_s1 + $0x60] ss:$8 sps:$4 sm:$0xff]   ;;  %v3264_v28 = vld [vmem:[%s4947_s1 + $0x74] ss:$8 sps:$4 sm:$0xff]  }
   0xa   :  { %v3260_v25 = vld [vmem:[%s4947_s1 + $0x564] ss:$8 sps:$4 sm:$0xff]   ;;  %v3263_v27 = vld [vmem:[%s4947_s1 + $0x560] ss:$8 sps:$4 sm:$0xff]   ;;  %v3266_v29 = vld [vmem:[%s4947_s1 + $0x574] ss:$8 sps:$4 sm:$0xff]  }
   0xb   :  { %2152 = vmatpush1.bf16.msra.mxu1 %v3238_v10  ;;  %v3268_v30 = vld [vmem:[%s4947_s1 + $0x70] ss:$8 sps:$4 sm:$0xff]   ;;  %v3270_v32 = vld [vmem:[%s4947_s1 + $0x84] ss:$8 sps:$4 sm:$0xff]   ;;  %v3274_v34 = vld [vmem:[%s4947_s1 + $0x80] ss:$8 sps:$4 sm:$0xff]  }
   0xc   :  { %2357 = vmatpush1.bf16.msra.mxu0 %v3239_v11  ;;  %2153 = vmatprep.subr.bf16.mxu1 %v3240_v12  ;;  %v3269_v31 = vld [vmem:[%s4947_s1 + $0x570] ss:$8 sps:$4 sm:$0xff]   ;;  %v3272_v33 = vld [vmem:[%s4947_s1 + $0x584] ss:$8 sps:$4 sm:$0xff]   ;;  %v3275_v35 = vld [vmem:[%s4947_s1 + $0x580] ss:$8 sps:$4 sm:$0xff]  }
   0xd   :  { %2358 = vmatprep.subr.bf16.mxu0 %v3242_v13  ;;  %v3276_v36 = vld [vmem:[%s4947_s1 + $0x94] ss:$8 sps:$4 sm:$0xff]   ;;  %v3280_v41 = vld [vmem:[%s4947_s1 + $0x90] ss:$8 sps:$4 sm:$0xff]   ;;  %v3282_v43 = vld [vmem:[%s4947_s1 + $0xa4] ss:$8 sps:$4 sm:$0xff]  }
   0xe   :  { %v3278_v37 = vld [vmem:[%s4947_s1 + $0x594] ss:$8 sps:$4 sm:$0xff]   ;;  %v3281_v42 = vld [vmem:[%s4947_s1 + $0x590] ss:$8 sps:$4 sm:$0xff]   ;;  %v3284_v44 = vld [vmem:[%s4947_s1 + $0x5a4] ss:$8 sps:$4 sm:$0xff]  }
   0xf   :  { %2154 = vmatpush1.bf16.msra.mxu1 %v3244_v14  ;;  %v3920_v45 = vshrl.u32 %v353_v38, 7  ;;  %v3286_v47 = vld [vmem:[%s4947_s1 + $0xa0] ss:$8 sps:$4 sm:$0xff]   ;;  %v3288_v49 = vld [vmem:[%s4947_s1 + $0xb4] ss:$8 sps:$4 sm:$0xff]  }
  0x10   :  { %2359 = vmatpush1.bf16.msra.mxu0 %v3245_v15  ;;  %2155 = vmatprep.subr.bf16.mxu1 %v3246_v16  ;;  %v3287_v48 = vld [vmem:[%s4947_s1 + $0x5a0] ss:$8 sps:$4 sm:$0xff]   ;;  %v3290_v50 = vld [vmem:[%s4947_s1 + $0x5b4] ss:$8 sps:$4 sm:$0xff]   ;;  %v3292_v53 = vld [vmem:[%s4947_s1 + $0xb0] ss:$8 sps:$4 sm:$0xff]  }
  0x11   :  { %2360 = vmatprep.subr.bf16.mxu0 %v3248_v17  ;;  %v3935_v51 = vsub.s32 %v369_v46, %v3920_v45  ;;  %v3940_v52 = vld [vmem:[%s4946_s0] sm:$0xff]  ;;  %v3293_v55 = vld [vmem:[%s4947_s1 + $0x5b0] ss:$8 sps:$4 sm:$0xff]   ;;  %v25_v56 = vld [vmem:[%s4946_s0 + $0x8] sm:$0xff] }
  0x12   :  { %v3294_v57 = vld [vmem:[%s4947_s1 + $0xc4] ss:$8 sps:$4 sm:$0xff]   ;;  %v3298_v63 = vld [vmem:[%s4947_s1 + $0xc0] ss:$8 sps:$4 sm:$0xff]   ;;  %v3300_v1 = vld [vmem:[%s4947_s1 + $0xd4] ss:$8 sps:$4 sm:$0xff]   ;;  %v415_v9 = vcombine.high %v25_v56, %v25_v56 }
  0x13   :  { %2156 = vmatpush1.bf16.msra.mxu1 %v3250_v18  ;;  %v373_v54 = vrot.slane %v3940_v52, %v3935_v51  ;;  %v3296_v58 = vld [vmem:[%s4947_s1 + $0x5c4] ss:$8 sps:$4 sm:$0xff]   ;;  %v422_v60 = vrot.slane %v25_v56, %v3935_v51  ;;  %v3299_v0 = vld [vmem:[%s4947_s1 + $0x5c0] ss:$8 sps:$4 sm:$0xff]   ;;  %v3302_v2 = vld [vmem:[%s4947_s1 + $0x5d4] ss:$8 sps:$4 sm:$0xff]  }
  0x14   :  { %2361 = vmatpush1.bf16.msra.mxu0 %v3251_v19  ;;  %2157 = vmatprep.subr.bf16.mxu1 %v3252_v20  ;;  %v3304_v5 = vld [vmem:[%s4947_s1 + $0xd0] ss:$8 sps:$4 sm:$0xff]   ;;  %v3306_v7 = vld [vmem:[%s4947_s1 + $0xe4] ss:$8 sps:$4 sm:$0xff]   ;;  %v3310_v10 = vld [vmem:[%s4947_s1 + $0xe0] ss:$8 sps:$4 sm:$0xff]   ;;  %v4006_v14 = vrot.slane %v415_v9, %v3935_v51 }
  0x15   :  { %2362 = vmatprep.subr.bf16.mxu0 %v3254_v21  ;;  %v381_v59 = vcombine.high %v373_v54, %v373_v54  ;;  %v430_v62 = vcombine.high %v422_v60, %v422_v60  ;;  %v3305_v6 = vld [vmem:[%s4947_s1 + $0x5d0] ss:$8 sps:$4 sm:$0xff]   ;;  %v3308_v8 = vld [vmem:[%s4947_s1 + $0x5e4] ss:$8 sps:$4 sm:$0xff]   ;;  %v3311_v11 = vld [vmem:[%s4947_s1 + $0x5e0] ss:$8 sps:$4 sm:$0xff]   ;;  %v4009_v15 = vrot.slane %v422_v60, %v3935_v51  ;;  %v4026_v21 = vrot.slane %v373_v54, %v3935_v51 }
  0x16   :  { %v3312_v12 = vld [vmem:[%s4947_s1 + $0xf4] ss:$8 sps:$4 sm:$0xff]   ;;  %v3316_v16 = vld [vmem:[%s4947_s1 + $0xf0] ss:$8 sps:$4 sm:$0xff]   ;;  %v3321_v18 = vld [vmem:[%s4947_s1 + $0x104] ss:$8 sps:$4 sm:$0xff]   ;;  %v431_v20 = vcombine.high %v4006_v14, %v4006_v14 }
  0x17   :  { %2158 = vmatpush1.bf16.msra.mxu1 %v3256_v22  ;;  %v3961_v61 = vrot.slane %v381_v59, %v3935_v51  ;;  %v3976_v3 = vrot.slane %v430_v62, %v3935_v51  ;;  %v3314_v13 = vld [vmem:[%s4947_s1 + $0x5f4] ss:$8 sps:$4 sm:$0xff]   ;;  %v3317_v17 = vld [vmem:[%s4947_s1 + $0x5f0] ss:$8 sps:$4 sm:$0xff]   ;;  %v3325_v19 = vld [vmem:[%s4947_s1 + $0x604] ss:$8 sps:$4 sm:$0xff]   ;;  %v460_v22 = vcombine.high %v4009_v15, %v4009_v15 }
  0x18   :  { %2363 = vmatpush1.bf16.msra.mxu0 %v3257_v23  ;;  %2159 = vmatprep.subr.bf16.mxu1 %v3258_v24  ;;  %v3319_v23 = vld [vmem:[%s4947_s1 + $0x100] ss:$8 sps:$4 sm:$0xff]   ;;  %v3341_v38 = vld [vmem:[%s4947_s1 + $0x630] ss:$8 sps:$4 sm:$0xff]   ;;  %v3346_v39 = vld [vmem:[%s4947_s1 + $0x144] ss:$8 sps:$4 sm:$0xff]  }
  0x19   :  { %2364 = vmatprep.subr.bf16.mxu0 %v3260_v25  ;;  %2179 = vmatprep.mubr.bf16.mxu1 %v3961_v61  ;;  %v462_v4 = vcombine.high %v3976_v3, %v3976_v3  ;;  %v3323_v24 = vld [vmem:[%s4947_s1 + $0x600] ss:$8 sps:$4 sm:$0xff]   ;;  %v3328_v25 = vld [vmem:[%s4947_s1 + $0x114] ss:$8 sps:$4 sm:$0xff]   ;;  %v3349_v40 = vld [vmem:[%s4947_s1 + $0x644] ss:$8 sps:$4 sm:$0xff]  }
  0x1a   :  { %v3350_v46 = vld [vmem:[%s4947_s1 + $0x150] ss:$8 sps:$4 sm:$0xff]   ;;  %v3364_v54 = vld [vmem:[%s4947_s1 + $0x174] ss:$8 sps:$4 sm:$0xff]   ;;  %v3373_v59 = vld [vmem:[%s4947_s1 + $0x684] ss:$8 sps:$4 sm:$0xff]  }
  0x1b   :  { %2160 = vmatpush1.bf16.msra.mxu1 %v3262_v26  ;;  %2384 = vmatprep.mubr.bf16.mxu0 %v462_v4  ;;  %v3331_v26 = vld [vmem:[%s4947_s1 + $0x614] ss:$8 sps:$4 sm:$0xff]   ;;  %v3362_v56 = vld [vmem:[%s4947_s1 + $0x170] ss:$8 sps:$4 sm:$0xff]   ;;  %v3368_v60 = vld [vmem:[%s4947_s1 + $0x180] ss:$8 sps:$4 sm:$0xff]  }
  0x1c   :  { %2365 = vmatpush1.bf16.msra.mxu0 %v3263_v27  ;;  %2161 = vmatprep.subr.bf16.mxu1 %v3264_v28  ;;  %v413_v27 = vcombine.high %v3961_v61, %v3961_v61  ;;  %v4045_v28 = vrot.slane %v431_v20, %v3935_v51  ;;  %v3371_v61 = vld [vmem:[%s4947_s1 + $0x680] ss:$8 sps:$4 sm:$0xff]   ;;  %v3376_v62 = vld [vmem:[%s4947_s1 + $0x194] ss:$8 sps:$4 sm:$0xff]   ;;  %v3385_v4 = vld [vmem:[%s4947_s1 + $0x6a4] ss:$8 sps:$4 sm:$0xff]  }
  0x1d   :  { %2366 = vmatprep.subr.bf16.mxu0 %v3266_v29  ;;  %v3326_v29 = vld [vmem:[%s4947_s1 + $0x110] ss:$8 sps:$4 sm:$0xff]  }
  0x1e   :  { %v3386_v9 = vld [vmem:[%s4947_s1 + $0x1b0] ss:$8 sps:$4 sm:$0xff]  }
  0x1f   :  { %2162 = vmatpush1.bf16.msra.mxu1 %v3268_v30  ;;  %v3329_v30 = vld [vmem:[%s4947_s1 + $0x610] ss:$8 sps:$4 sm:$0xff]  }
  0x20   :  { %2367 = vmatpush1.bf16.msra.mxu0 %v3269_v31  ;;  %2163 = vmatprep.subr.bf16.mxu1 %v3270_v32  ;;  %v3334_v31 = vld [vmem:[%s4947_s1 + $0x124] ss:$8 sps:$4 sm:$0xff]   ;;  %v3401_v20 = vld [vmem:[%s4947_s1 + $0x6d0] ss:$8 sps:$4 sm:$0xff]  }
  0x21   :  { %2368 = vmatprep.subr.bf16.mxu0 %v3272_v33  ;;  %v3337_v32 = vld [vmem:[%s4947_s1 + $0x624] ss:$8 sps:$4 sm:$0xff]   ;;  %v3332_v33 = vld [vmem:[%s4947_s1 + $0x120] ss:$8 sps:$4 sm:$0xff]  }
  0x23   :  { %2164 = vmatpush1.bf16.msra.mxu1 %v3274_v34  ;;  %v3335_v34 = vld [vmem:[%s4947_s1 + $0x620] ss:$8 sps:$4 sm:$0xff]  }
  0x24   :  { %2369 = vmatpush1.bf16.msra.mxu0 %v3275_v35  ;;  %2165 = vmatprep.subr.bf16.mxu1 %v3276_v36  ;;  %v3340_v35 = vld [vmem:[%s4947_s1 + $0x134] ss:$8 sps:$4 sm:$0xff]  }
  0x25   :  { %2370 = vmatprep.subr.bf16.mxu0 %v3278_v37  ;;  %v3343_v36 = vld [vmem:[%s4947_s1 + $0x634] ss:$8 sps:$4 sm:$0xff]   ;;  %v3338_v37 = vld [vmem:[%s4947_s1 + $0x130] ss:$8 sps:$4 sm:$0xff]  }
  0x27   :  { %2166 = vmatpush1.bf16.msra.mxu1 %v3280_v41  ;;  %v3344_v41 = vld [vmem:[%s4947_s1 + $0x140] ss:$8 sps:$4 sm:$0xff]  }
  0x28   :  { %2371 = vmatpush1.bf16.msra.mxu0 %v3281_v42  ;;  %2167 = vmatprep.subr.bf16.mxu1 %v3282_v43  ;;  %v3347_v42 = vld [vmem:[%s4947_s1 + $0x640] ss:$8 sps:$4 sm:$0xff]   ;;  %v3352_v43 = vld [vmem:[%s4947_s1 + $0x154] ss:$8 sps:$4 sm:$0xff]  }
  0x29   :  { %2372 = vmatprep.subr.bf16.mxu0 %v3284_v44  ;;  %v3355_v44 = vld [vmem:[%s4947_s1 + $0x654] ss:$8 sps:$4 sm:$0xff]  }
  0x2b   :  { %2168 = vmatpush1.bf16.msra.mxu1 %v3286_v47  ;;  %v3353_v47 = vld [vmem:[%s4947_s1 + $0x650] ss:$8 sps:$4 sm:$0xff]  }
  0x2c   :  { %2373 = vmatpush1.bf16.msra.mxu0 %v3287_v48  ;;  %2169 = vmatprep.subr.bf16.mxu1 %v3288_v49  ;;  %v3358_v48 = vld [vmem:[%s4947_s1 + $0x164] ss:$8 sps:$4 sm:$0xff]  }
  0x2d   :  { %2374 = vmatprep.subr.bf16.mxu0 %v3290_v50  ;;  %v3361_v49 = vld [vmem:[%s4947_s1 + $0x664] ss:$8 sps:$4 sm:$0xff]   ;;  %v3356_v50 = vld [vmem:[%s4947_s1 + $0x160] ss:$8 sps:$4 sm:$0xff]  }
  0x2f   :  { %2170 = vmatpush1.bf16.msra.mxu1 %v3292_v53  ;;  %v3359_v53 = vld [vmem:[%s4947_s1 + $0x660] ss:$8 sps:$4 sm:$0xff]  }
  0x30   :  { %2375 = vmatpush1.bf16.msra.mxu0 %v3293_v55  ;;  %2171 = vmatprep.subr.bf16.mxu1 %v3294_v57  ;;  %v3367_v55 = vld [vmem:[%s4947_s1 + $0x674] ss:$8 sps:$4 sm:$0xff]   ;;  %v3365_v57 = vld [vmem:[%s4947_s1 + $0x670] ss:$8 sps:$4 sm:$0xff]  }
  0x31   :  { %2376 = vmatprep.subr.bf16.mxu0 %v3296_v58  ;;  %v3370_v58 = vld [vmem:[%s4947_s1 + $0x184] ss:$8 sps:$4 sm:$0xff]  }
  0x33   :  { %2172 = vmatpush1.bf16.msra.mxu1 %v3298_v63  ;;  %v3379_v63 = vld [vmem:[%s4947_s1 + $0x694] ss:$8 sps:$4 sm:$0xff]  }
  0x34   :  { %2377 = vmatpush1.bf16.msra.mxu0 %v3299_v0  ;;  %2173 = vmatprep.subr.bf16.mxu1 %v3300_v1  ;;  %v3374_v0 = vld [vmem:[%s4947_s1 + $0x190] ss:$8 sps:$4 sm:$0xff]  }
  0x35   :  { %2378 = vmatprep.subr.bf16.mxu0 %v3302_v2  ;;  %v3377_v1 = vld [vmem:[%s4947_s1 + $0x690] ss:$8 sps:$4 sm:$0xff]   ;;  %v3382_v2 = vld [vmem:[%s4947_s1 + $0x1a4] ss:$8 sps:$4 sm:$0xff]  }
  0x37   :  { %2174 = vmatpush1.bf16.msra.mxu1 %v3304_v5  ;;  %v3380_v5 = vld [vmem:[%s4947_s1 + $0x1a0] ss:$8 sps:$4 sm:$0xff]  }
  0x38   :  { %2379 = vmatpush1.bf16.msra.mxu0 %v3305_v6  ;;  %2175 = vmatprep.subr.bf16.mxu1 %v3306_v7  ;;  %v3383_v6 = vld [vmem:[%s4947_s1 + $0x6a0] ss:$8 sps:$4 sm:$0xff]   ;;  %v3388_v7 = vld [vmem:[%s4947_s1 + $0x1b4] ss:$8 sps:$4 sm:$0xff]  }
  0x39   :  { %2380 = vmatprep.subr.bf16.mxu0 %v3308_v8  ;;  %v3391_v8 = vld [vmem:[%s4947_s1 + $0x6b4] ss:$8 sps:$4 sm:$0xff]  }
  0x3b   :  { %2176 = vmatpush1.bf16.msra.mxu1 %v3310_v10  ;;  %v3389_v10 = vld [vmem:[%s4947_s1 + $0x6b0] ss:$8 sps:$4 sm:$0xff]  }
  0x3c   :  { %2381 = vmatpush1.bf16.msra.mxu0 %v3311_v11  ;;  %2177 = vmatprep.subr.bf16.mxu1 %v3312_v12  ;;  %v3394_v11 = vld [vmem:[%s4947_s1 + $0x1c4] ss:$8 sps:$4 sm:$0xff]  }
  0x3d   :  { %2382 = vmatprep.subr.bf16.mxu0 %v3314_v13  ;;  %v3397_v12 = vld [vmem:[%s4947_s1 + $0x6c4] ss:$8 sps:$4 sm:$0xff]   ;;  %v3392_v13 = vld [vmem:[%s4947_s1 + $0x1c0] ss:$8 sps:$4 sm:$0xff]  }
  0x3f   :  { %2178 = vmatpush1.bf16.msra.mxu1 %v3316_v16  ;;  %v3395_v16 = vld [vmem:[%s4947_s1 + $0x6c0] ss:$8 sps:$4 sm:$0xff]  }
  0x40   :  { %2383 = vmatpush1.bf16.msra.mxu0 %v3317_v17  ;;  %2188 = vmatprep.subr.bf16.mxu1 %v3321_v18  ;;  %v3400_v17 = vld [vmem:[%s4947_s1 + $0x1d4] ss:$8 sps:$4 sm:$0xff]  }
  0x41   :  { %2393 = vmatprep.subr.bf16.mxu0 %v3325_v19  ;;  %v3403_v18 = vld [vmem:[%s4947_s1 + $0x6d4] ss:$8 sps:$4 sm:$0xff]   ;;  %v3398_v19 = vld [vmem:[%s4947_s1 + $0x1d0] ss:$8 sps:$4 sm:$0xff]  }
  0x42   :  { %2180 = vmatmul.mubr.bf16.vlgmr.msra.gmra.mrb[0].mxu1 %v4026_v21 }
  0x43   :  { %2385 = vmatmul.mubr.bf16.vlgmr.msra.gmra.mrb[0].mxu0 %v460_v22  ;;  %2189 = vmatpush1.bf16.msra.mxu1 %v3319_v23  ;;  %v3406_v22 = vld [vmem:[%s4947_s1 + $0x1e4] ss:$8 sps:$4 sm:$0xff]  }
  0x44   :  { %2394 = vmatpush1.bf16.msra.mxu0 %v3323_v24  ;;  %2190 = vmatprep.subr.bf16.mxu1 %v3328_v25  ;;  %v3409_v23 = vld [vmem:[%s4947_s1 + $0x6e4] ss:$8 sps:$4 sm:$0xff]   ;;  %v366_v24 = vcombine.high %v3940_v52, %v3940_v52  ;;  %v3404_v25 = vld [vmem:[%s4947_s1 + $0x1e0] ss:$8 sps:$4 sm:$0xff]   ;;  %v3415_v52 = vld [vmem:[%s4947_s1 + $0x6f4] ss:$8 sps:$4 sm:$0xff]  }
  0x45   :  { %2395 = vmatprep.subr.bf16.mxu0 %v3331_v26  ;;  %2220 = vmatprep.mubr.bf16.mxu1 %v413_v27  ;;  %v3407_v26 = vld [vmem:[%s4947_s1 + $0x6e0] ss:$8 sps:$4 sm:$0xff]   ;;  %v3412_v27 = vld [vmem:[%s4947_s1 + $0x1f4] ss:$8 sps:$4 sm:$0xff]  }
  0x46   :  { %2425 = vmatprep.mubr.bf16.mxu0 %v4045_v28 }
  0x47   :  { %2191 = vmatpush1.bf16.msra.mxu1 %v3326_v29  ;;  %v4220_v29 = vrot.slane %v366_v24, %v3935_v51  ;;  %v3485_v24 = vld [vmem:[%s4947_s1 + $0x7b0] ss:$8 sps:$4 sm:$0xff]  }
  0x48   :  { %2396 = vmatpush1.bf16.msra.mxu0 %v3329_v30  ;;  %2192 = vmatprep.subr.bf16.mxu1 %v3334_v31  ;;  %v3410_v30 = vld [vmem:[%s4947_s1 + $0x1f0] ss:$8 sps:$4 sm:$0xff]  }
  0x49   :  { %2397 = vmatprep.subr.bf16.mxu0 %v3337_v32  ;;  %v3413_v31 = vld [vmem:[%s4947_s1 + $0x6f0] ss:$8 sps:$4 sm:$0xff]   ;;  %v3418_v32 = vld [vmem:[%s4947_s1 + $0x204] ss:$8 sps:$4 sm:$0xff]  }
  0x4b   :  { %2193 = vmatpush1.bf16.msra.mxu1 %v3332_v33  ;;  %v3421_v33 = vld [vmem:[%s4947_s1 + $0x704] ss:$8 sps:$4 sm:$0xff]  }
  0x4c   :  { %2398 = vmatpush1.bf16.msra.mxu0 %v3335_v34  ;;  %2194 = vmatprep.subr.bf16.mxu1 %v3340_v35  ;;  %v382_v34 = vcombine.high %v4220_v29, %v4220_v29  ;;  %v411_v35 = vcombine.high %v4026_v21, %v4026_v21  ;;  %v3424_v21 = vld [vmem:[%s4947_s1 + $0x214] ss:$8 sps:$4 sm:$0xff]  }
  0x4d   :  { %2399 = vmatprep.subr.bf16.mxu0 %v3343_v36  ;;  %v4240_v36 = vrot.slane %v4006_v14, %v3935_v51  ;;  %v3427_v14 = vld [vmem:[%s4947_s1 + $0x714] ss:$8 sps:$4 sm:$0xff]  }
  0x4f   :  { %2195 = vmatpush1.bf16.msra.mxu1 %v3338_v37  ;;  %v3416_v37 = vld [vmem:[%s4947_s1 + $0x200] ss:$8 sps:$4 sm:$0xff]  }
  0x50   :  { %2400 = vmatpush1.bf16.msra.mxu0 %v3341_v38  ;;  %2196 = vmatprep.subr.bf16.mxu1 %v3346_v39  ;;  %v3419_v38 = vld [vmem:[%s4947_s1 + $0x700] ss:$8 sps:$4 sm:$0xff]   ;;  %v4255_v39 = vrot.slane %v382_v34, %v3935_v51  ;;  %v3502_v34 = vld [vmem:[%s4947_s1 + $0x2e4] ss:$8 sps:$4 sm:$0xff]  }
  0x51   :  { %2401 = vmatprep.subr.bf16.mxu0 %v3349_v40  ;;  %v463_v40 = vcombine.high %v4045_v28, %v4045_v28  ;;  %v3433_v28 = vld [vmem:[%s4947_s1 + $0x724] ss:$8 sps:$4 sm:$0xff]  }
  0x53   :  { %2197 = vmatpush1.bf16.msra.mxu1 %v3344_v41  ;;  %v3422_v41 = vld [vmem:[%s4947_s1 + $0x210] ss:$8 sps:$4 sm:$0xff]  }
  0x54   :  { %2402 = vmatpush1.bf16.msra.mxu0 %v3347_v42  ;;  %2198 = vmatprep.subr.bf16.mxu1 %v3352_v43  ;;  %v3425_v42 = vld [vmem:[%s4947_s1 + $0x710] ss:$8 sps:$4 sm:$0xff]   ;;  %v3430_v43 = vld [vmem:[%s4947_s1 + $0x224] ss:$8 sps:$4 sm:$0xff]  }
  0x55   :  { %2403 = vmatprep.subr.bf16.mxu0 %v3355_v44  ;;  %v3428_v44 = vld [vmem:[%s4947_s1 + $0x220] ss:$8 sps:$4 sm:$0xff]  }
  0x57   :  { %2199 = vmatpush1.bf16.msra.mxu1 %v3350_v46  ;;  %v3431_v46 = vld [vmem:[%s4947_s1 + $0x720] ss:$8 sps:$4 sm:$0xff]  }
  0x58   :  { %2404 = vmatpush1.bf16.msra.mxu0 %v3353_v47  ;;  %2200 = vmatprep.subr.bf16.mxu1 %v3358_v48  ;;  %v3436_v47 = vld [vmem:[%s4947_s1 + $0x234] ss:$8 sps:$4 sm:$0xff]  }
  0x59   :  { %2405 = vmatprep.subr.bf16.mxu0 %v3361_v49  ;;  %v3439_v48 = vld [vmem:[%s4947_s1 + $0x734] ss:$8 sps:$4 sm:$0xff]   ;;  %v3434_v49 = vld [vmem:[%s4947_s1 + $0x230] ss:$8 sps:$4 sm:$0xff]  }
  0x5b   :  { %2201 = vmatpush1.bf16.msra.mxu1 %v3356_v50  ;;  %v3437_v50 = vld [vmem:[%s4947_s1 + $0x730] ss:$8 sps:$4 sm:$0xff]  }
  0x5c   :  { %2406 = vmatpush1.bf16.msra.mxu0 %v3359_v53  ;;  %2202 = vmatprep.subr.bf16.mxu1 %v3364_v54  ;;  %v3442_v53 = vld [vmem:[%s4947_s1 + $0x244] ss:$8 sps:$4 sm:$0xff]  }
  0x5d   :  { %2407 = vmatprep.subr.bf16.mxu0 %v3367_v55  ;;  %v3445_v54 = vld [vmem:[%s4947_s1 + $0x744] ss:$8 sps:$4 sm:$0xff]   ;;  %v3440_v55 = vld [vmem:[%s4947_s1 + $0x240] ss:$8 sps:$4 sm:$0xff]  }
  0x5f   :  { %2203 = vmatpush1.bf16.msra.mxu1 %v3362_v56  ;;  %v3443_v56 = vld [vmem:[%s4947_s1 + $0x740] ss:$8 sps:$4 sm:$0xff]  }
  0x60   :  { %2408 = vmatpush1.bf16.msra.mxu0 %v3365_v57  ;;  %2204 = vmatprep.subr.bf16.mxu1 %v3370_v58  ;;  %v3448_v57 = vld [vmem:[%s4947_s1 + $0x254] ss:$8 sps:$4 sm:$0xff]  }
  0x61   :  { %2409 = vmatprep.subr.bf16.mxu0 %v3373_v59  ;;  %v3451_v58 = vld [vmem:[%s4947_s1 + $0x754] ss:$8 sps:$4 sm:$0xff]   ;;  %v3446_v59 = vld [vmem:[%s4947_s1 + $0x250] ss:$8 sps:$4 sm:$0xff]  }
  0x63   :  { %2205 = vmatpush1.bf16.msra.mxu1 %v3368_v60  ;;  %v3449_v60 = vld [vmem:[%s4947_s1 + $0x750] ss:$8 sps:$4 sm:$0xff]  }
  0x64   :  { %2410 = vmatpush1.bf16.msra.mxu0 %v3371_v61  ;;  %2206 = vmatprep.subr.bf16.mxu1 %v3376_v62  ;;  %v3454_v61 = vld [vmem:[%s4947_s1 + $0x264] ss:$8 sps:$4 sm:$0xff]  }
  0x65   :  { %2411 = vmatprep.subr.bf16.mxu0 %v3379_v63  ;;  %v3457_v62 = vld [vmem:[%s4947_s1 + $0x764] ss:$8 sps:$4 sm:$0xff]   ;;  %v3452_v63 = vld [vmem:[%s4947_s1 + $0x260] ss:$8 sps:$4 sm:$0xff]  }
  0x67   :  { %2207 = vmatpush1.bf16.msra.mxu1 %v3374_v0  ;;  %v3455_v0 = vld [vmem:[%s4947_s1 + $0x760] ss:$8 sps:$4 sm:$0xff]  }
  0x68   :  { %2412 = vmatpush1.bf16.msra.mxu0 %v3377_v1  ;;  %2208 = vmatprep.subr.bf16.mxu1 %v3382_v2  ;;  %v3460_v1 = vld [vmem:[%s4947_s1 + $0x274] ss:$8 sps:$4 sm:$0xff]  }
  0x69   :  { %2413 = vmatprep.subr.bf16.mxu0 %v3385_v4  ;;  %v3463_v2 = vld [vmem:[%s4947_s1 + $0x774] ss:$8 sps:$4 sm:$0xff]   ;;  %v3458_v4 = vld [vmem:[%s4947_s1 + $0x270] ss:$8 sps:$4 sm:$0xff]  }
  0x6b   :  { %2209 = vmatpush1.bf16.msra.mxu1 %v3380_v5  ;;  %v3461_v5 = vld [vmem:[%s4947_s1 + $0x770] ss:$8 sps:$4 sm:$0xff]  }
  0x6c   :  { %2414 = vmatpush1.bf16.msra.mxu0 %v3383_v6  ;;  %2210 = vmatprep.subr.bf16.mxu1 %v3388_v7  ;;  %v3466_v6 = vld [vmem:[%s4947_s1 + $0x284] ss:$8 sps:$4 sm:$0xff]  }
  0x6d   :  { %2415 = vmatprep.subr.bf16.mxu0 %v3391_v8  ;;  %v3469_v7 = vld [vmem:[%s4947_s1 + $0x784] ss:$8 sps:$4 sm:$0xff]   ;;  %v3464_v8 = vld [vmem:[%s4947_s1 + $0x280] ss:$8 sps:$4 sm:$0xff]  }
  0x6f   :  { %2211 = vmatpush1.bf16.msra.mxu1 %v3386_v9  ;;  %v3467_v9 = vld [vmem:[%s4947_s1 + $0x780] ss:$8 sps:$4 sm:$0xff]  }
  0x70   :  { %2416 = vmatpush1.bf16.msra.mxu0 %v3389_v10  ;;  %2212 = vmatprep.subr.bf16.mxu1 %v3394_v11  ;;  %v3472_v10 = vld [vmem:[%s4947_s1 + $0x294] ss:$8 sps:$4 sm:$0xff]  }
  0x71   :  { %2417 = vmatprep.subr.bf16.mxu0 %v3397_v12  ;;  %v3475_v11 = vld [vmem:[%s4947_s1 + $0x794] ss:$8 sps:$4 sm:$0xff]   ;;  %v3470_v12 = vld [vmem:[%s4947_s1 + $0x290] ss:$8 sps:$4 sm:$0xff]  }
  0x73   :  { %2213 = vmatpush1.bf16.msra.mxu1 %v3392_v13  ;;  %v3473_v13 = vld [vmem:[%s4947_s1 + $0x790] ss:$8 sps:$4 sm:$0xff]  }
  0x74   :  { %2418 = vmatpush1.bf16.msra.mxu0 %v3395_v16  ;;  %2214 = vmatprep.subr.bf16.mxu1 %v3400_v17  ;;  %v3478_v16 = vld [vmem:[%s4947_s1 + $0x2a4] ss:$8 sps:$4 sm:$0xff]  }
  0x75   :  { %2419 = vmatprep.subr.bf16.mxu0 %v3403_v18  ;;  %v3481_v17 = vld [vmem:[%s4947_s1 + $0x7a4] ss:$8 sps:$4 sm:$0xff]   ;;  %v3476_v18 = vld [vmem:[%s4947_s1 + $0x2a0] ss:$8 sps:$4 sm:$0xff]  }
  0x77   :  { %2215 = vmatpush1.bf16.msra.mxu1 %v3398_v19  ;;  %v3479_v19 = vld [vmem:[%s4947_s1 + $0x7a0] ss:$8 sps:$4 sm:$0xff]  }
  0x78   :  { %2420 = vmatpush1.bf16.msra.mxu0 %v3401_v20  ;;  %2216 = vmatprep.subr.bf16.mxu1 %v3406_v22  ;;  %v3484_v20 = vld [vmem:[%s4947_s1 + $0x2b4] ss:$8 sps:$4 sm:$0xff]  }
  0x79   :  { %2421 = vmatprep.subr.bf16.mxu0 %v3409_v23  ;;  %v3487_v22 = vld [vmem:[%s4947_s1 + $0x7b4] ss:$8 sps:$4 sm:$0xff]   ;;  %v3482_v23 = vld [vmem:[%s4947_s1 + $0x2b0] ss:$8 sps:$4 sm:$0xff]  }
  0x7b   :  { %2217 = vmatpush1.bf16.msra.mxu1 %v3404_v25  ;;  %v3490_v25 = vld [vmem:[%s4947_s1 + $0x2c4] ss:$8 sps:$4 sm:$0xff]  }
  0x7c   :  { %2422 = vmatpush1.bf16.msra.mxu0 %v3407_v26  ;;  %2218 = vmatprep.subr.bf16.mxu1 %v3412_v27  ;;  %v3493_v26 = vld [vmem:[%s4947_s1 + $0x7c4] ss:$8 sps:$4 sm:$0xff]   ;;  %v3488_v27 = vld [vmem:[%s4947_s1 + $0x2c0] ss:$8 sps:$4 sm:$0xff]  }
  0x7d   :  { %2423 = vmatprep.subr.bf16.mxu0 %v3415_v52  ;;  %v3491_v52 = vld [vmem:[%s4947_s1 + $0x7c0] ss:$8 sps:$4 sm:$0xff]  }
  0x7f   :  { %2219 = vmatpush1.bf16.msra.mxu1 %v3410_v30  ;;  %v3496_v30 = vld [vmem:[%s4947_s1 + $0x2d4] ss:$8 sps:$4 sm:$0xff]  }
  0x80   :  { %2424 = vmatpush1.bf16.msra.mxu0 %v3413_v31  ;;  %2229 = vmatprep.subr.bf16.mxu1 %v3418_v32  ;;  %v3499_v31 = vld [vmem:[%s4947_s1 + $0x7d4] ss:$8 sps:$4 sm:$0xff]   ;;  %v3494_v32 = vld [vmem:[%s4947_s1 + $0x2d0] ss:$8 sps:$4 sm:$0xff]  }
  0x81   :  { %2434 = vmatprep.subr.bf16.mxu0 %v3421_v33  ;;  %v3497_v33 = vld [vmem:[%s4947_s1 + $0x7d0] ss:$8 sps:$4 sm:$0xff]  }
  0x82   :  { %2221 = vmatmul.mubr.bf16.vlgmr.msra.gmra.mrb[0].mxu1 %v411_v35  ;;  %v3505_v35 = vld [vmem:[%s4947_s1 + $0x7e4] ss:$8 sps:$4 sm:$0xff]  }
  0x83   :  { %2426 = vmatmul.mubr.bf16.vlgmr.msra.gmra.mrb[0].mxu0 %v4240_v36  ;;  %2230 = vmatpush1.bf16.msra.mxu1 %v3416_v37  ;;  %v3500_v37 = vld [vmem:[%s4947_s1 + $0x2e0] ss:$8 sps:$4 sm:$0xff]  }
  0x84   :  { %2435 = vmatpush1.bf16.msra.mxu0 %v3419_v38  ;;  %2231 = vmatprep.subr.bf16.mxu1 %v3424_v21  ;;  %v4423_v38 = vld [vmem:[%s4946_s0 + $0x10] sm:$0x1f]  ;;  %v3503_v21 = vld [vmem:[%s4947_s1 + $0x7e0] ss:$8 sps:$4 sm:$0xff]  }
  0x85   :  { %2436 = vmatprep.subr.bf16.mxu0 %v3427_v14  ;;  %2261 = vmatprep.mubr.bf16.mxu1 %v4255_v39  ;;  %v3508_v14 = vld [vmem:[%s4947_s1 + $0x2f4] ss:$8 sps:$4 sm:$0xff]  }
  0x86   :  { %2466 = vmatprep.mubr.bf16.mxu0 %v463_v40  ;;  %v3511_v40 = vld [vmem:[%s4947_s1 + $0x7f4] ss:$8 sps:$4 sm:$0xff]  }
  0x87   :  { %2232 = vmatpush1.bf16.msra.mxu1 %v3422_v41  ;;  %v4436_v41 = vrot.slane %v4423_v38, %v3935_v51 }
  0x88   :  { %2437 = vmatpush1.bf16.msra.mxu0 %v3425_v42  ;;  %2233 = vmatprep.subr.bf16.mxu1 %v3430_v43  ;;  %v3506_v42 = vld [vmem:[%s4947_s1 + $0x2f0] ss:$8 sps:$4 sm:$0xff]  }
  0x89   :  { %2438 = vmatprep.subr.bf16.mxu0 %v3433_v28  ;;  %v3509_v43 = vld [vmem:[%s4947_s1 + $0x7f0] ss:$8 sps:$4 sm:$0xff]   ;;  %v3514_v28 = vld [vmem:[%s4947_s1 + $0x304] ss:$8 sps:$4 sm:$0xff]  }
  0x8b   :  { %2234 = vmatpush1.bf16.msra.mxu1 %v3428_v44  ;;  %v3517_v44 = vld [vmem:[%s4947_s1 + $0x804] ss:$8 sps:$4 sm:$0xff]  }
  0x8c   :  { %2439 = vmatpush1.bf16.msra.mxu0 %v3431_v46  ;;  %2235 = vmatprep.subr.bf16.mxu1 %v3436_v47  ;;  %v479_v46 = vcombine.high %v4436_v41, %v4436_v41  ;;  %v3512_v47 = vld [vmem:[%s4947_s1 + $0x300] ss:$8 sps:$4 sm:$0xff]  }
  0x8d   :  { %2440 = vmatprep.subr.bf16.mxu0 %v3439_v48  ;;  %v4457_v48 = vrot.slane %v4220_v29, %v3935_v51  ;;  %v3523_v29 = vld [vmem:[%s4947_s1 + $0x814] ss:$8 sps:$4 sm:$0xff]  }
  0x8f   :  { %2236 = vmatpush1.bf16.msra.mxu1 %v3434_v49  ;;  %v461_v49 = vcombine.high %v4240_v36, %v4240_v36  ;;  %v4473_v36 = vrot.slane %v479_v46, %v3935_v51 }
  0x90   :  { %2441 = vmatpush1.bf16.msra.mxu0 %v3437_v50  ;;  %2237 = vmatprep.subr.bf16.mxu1 %v3442_v53  ;;  %v3515_v50 = vld [vmem:[%s4947_s1 + $0x800] ss:$8 sps:$4 sm:$0xff]   ;;  %v3520_v53 = vld [vmem:[%s4947_s1 + $0x314] ss:$8 sps:$4 sm:$0xff]  }
  0x91   :  { %2442 = vmatprep.subr.bf16.mxu0 %v3445_v54  ;;  %v414_v54 = vcombine.high %v4255_v39, %v4255_v39  ;;  %v3526_v39 = vld [vmem:[%s4947_s1 + $0x324] ss:$8 sps:$4 sm:$0xff]  }
  0x93   :  { %2238 = vmatpush1.bf16.msra.mxu1 %v3440_v55  ;;  %v3518_v55 = vld [vmem:[%s4947_s1 + $0x310] ss:$8 sps:$4 sm:$0xff]  }
  0x94   :  { %2443 = vmatpush1.bf16.msra.mxu0 %v3443_v56  ;;  %2239 = vmatprep.subr.bf16.mxu1 %v3448_v57  ;;  %v3521_v56 = vld [vmem:[%s4947_s1 + $0x810] ss:$8 sps:$4 sm:$0xff]   ;;  %v3529_v57 = vld [vmem:[%s4947_s1 + $0x824] ss:$8 sps:$4 sm:$0xff]  }
  0x95   :  { %2444 = vmatprep.subr.bf16.mxu0 %v3451_v58  ;;  %v3524_v58 = vld [vmem:[%s4947_s1 + $0x320] ss:$8 sps:$4 sm:$0xff]  }
  0x97   :  { %2240 = vmatpush1.bf16.msra.mxu1 %v3446_v59  ;;  %v3527_v59 = vld [vmem:[%s4947_s1 + $0x820] ss:$8 sps:$4 sm:$0xff]  }
  0x98   :  { %2445 = vmatpush1.bf16.msra.mxu0 %v3449_v60  ;;  %2241 = vmatprep.subr.bf16.mxu1 %v3454_v61  ;;  %v3532_v60 = vld [vmem:[%s4947_s1 + $0x334] ss:$8 sps:$4 sm:$0xff]  }
  0x99   :  { %2446 = vmatprep.subr.bf16.mxu0 %v3457_v62  ;;  %v3535_v61 = vld [vmem:[%s4947_s1 + $0x834] ss:$8 sps:$4 sm:$0xff]   ;;  %v3530_v62 = vld [vmem:[%s4947_s1 + $0x330] ss:$8 sps:$4 sm:$0xff]  }
  0x9b   :  { %2242 = vmatpush1.bf16.msra.mxu1 %v3452_v63  ;;  %v3533_v63 = vld [vmem:[%s4947_s1 + $0x830] ss:$8 sps:$4 sm:$0xff]  }
  0x9c   :  { %2447 = vmatpush1.bf16.msra.mxu0 %v3455_v0  ;;  %2243 = vmatprep.subr.bf16.mxu1 %v3460_v1  ;;  %v3538_v0 = vld [vmem:[%s4947_s1 + $0x344] ss:$8 sps:$4 sm:$0xff]  }
  0x9d   :  { %2448 = vmatprep.subr.bf16.mxu0 %v3463_v2  ;;  %v3541_v1 = vld [vmem:[%s4947_s1 + $0x844] ss:$8 sps:$4 sm:$0xff]   ;;  %v3536_v2 = vld [vmem:[%s4947_s1 + $0x340] ss:$8 sps:$4 sm:$0xff]  }
  0x9f   :  { %2244 = vmatpush1.bf16.msra.mxu1 %v3458_v4  ;;  %v3539_v4 = vld [vmem:[%s4947_s1 + $0x840] ss:$8 sps:$4 sm:$0xff]  }
  0xa0   :  { %2449 = vmatpush1.bf16.msra.mxu0 %v3461_v5  ;;  %2245 = vmatprep.subr.bf16.mxu1 %v3466_v6  ;;  %v3544_v5 = vld [vmem:[%s4947_s1 + $0x354] ss:$8 sps:$4 sm:$0xff]  }
  0xa1   :  { %2450 = vmatprep.subr.bf16.mxu0 %v3469_v7  ;;  %v3547_v6 = vld [vmem:[%s4947_s1 + $0x854] ss:$8 sps:$4 sm:$0xff]   ;;  %v3542_v7 = vld [vmem:[%s4947_s1 + $0x350] ss:$8 sps:$4 sm:$0xff]  }
  0xa3   :  { %2246 = vmatpush1.bf16.msra.mxu1 %v3464_v8  ;;  %v3545_v8 = vld [vmem:[%s4947_s1 + $0x850] ss:$8 sps:$4 sm:$0xff]  }
  0xa4   :  { %2451 = vmatpush1.bf16.msra.mxu0 %v3467_v9  ;;  %2247 = vmatprep.subr.bf16.mxu1 %v3472_v10  ;;  %v3550_v9 = vld [vmem:[%s4947_s1 + $0x364] ss:$8 sps:$4 sm:$0xff]  }
  0xa5   :  { %2452 = vmatprep.subr.bf16.mxu0 %v3475_v11  ;;  %v3553_v10 = vld [vmem:[%s4947_s1 + $0x864] ss:$8 sps:$4 sm:$0xff]   ;;  %v3548_v11 = vld [vmem:[%s4947_s1 + $0x360] ss:$8 sps:$4 sm:$0xff]  }
  0xa7   :  { %2248 = vmatpush1.bf16.msra.mxu1 %v3470_v12  ;;  %v3551_v12 = vld [vmem:[%s4947_s1 + $0x860] ss:$8 sps:$4 sm:$0xff]  }
  0xa8   :  { %2453 = vmatpush1.bf16.msra.mxu0 %v3473_v13  ;;  %2249 = vmatprep.subr.bf16.mxu1 %v3478_v16  ;;  %v3556_v13 = vld [vmem:[%s4947_s1 + $0x374] ss:$8 sps:$4 sm:$0xff]  }
  0xa9   :  { %2454 = vmatprep.subr.bf16.mxu0 %v3481_v17  ;;  %v3559_v16 = vld [vmem:[%s4947_s1 + $0x874] ss:$8 sps:$4 sm:$0xff]   ;;  %v3554_v17 = vld [vmem:[%s4947_s1 + $0x370] ss:$8 sps:$4 sm:$0xff]  }
  0xab   :  { %2250 = vmatpush1.bf16.msra.mxu1 %v3476_v18  ;;  %v3557_v18 = vld [vmem:[%s4947_s1 + $0x870] ss:$8 sps:$4 sm:$0xff]  }
  0xac   :  { %2455 = vmatpush1.bf16.msra.mxu0 %v3479_v19  ;;  %2251 = vmatprep.subr.bf16.mxu1 %v3484_v20  ;;  %v3562_v19 = vld [vmem:[%s4947_s1 + $0x384] ss:$8 sps:$4 sm:$0xff]  }
  0xad   :  { %2456 = vmatprep.subr.bf16.mxu0 %v3487_v22  ;;  %v3565_v20 = vld [vmem:[%s4947_s1 + $0x884] ss:$8 sps:$4 sm:$0xff]   ;;  %v3560_v22 = vld [vmem:[%s4947_s1 + $0x380] ss:$8 sps:$4 sm:$0xff]  }
  0xaf   :  { %2252 = vmatpush1.bf16.msra.mxu1 %v3482_v23  ;;  %v3563_v23 = vld [vmem:[%s4947_s1 + $0x880] ss:$8 sps:$4 sm:$0xff]  }
  0xb0   :  { %2457 = vmatpush1.bf16.msra.mxu0 %v3485_v24  ;;  %2253 = vmatprep.subr.bf16.mxu1 %v3490_v25  ;;  %v3568_v24 = vld [vmem:[%s4947_s1 + $0x394] ss:$8 sps:$4 sm:$0xff]  }
  0xb1   :  { %2458 = vmatprep.subr.bf16.mxu0 %v3493_v26  ;;  %v3571_v25 = vld [vmem:[%s4947_s1 + $0x894] ss:$8 sps:$4 sm:$0xff]   ;;  %v3566_v26 = vld [vmem:[%s4947_s1 + $0x390] ss:$8 sps:$4 sm:$0xff]  }
  0xb3   :  { %2254 = vmatpush1.bf16.msra.mxu1 %v3488_v27  ;;  %v3569_v27 = vld [vmem:[%s4947_s1 + $0x890] ss:$8 sps:$4 sm:$0xff]  }
  0xb4   :  { %2459 = vmatpush1.bf16.msra.mxu0 %v3491_v52  ;;  %2255 = vmatprep.subr.bf16.mxu1 %v3496_v30  ;;  %v3574_v52 = vld [vmem:[%s4947_s1 + $0x3a4] ss:$8 sps:$4 sm:$0xff]  }
  0xb5   :  { %2460 = vmatprep.subr.bf16.mxu0 %v3499_v31  ;;  %v3577_v30 = vld [vmem:[%s4947_s1 + $0x8a4] ss:$8 sps:$4 sm:$0xff]  }
  0xb7   :  { %2256 = vmatpush1.bf16.msra.mxu1 %v3494_v32 }
  0xb8   :  { %2461 = vmatpush1.bf16.msra.mxu0 %v3497_v33  ;;  %2257 = vmatprep.subr.bf16.mxu1 %v3502_v34 }
  0xb9   :  { %2462 = vmatprep.subr.bf16.mxu0 %v3505_v35 }
  0xbb   :  { %2258 = vmatpush1.bf16.msra.mxu1 %v3500_v37 }
  0xbc   :  { %2463 = vmatpush1.bf16.msra.mxu0 %v3503_v21  ;;  %2259 = vmatprep.subr.bf16.mxu1 %v3508_v14 }
  0xbd   :  { %2464 = vmatprep.subr.bf16.mxu0 %v3511_v40 }
  0xbf   :  { %2260 = vmatpush1.bf16.msra.mxu1 %v3506_v42 }
  0xc0   :  { %2465 = vmatpush1.bf16.msra.mxu0 %v3509_v43  ;;  %2270 = vmatprep.subr.bf16.mxu1 %v3514_v28 }
  0xc1   :  { %2475 = vmatprep.subr.bf16.mxu0 %v3517_v44 }
  0xc2   :  { %2262 = vmatmul.mubr.bf16.vlgmr.msra.gmra.mrb[0].mxu1 %v4457_v48 }
  0xc3   :  { %2467 = vmatmul.mubr.bf16.vlgmr.msra.gmra.mrb[0].mxu0 %v461_v49  ;;  %2271 = vmatpush1.bf16.msra.mxu1 %v3512_v47 }
  0xc4   :  { %2476 = vmatpush1.bf16.msra.mxu0 %v3515_v50  ;;  %2272 = vmatprep.subr.bf16.mxu1 %v3520_v53 }
  0xc5   :  { %2477 = vmatprep.subr.bf16.mxu0 %v3523_v29  ;;  %2302 = vmatprep.mubr.bf16.mxu1 %v414_v54 }
  0xc6   :  { %2507 = vmatprep.mubr.bf16.mxu0 %v4473_v36 }
  0xc7   :  { %2273 = vmatpush1.bf16.msra.mxu1 %v3518_v55 }
  0xc8   :  { %2478 = vmatpush1.bf16.msra.mxu0 %v3521_v56  ;;  %2274 = vmatprep.subr.bf16.mxu1 %v3526_v39 }
  0xc9   :  { %2479 = vmatprep.subr.bf16.mxu0 %v3529_v57 }
  0xcb   :  { %2275 = vmatpush1.bf16.msra.mxu1 %v3524_v58 }
  0xcc   :  { %2480 = vmatpush1.bf16.msra.mxu0 %v3527_v59  ;;  %2276 = vmatprep.subr.bf16.mxu1 %v3532_v60 }
  0xcd   :  { %2481 = vmatprep.subr.bf16.mxu0 %v3535_v61 }
  0xcf   :  { %2277 = vmatpush1.bf16.msra.mxu1 %v3530_v62 }
  0xd0   :  { %2482 = vmatpush1.bf16.msra.mxu0 %v3533_v63  ;;  %2278 = vmatprep.subr.bf16.mxu1 %v3538_v0 }
  0xd1   :  { %2483 = vmatprep.subr.bf16.mxu0 %v3541_v1 }
  0xd3   :  { %2279 = vmatpush1.bf16.msra.mxu1 %v3536_v2 }
  0xd4   :  { %2484 = vmatpush1.bf16.msra.mxu0 %v3539_v4  ;;  %2280 = vmatprep.subr.bf16.mxu1 %v3544_v5 }
  0xd5   :  { %2485 = vmatprep.subr.bf16.mxu0 %v3547_v6 }
  0xd7   :  { %2281 = vmatpush1.bf16.msra.mxu1 %v3542_v7 }
  0xd8   :  { %2486 = vmatpush1.bf16.msra.mxu0 %v3545_v8  ;;  %2282 = vmatprep.subr.bf16.mxu1 %v3550_v9 }
  0xd9   :  { %2487 = vmatprep.subr.bf16.mxu0 %v3553_v10 }
  0xdb   :  { %2283 = vmatpush1.bf16.msra.mxu1 %v3548_v11 }
  0xdc   :  { %2488 = vmatpush1.bf16.msra.mxu0 %v3551_v12  ;;  %2284 = vmatprep.subr.bf16.mxu1 %v3556_v13 }
  0xdd   :  { %2489 = vmatprep.subr.bf16.mxu0 %v3559_v16 }
  0xdf   :  { %2285 = vmatpush1.bf16.msra.mxu1 %v3554_v17 }
  0xe0   :  { %2490 = vmatpush1.bf16.msra.mxu0 %v3557_v18  ;;  %2286 = vmatprep.subr.bf16.mxu1 %v3562_v19 }
  0xe1   :  { %2491 = vmatprep.subr.bf16.mxu0 %v3565_v20 }
  0xe3   :  { %2287 = vmatpush1.bf16.msra.mxu1 %v3560_v22 }
  0xe4   :  { %2492 = vmatpush1.bf16.msra.mxu0 %v3563_v23  ;;  %2288 = vmatprep.subr.bf16.mxu1 %v3568_v24 }
  0xe5   :  { %2493 = vmatprep.subr.bf16.mxu0 %v3571_v25 }
  0xe6   :  { %12 = vsyncpa [#allocation3], 0  ;;  %v3572_v31 = vld [vmem:[%s4947_s1 + $0x3a0] ss:$8 sps:$4 sm:$0xff]   ;;  %v3580_v33 = vld [vmem:[%s4947_s1 + $0x3b4] ss:$8 sps:$4 sm:$0xff]   ;;  %v412_v58 = vcombine.high %v4457_v48, %v4457_v48  ;;  %v4661_v59 = vrot.slane %v4436_v41, %v3935_v51  ;;  %v502_v62 = vcombine.high %v4473_v36, %v4473_v36 }
  0xe7   :  { %2289 = vmatpush1.bf16.msra.mxu1 %v3566_v26  ;;  %v3575_v32 = vld [vmem:[%s4947_s1 + $0x8a0] ss:$8 sps:$4 sm:$0xff]   ;;  %v3583_v34 = vld [vmem:[%s4947_s1 + $0x8b4] ss:$8 sps:$4 sm:$0xff]   ;;  %v3578_v35 = vld [vmem:[%s4947_s1 + $0x3b0] ss:$8 sps:$4 sm:$0xff]  }
  0xe8   :  { %2494 = vmatpush1.bf16.msra.mxu0 %v3569_v27  ;;  %2290 = vmatprep.subr.bf16.mxu1 %v3574_v52  ;;  %v3581_v37 = vld [vmem:[%s4947_s1 + $0x8b0] ss:$8 sps:$4 sm:$0xff]   ;;  %v3586_v21 = vld [vmem:[%s4947_s1 + $0x3c4] ss:$8 sps:$4 sm:$0xff]   ;;  %v3584_v40 = vld [vmem:[%s4947_s1 + $0x3c0] ss:$8 sps:$4 sm:$0xff]  }
  0xe9   :  { %2495 = vmatprep.subr.bf16.mxu0 %v3577_v30  ;;  %v3589_v14 = vld [vmem:[%s4947_s1 + $0x8c4] ss:$8 sps:$4 sm:$0xff]   ;;  %v3587_v42 = vld [vmem:[%s4947_s1 + $0x8c0] ss:$8 sps:$4 sm:$0xff]   ;;  %v3592_v43 = vld [vmem:[%s4947_s1 + $0x3d4] ss:$8 sps:$4 sm:$0xff]  }
  0xea   :  { %v3595_v28 = vld [vmem:[%s4947_s1 + $0x8d4] ss:$8 sps:$4 sm:$0xff]   ;;  %v3590_v44 = vld [vmem:[%s4947_s1 + $0x3d0] ss:$8 sps:$4 sm:$0xff]   ;;  %v3598_v47 = vld [vmem:[%s4947_s1 + $0x3e4] ss:$8 sps:$4 sm:$0xff]  }
  0xeb   :  { %2291 = vmatpush1.bf16.msra.mxu1 %v3572_v31  ;;  %v3593_v46 = vld [vmem:[%s4947_s1 + $0x8d0] ss:$8 sps:$4 sm:$0xff]   ;;  %v3601_v49 = vld [vmem:[%s4947_s1 + $0x8e4] ss:$8 sps:$4 sm:$0xff]   ;;  %v3596_v50 = vld [vmem:[%s4947_s1 + $0x3e0] ss:$8 sps:$4 sm:$0xff]  }
  0xec   :  { %2496 = vmatpush1.bf16.msra.mxu0 %v3575_v32  ;;  %2292 = vmatprep.subr.bf16.mxu1 %v3580_v33  ;;  %v3599_v53 = vld [vmem:[%s4947_s1 + $0x8e0] ss:$8 sps:$4 sm:$0xff]   ;;  %v3604_v29 = vld [vmem:[%s4947_s1 + $0x3f4] ss:$8 sps:$4 sm:$0xff]   ;;  %v3602_v55 = vld [vmem:[%s4947_s1 + $0x3f0] ss:$8 sps:$4 sm:$0xff]  }
  0xed   :  { %2497 = vmatprep.subr.bf16.mxu0 %v3583_v34  ;;  %v3607_v54 = vld [vmem:[%s4947_s1 + $0x8f4] ss:$8 sps:$4 sm:$0xff]   ;;  %v3605_v56 = vld [vmem:[%s4947_s1 + $0x8f0] ss:$8 sps:$4 sm:$0xff]   ;;  %v3610_v39 = vld [vmem:[%s4947_s1 + $0x404] ss:$8 sps:$4 sm:$0xff]  }
  0xee   :  { %v3614_v57 = vld [vmem:[%s4947_s1 + $0x904] ss:$8 sps:$4 sm:$0xff]   ;;  %v3608_v60 = vld [vmem:[%s4947_s1 + $0x400] ss:$8 sps:$4 sm:$0xff]   ;;  %v3617_v48 = vld [vmem:[%s4947_s1 + $0x414] ss:$8 sps:$4 sm:$0xff]  }
  0xef   :  { %2293 = vmatpush1.bf16.msra.mxu1 %v3578_v35  ;;  %v3612_v61 = vld [vmem:[%s4947_s1 + $0x900] ss:$8 sps:$4 sm:$0xff]   ;;  %v3620_v41 = vld [vmem:[%s4947_s1 + $0x914] ss:$8 sps:$4 sm:$0xff]   ;;  %v3615_v63 = vld [vmem:[%s4947_s1 + $0x410] ss:$8 sps:$4 sm:$0xff]  }
  0xf0   :  { %2498 = vmatpush1.bf16.msra.mxu0 %v3581_v37  ;;  %2294 = vmatprep.subr.bf16.mxu1 %v3586_v21  ;;  %v3618_v0 = vld [vmem:[%s4947_s1 + $0x910] ss:$8 sps:$4 sm:$0xff]   ;;  %v3623_v1 = vld [vmem:[%s4947_s1 + $0x424] ss:$8 sps:$4 sm:$0xff]   ;;  %v3621_v2 = vld [vmem:[%s4947_s1 + $0x420] ss:$8 sps:$4 sm:$0xff]  }
  0xf1   :  { %2499 = vmatprep.subr.bf16.mxu0 %v3589_v14  ;;  %v3626_v36 = vld [vmem:[%s4947_s1 + $0x924] ss:$8 sps:$4 sm:$0xff]   ;;  %v3624_v4 = vld [vmem:[%s4947_s1 + $0x920] ss:$8 sps:$4 sm:$0xff]   ;;  %v3629_v5 = vld [vmem:[%s4947_s1 + $0x434] ss:$8 sps:$4 sm:$0xff]  }
  0xf2   :  { %v3627_v6 = vld [vmem:[%s4947_s1 + $0x430] ss:$8 sps:$4 sm:$0xff]   ;;  %v3635_v8 = vld [vmem:[%s4947_s1 + $0x444] ss:$8 sps:$4 sm:$0xff]   ;;  %v3633_v10 = vld [vmem:[%s4947_s1 + $0x440] ss:$8 sps:$4 sm:$0xff]  }
  0xf3   :  { %2295 = vmatpush1.bf16.msra.mxu1 %v3584_v40  ;;  %v3630_v7 = vld [vmem:[%s4947_s1 + $0x930] ss:$8 sps:$4 sm:$0xff]   ;;  %v3638_v9 = vld [vmem:[%s4947_s1 + $0x944] ss:$8 sps:$4 sm:$0xff]   ;;  %v3636_v11 = vld [vmem:[%s4947_s1 + $0x940] ss:$8 sps:$4 sm:$0xff]  }
  0xf4   :  { %2500 = vmatpush1.bf16.msra.mxu0 %v3587_v42  ;;  %2296 = vmatprep.subr.bf16.mxu1 %v3592_v43  ;;  %v3641_v12 = vld [vmem:[%s4947_s1 + $0x454] ss:$8 sps:$4 sm:$0xff]   ;;  %v3639_v16 = vld [vmem:[%s4947_s1 + $0x450] ss:$8 sps:$4 sm:$0xff]   ;;  %v3647_v18 = vld [vmem:[%s4947_s1 + $0x464] ss:$8 sps:$4 sm:$0xff]  }
  0xf5   :  { %2501 = vmatprep.subr.bf16.mxu0 %v3595_v28  ;;  %v3644_v13 = vld [vmem:[%s4947_s1 + $0x954] ss:$8 sps:$4 sm:$0xff]   ;;  %v3642_v17 = vld [vmem:[%s4947_s1 + $0x950] ss:$8 sps:$4 sm:$0xff]   ;;  %v3650_v19 = vld [vmem:[%s4947_s1 + $0x964] ss:$8 sps:$4 sm:$0xff]  }
  0xf6   :  { %v3645_v20 = vld [vmem:[%s4947_s1 + $0x460] ss:$8 sps:$4 sm:$0xff]   ;;  %v3653_v23 = vld [vmem:[%s4947_s1 + $0x474] ss:$8 sps:$4 sm:$0xff]   ;;  %v3651_v25 = vld [vmem:[%s4947_s1 + $0x470] ss:$8 sps:$4 sm:$0xff]  }
  0xf7   :  { %2297 = vmatpush1.bf16.msra.mxu1 %v3590_v44  ;;  %v3648_v22 = vld [vmem:[%s4947_s1 + $0x960] ss:$8 sps:$4 sm:$0xff]   ;;  %v3656_v24 = vld [vmem:[%s4947_s1 + $0x974] ss:$8 sps:$4 sm:$0xff]   ;;  %v3654_v26 = vld [vmem:[%s4947_s1 + $0x970] ss:$8 sps:$4 sm:$0xff]  }
  0xf8   :  { %2502 = vmatpush1.bf16.msra.mxu0 %v3593_v46  ;;  %2298 = vmatprep.subr.bf16.mxu1 %v3598_v47  ;;  %v3659_v27 = vld [vmem:[%s4947_s1 + $0x484] ss:$8 sps:$4 sm:$0xff]   ;;  %v3657_v30 = vld [vmem:[%s4947_s1 + $0x480] ss:$8 sps:$4 sm:$0xff]   ;;  %v3665_v32 = vld [vmem:[%s4947_s1 + $0x494] ss:$8 sps:$4 sm:$0xff]  }
  0xf9   :  { %2503 = vmatprep.subr.bf16.mxu0 %v3601_v49  ;;  %v3662_v52 = vld [vmem:[%s4947_s1 + $0x984] ss:$8 sps:$4 sm:$0xff]   ;;  %v3660_v31 = vld [vmem:[%s4947_s1 + $0x980] ss:$8 sps:$4 sm:$0xff]   ;;  %v3668_v33 = vld [vmem:[%s4947_s1 + $0x994] ss:$8 sps:$4 sm:$0xff]  }
  0xfa   :  { %v3663_v34 = vld [vmem:[%s4947_s1 + $0x490] ss:$8 sps:$4 sm:$0xff]   ;;  %v3671_v37 = vld [vmem:[%s4947_s1 + $0x4a4] ss:$8 sps:$4 sm:$0xff]   ;;  %v3669_v14 = vld [vmem:[%s4947_s1 + $0x4a0] ss:$8 sps:$4 sm:$0xff]  }
  0xfb   :  { %2299 = vmatpush1.bf16.msra.mxu1 %v3596_v50  ;;  %v3666_v35 = vld [vmem:[%s4947_s1 + $0x990] ss:$8 sps:$4 sm:$0xff]   ;;  %v3674_v21 = vld [vmem:[%s4947_s1 + $0x9a4] ss:$8 sps:$4 sm:$0xff]   ;;  %v3672_v40 = vld [vmem:[%s4947_s1 + $0x9a0] ss:$8 sps:$4 sm:$0xff]  }
  0xfc   :  { %2504 = vmatpush1.bf16.msra.mxu0 %v3599_v53  ;;  %2300 = vmatprep.subr.bf16.mxu1 %v3604_v29  ;;  %v3677_v42 = vld [vmem:[%s4947_s1 + $0x4b4] ss:$8 sps:$4 sm:$0xff]   ;;  %v3675_v28 = vld [vmem:[%s4947_s1 + $0x4b0] ss:$8 sps:$4 sm:$0xff]   ;;  %v3683_v46 = vld [vmem:[%s4947_s1 + $0x4c4] ss:$8 sps:$4 sm:$0xff]  }
  0xfd   :  { %2505 = vmatprep.subr.bf16.mxu0 %v3607_v54  ;;  %v3680_v43 = vld [vmem:[%s4947_s1 + $0x9b4] ss:$8 sps:$4 sm:$0xff]   ;;  %v3678_v44 = vld [vmem:[%s4947_s1 + $0x9b0] ss:$8 sps:$4 sm:$0xff]   ;;  %v3686_v47 = vld [vmem:[%s4947_s1 + $0x9c4] ss:$8 sps:$4 sm:$0xff]  }
  0xfe   :  { %v3681_v49 = vld [vmem:[%s4947_s1 + $0x4c0] ss:$8 sps:$4 sm:$0xff]   ;;  %v3689_v53 = vld [vmem:[%s4947_s1 + $0x4d4] ss:$8 sps:$4 sm:$0xff]   ;;  %v3687_v54 = vld [vmem:[%s4947_s1 + $0x4d0] ss:$8 sps:$4 sm:$0xff]  }
  0xff   :  { %2301 = vmatpush1.bf16.msra.mxu1 %v3602_v55  ;;  %v3684_v50 = vld [vmem:[%s4947_s1 + $0x9c0] ss:$8 sps:$4 sm:$0xff]   ;;  %v3692_v29 = vld [vmem:[%s4947_s1 + $0x9d4] ss:$8 sps:$4 sm:$0xff]   ;;  %v3690_v55 = vld [vmem:[%s4947_s1 + $0x9d0] ss:$8 sps:$4 sm:$0xff]  }
 0x100   :  { %2506 = vmatpush1.bf16.msra.mxu0 %v3605_v56  ;;  %2311 = vmatprep.subr.bf16.mxu1 %v3610_v39  ;;  %v3695_v56 = vld [vmem:[%s4947_s1 + $0x4e4] ss:$8 sps:$4 sm:$0xff]   ;;  %vm2143_vm0 = vcmask 261120   ;;  %vm2777_vm1 = vcmask 41984   ;;  %s3757_s23 = smov 122   ;;  %vm2794_vm2 = vcmask 1024  }
 0x101   :  { %2516 = vmatprep.subr.bf16.mxu0 %v3614_v57  ;;  %v3698_v39 = vld [vmem:[%s4947_s1 + $0x9e4] ss:$8 sps:$4 sm:$0xff]   ;;  %v3693_v57 = vld [vmem:[%s4947_s1 + $0x4e0] ss:$8 sps:$4 sm:$0xff]  }
 0x102   :  { %2303 = vmatmul.mubr.bf16.vlgmr.msra.gmra.mrb[0].mxu1 %v412_v58  ;;  %v3696_v58 = vld [vmem:[%s4947_s1 + $0x9e0] ss:$8 sps:$4 sm:$0xff]  }
 0x103   :  { %2508 = vmatmul.mubr.bf16.vlgmr.msra.gmra.mrb[0].mxu0 %v4661_v59  ;;  %2312 = vmatpush1.bf16.msra.mxu1 %v3608_v60  ;;  %v3701_v60 = vld [vmem:[%s4947_s1 + $0x4f4] ss:$8 sps:$4 sm:$0xff]  }
 0x104   :  { %2517 = vmatpush1.bf16.msra.mxu0 %v3612_v61  ;;  %2313 = vmatprep.subr.bf16.mxu1 %v3617_v48  ;;  %v3704_v61 = vld [vmem:[%s4947_s1 + $0x9f4] ss:$8 sps:$4 sm:$0xff]   ;;  %v3699_v48 = vld [vmem:[%s4947_s1 + $0x4f0] ss:$8 sps:$4 sm:$0xff]  }
 0x105   :  { %2518 = vmatprep.subr.bf16.mxu0 %v3620_v41  ;;  %2343 = vmatprep.mubr.bf16.mxu1 %v3976_v3  ;;  %v3632_v3 = vld [vmem:[%s4947_s1 + $0x934] ss:$8 sps:$4 sm:$0xff]   ;;  %v3702_v41 = vld [vmem:[%s4947_s1 + $0x9f0] ss:$8 sps:$4 sm:$0xff]  }
 0x106   :  { %2548 = vmatprep.mubr.bf16.mxu0 %v502_v62  ;;  %v3707_v62 = vld [vmem:[%s4947_s1 + $0xa04] ss:$8 sps:$4 sm:$0xff]  }
 0x107   :  { %2314 = vmatpush1.bf16.msra.mxu1 %v3615_v63  ;;  %v3711_v63 = vld [vmem:[%s4949_s3 + $0x40] sm:$0xff]  }
 0x108   :  { %2519 = vmatpush1.bf16.msra.mxu0 %v3618_v0  ;;  %2315 = vmatprep.subr.bf16.mxu1 %v3623_v1  ;;  %v501_v0 = vcombine.high %v4661_v59, %v4661_v59  ;;  %v3705_v1 = vld [vmem:[%s4947_s1 + $0xa00] ss:$8 sps:$4 sm:$0xff]  }
 0x109   :  { %2520 = vmatprep.subr.bf16.mxu0 %v3626_v36  ;;  %v3710_v36 = vld [vmem:[%s4947_s1 + $0xa14] ss:$8 sps:$4 sm:$0xff]   ;;  %v3713_v59 = vld [vmem:[%s4949_s3 + $0x48] sm:$0xff]  }
 0x10b   :  { %2316 = vmatpush1.bf16.msra.mxu1 %v3621_v2  ;;  %v3712_v2 = vld [vmem:[%s4949_s3] sm:$0xff]  }
 0x10c   :  { %2521 = vmatpush1.bf16.msra.mxu0 %v3624_v4  ;;  %2317 = vmatprep.subr.bf16.mxu1 %v3629_v5  ;;  %v464_v4 = vcombine.high %v4423_v38, %v4423_v38  ;;  %v3708_v5 = vld [vmem:[%s4947_s1 + $0xa10] ss:$8 sps:$4 sm:$0xff]  }
 0x10d   :  { %2522 = vmatprep.subr.bf16.mxu0 %v3632_v3  ;;  %v3756_v3 = vmov 0   ;;  %v3715_v38 = vld [vmem:[%s4949_s3 + $0x50] sm:$0xff]  }
 0x10f   :  { %2318 = vmatpush1.bf16.msra.mxu1 %v3627_v6  ;;  %v3714_v6 = vld [vmem:[%s4949_s3 + $0x8] sm:$0xff]  }
 0x110   :  { %2523 = vmatpush1.bf16.msra.mxu0 %v3630_v7  ;;  %2319 = vmatprep.subr.bf16.mxu1 %v3635_v8  ;;  %v3716_v7 = vld [vmem:[%s4949_s3 + $0x10] sm:$0xff]  }
 0x111   :  { %2524 = vmatprep.subr.bf16.mxu0 %v3638_v9  ;;  %v3717_v9 = vld [vmem:[%s4949_s3 + $0x58] sm:$0xff]  }
 0x113   :  { %2320 = vmatpush1.bf16.msra.mxu1 %v3633_v10  ;;  %v3718_v10 = vld [vmem:[%s4949_s3 + $0x18] sm:$0xff]  }
 0x114   :  { %2525 = vmatpush1.bf16.msra.mxu0 %v3636_v11  ;;  %2321 = vmatprep.subr.bf16.mxu1 %v3641_v12  ;;  %v3719_v11 = vld [vmem:[%s4949_s3 + $0x60] sm:$0xff]   ;;  %v3721_v12 = vld [vmem:[%s4949_s3 + $0x68] sm:$0xff]  }
 0x115   :  { %2526 = vmatprep.subr.bf16.mxu0 %v3644_v13  ;;  %v3722_v13 = vld [vmem:[%s4949_s3 + $0x28] sm:$0xff]  }
 0x117   :  { %2322 = vmatpush1.bf16.msra.mxu1 %v3639_v16  ;;  %v3723_v16 = vld [vmem:[%s4949_s3 + $0x70] sm:$0xff]  }
 0x118   :  { %2527 = vmatpush1.bf16.msra.mxu0 %v3642_v17  ;;  %2323 = vmatprep.subr.bf16.mxu1 %v3647_v18  ;;  %v3724_v17 = vld [vmem:[%s4949_s3 + $0x30] sm:$0xff]   ;;  %v3725_v18 = vld [vmem:[%s4949_s3 + $0x78] sm:$0xff]  }
 0x119   :  { %2528 = vmatprep.subr.bf16.mxu0 %v3650_v19  ;;  %v3726_v19 = vld [vmem:[%s4949_s3 + $0x38] sm:$0xff]  }
 0x11b   :  { %2324 = vmatpush1.bf16.msra.mxu1 %v3645_v20 }
 0x11c   :  { %2529 = vmatpush1.bf16.msra.mxu0 %v3648_v22  ;;  %2325 = vmatprep.subr.bf16.mxu1 %v3653_v23 }
 0x11d   :  { %2530 = vmatprep.subr.bf16.mxu0 %v3656_v24  ;;  %v355_v24 = vsub.s32 0, %v3920_v45 }
 0x11f   :  { %2326 = vmatpush1.bf16.msra.mxu1 %v3651_v25 }
 0x120   :  { %2531 = vmatpush1.bf16.msra.mxu0 %v3654_v26  ;;  %2327 = vmatprep.subr.bf16.mxu1 %v3659_v27  ;;  %v351_v26 = vld [vmem:[%s4948_s2] sm:$0x3]  ;;  %v359_v27 = vsub.s32 1, %v3920_v45 }
 0x121   :  { %2532 = vmatprep.subr.bf16.mxu0 %v3662_v52  ;;  %v356_v52 = vrot.slane %v351_v26, %v355_v24  ;;  %v3139_v45 = vld [vmem:[%s4950_s4] ss:$0 sm:$0xff]  ;;  %s3758_s4 = smov [#allocation2]  }
 0x122   :  { %s2802_s26 = sshll.u32 %s3758_s4, 4  ;;  %s2803_s26 = int_to_ptr.vmem [resolvable:$true] %s2802_s26 }
 0x123   :  { %2328 = vmatpush1.bf16.msra.mxu1 %v3657_v30  ;;  %v360_v30 = vrot.slane %v351_v26, %v359_v27  ;;  %s3731_s1 = scalar_lea.vmem %s2803_s26, 32  ;;  %p3736_p1 = scmp.lt.s32.totalorder %s2803_s26, %s2803_s26 }
 0x124   :  { %2533 = vmatpush1.bf16.msra.mxu0 %v3660_v31  ;;  %2329 = vmatprep.subr.bf16.mxu1 %v3665_v32  ;;  %p3732_p0 = scmp.ne.s32.totalorder %s2803_s26, %s3731_s1  ;;  %p3737_p2 = scmp.lt.s32.totalorder %s3731_s1, %s3731_s1 }
 0x125   :  { %2534 = vmatprep.subr.bf16.mxu0 %v3668_v33 }
 0x126   :  { %p3738_p3 = por %p3737_p2, %p3736_p1 }
 0x127   :  { %2330 = vmatpush1.bf16.msra.mxu1 %v3663_v34 }
 0x128   :  { %2535 = vmatpush1.bf16.msra.mxu0 %v3666_v35  ;;  %2331 = vmatprep.subr.bf16.mxu1 %v3671_v37  ;;  %p3739_p4 = pnand %p3738_p3, %p3732_p0 }
 0x129   :  { %2536 = vmatprep.subr.bf16.mxu0 %v3674_v21 }
 0x12b   :  { %2332 = vmatpush1.bf16.msra.mxu1 %v3669_v14 }
 0x12c   :  { %2537 = vmatpush1.bf16.msra.mxu0 %v3672_v40  ;;  %2333 = vmatprep.subr.bf16.mxu1 %v3677_v42 }
 0x12d   :  { %2538 = vmatprep.subr.bf16.mxu0 %v3680_v43 }
 0x12f   :  { %2334 = vmatpush1.bf16.msra.mxu1 %v3675_v28 }
 0x130   :  { %2539 = vmatpush1.bf16.msra.mxu0 %v3678_v44  ;;  %2335 = vmatprep.subr.bf16.mxu1 %v3683_v46 }
 0x131   :  { %2540 = vmatprep.subr.bf16.mxu0 %v3686_v47 }
 0x133   :  { %2336 = vmatpush1.bf16.msra.mxu1 %v3681_v49 }
 0x134   :  { %2541 = vmatpush1.bf16.msra.mxu0 %v3684_v50  ;;  %2337 = vmatprep.subr.bf16.mxu1 %v3689_v53 }
 0x135   :  { %2542 = vmatprep.subr.bf16.mxu0 %v3692_v29 }
 0x137   :  { %2338 = vmatpush1.bf16.msra.mxu1 %v3687_v54 }
 0x138   :  { %2543 = vmatpush1.bf16.msra.mxu0 %v3690_v55  ;;  %2339 = vmatprep.subr.bf16.mxu1 %v3695_v56 }
 0x139   :  { %2544 = vmatprep.subr.bf16.mxu0 %v3698_v39 }
 0x13b   :  { %2340 = vmatpush1.bf16.msra.mxu1 %v3693_v57 }
 0x13c   :  { %2545 = vmatpush1.bf16.msra.mxu0 %v3696_v58  ;;  %2341 = vmatprep.subr.bf16.mxu1 %v3701_v60 }
 0x13d   :  { %2546 = vmatprep.subr.bf16.mxu0 %v3704_v61 }
 0x13f   :  { %2342 = vmatpush1.bf16.msra.mxu1 %v3699_v48 }
 0x140   :  { %2547 = vmatpush1.bf16.msra.mxu0 %v3702_v41  ;;  %3156 = vmatprep.subr.bf16.mxu1 %v3711_v63 }
 0x141   :  { %2557 = vmatprep.subr.bf16.mxu0 %v3707_v62 }
 0x142   :  { %2344 = vmatmul.mubr.bf16.vlgmr.msra.gmra.mrb[0].mxu1 %v4009_v15  ;;  %v478_v15 = vrot.slane %v464_v4, %v3935_v51 }
 0x143   :  { %2549 = vmatmul.mubr.bf16.vlgmr.msra.gmra.mrb[0].mxu0 %v501_v0  ;;  %3157 = vmatpush3.bf16.msra.mxu1 %v3712_v2 }
 0x144   :  { %2558 = vmatpush1.bf16.msra.mxu0 %v3705_v1  ;;  %2589 = vmatprep.mubr.bf16.mxu0 %v3756_v3  ;;  %v493_v8 = vrot.slane %v478_v15, %v3935_v51  ;;  %v3720_v51 = vld [vmem:[%s4949_s3 + $0x20] sm:$0xff]  }
 0x145   :  { %2559 = vmatprep.subr.bf16.mxu0 %v3710_v36  ;;  %3158 = vmatprep.subr.bf16.mxu1 %v3713_v59 }
 0x147   :  { %3159 = vmatpush3.bf16.msra.mxu1 %v3714_v6 }
 0x148   :  { %2560 = vmatpush1.bf16.msra.mxu0 %v3708_v5  ;;  %3160 = vmatprep.subr.bf16.mxu1 %v3715_v38 }
 0x14b   :  { %3161 = vmatpush3.bf16.msra.mxu1 %v3716_v7 }
 0x14c   :  { %3162 = vmatprep.subr.bf16.mxu1 %v3717_v9 }
 0x14f   :  { %3138 = vmatmul.mubr.msk.bf16.vlgmr.msra.gmra.mrb[0].mxu0 %vm2143_vm0, %v493_v8  ;;  %3163 = vmatpush3.bf16.msra.mxu1 %v3718_v10 }
 0x150   :  { %3164 = vmatprep.subr.bf16.mxu1 %v3719_v11 }
 0x153   :  { %3165 = vmatpush3.bf16.msra.mxu1 %v3720_v51 }
 0x154   :  { %3166 = vmatprep.subr.bf16.mxu1 %v3721_v12 }
 0x157   :  { %3167 = vmatpush3.bf16.msra.mxu1 %v3722_v13 }
 0x158   :  { %3168 = vmatprep.subr.bf16.mxu1 %v3723_v16 }
 0x15b   :  { %3169 = vmatpush3.bf16.msra.mxu1 %v3724_v17 }
 0x15c   :  { %3170 = vmatprep.subr.bf16.mxu1 %v3725_v18 }
 0x15f   :  { %3171 = vmatpush3.bf16.msra.mxu1 %v3726_v19 }
 0x215   :  { %v2345_v20 = vpop.f32.mrb[0].mxu1 }
 0x216   :  { %v2347_v22 = vpop.f32.mrb[1].mxu1  ;;  %v3178_v31 = vadd.f32 %v2345_v20, %v356_v52 }
 0x217   :  { %v2349_v23 = vpop.f32.mrb[2].mxu1  ;;  %v3180_v32 = vadd.f32 %v2347_v22, %v360_v30 }
 0x218   :  { %v2350_v25 = vpop.f32.mrb[3].mxu1 }
 0x222   :  { %v2591_v33 = vpop.f32.mrb[0].mxu0 }
 0x223   :  { %v3179_v34 = vadd.f32 %v3178_v31, %v2591_v33  ;;  %v2593_v35 = vpop.f32.mrb[1].mxu0 }
 0x224   :  { %v3181_v37 = vadd.f32 %v3180_v32, %v2593_v35  ;;  %v2595_v21 = vpop.f32.mrb[2].mxu0 }
 0x225   :  { %v2598_v14 = vmax.f32 %v3179_v34, 0.0  ;;  %v2596_v40 = vpop.f32.mrb[3].mxu0 }
 0x226   :  { %v2599_v42 = vmax.f32 %v3181_v37, 0.0 }
 0x227   :  { %v2600_v28 = vpack.c.bf16 %v2598_v14, %v2598_v14 }
 0x228   :  { %v2601_v43 = vpack.c.bf16 %v2599_v42, %v2599_v42 }
 0x22a   :  { %2769 = vmatprep.mubr.bf16.mxu1 %v2601_v43 }
 0x22b   :  { %2770 = vmatmul.mubr.bf16.vlgmr.msra.gmra.mrb[4].mxu1 %v2600_v28 }
 0x2fe   :  { %v3172_v44 = vpop.f32.mrb[4].mxu1 }
 0x2ff   :  { %v3173_v46 = vpop.f32.mrb[5].mxu1 }
 0x300   :  { %v3174_v47 = vadd.f32 %v3173_v46, %v3172_v44  ;;  %v3175_v49 = vpop.f32.mrb[6].mxu1 }
 0x301   :  { %v3176_v50 = vpop.f32.mrb[7].mxu1 }
 0x302   :  { %v2772_v53 = vadd.f32 %v3174_v47, %v3139_v45 }
 0x304   :  { %2791 = vrot.lane.b32.xlu1 %v2772_v53, %s3757_s23  ;;  %v2778_v29 = vsel %vm2777_vm1, %v2772_v53, -inf }
 0x305   :  { %2779 = vmax.xlane.f32.xlu0 %v2778_v29 }
 0x376   :  { %v2792_v54 = vpop.permute.xlu1 %2791 }
 0x377   :  { %2795 = vst.msk [vmem:[%s4952_s6] sm:$0x3] %vm2794_vm2, %v2792_v54 }
 0x392   :  { %v2780_v55 = vpop.xlane.xlu0 %2779 }
 0x393   :  { %v2781_v56 = vsub.f32 %v2772_v53, %v2780_v55 }
 0x395   :  { %v2782_v39 = vmul.f32 1.442695, %v2781_v56 }
 0x397   :  { %3727 = vpow2.f32 %v2782_v39 }
 0x3a1   :  { %v3728_v57 = vpop.eup %3727 }
 0x3a2   :  { %v2784_v58 = vsel %vm2777_vm1, %v3728_v57, 0.0 }
 0x3a3   :  { %2785 = vadd.xlane.f32.xlu0 %v2784_v58 }
 0x430   :  { %v2786_v60 = vpop.xlane.xlu0 %2785 }
 0x431   :  { %3729 = vrcp.f32 %v2786_v60 }
 0x43b   :  { %v3730_v61 = vpop.eup %3729 }
 0x43c   :  { %v2788_v48 = vmul.f32 %v3730_v61, %v3728_v57 }
 0x43e   :  { %2789 = vst.msk [vmem:[#allocation2] sm:$0x3] %vm2777_vm1, %v2788_v48 }
 0x43f   :  { %3742 = shalt.err (!%p3739_p4)
}
 0x440   :  { %s3743_s28 = scalar_lea.hbm %s4951_s5, 32 }
 0x441   :  { %p3744_p5 = scmp.ne.s32.totalorder %s4951_s5, %s3743_s28  ;;  %p3747_p6 = scmp.lt.u32.totalorder %s3743_s28, %s4951_s5 }
 0x443   :  { %p3749_p7 = pnand %p3747_p6, %p3744_p5 }
 0x445   :  { %3752 = shalt.err (!%p3749_p7)
}
 0x446   :  { %2805 = dma.vmem_to_hbm [thread:$0]  %s2803_s26, 32, %s4951_s5, [#allocation3]  }
 0x447   :  { %3753 = dma.done.wait [#allocation3], 32  }
 0x448   :  { %3754 = vsyncadd [#allocation3], 4294967264 }
 0x449   :  { %2813 = vsyncpa [#allocation3], 1 }

</bundles_post_ra>
